<compile_context>
chip_gen: v5e
topology: v5e:2x2
jax: 0.10.0
libtpu: 0.0.40
codegen_flags: <defaults>
</compile_context>

<pallas_src>
import jax
import jax.numpy as jnp
from jax import lax
from jax.experimental import pallas as pl
from jax.experimental.pallas import tpu as pltpu

PAD_token = 1  # as in TRADE; embedding padding row is re-randomized by .normal_()


# ----------------------------------------------------------------------------
# Pallas kernel: bidirectional single-layer GRU recurrence, K time steps per
# grid step.  Forward direction walks times [blk*K, blk*K+K); backward walks
# times [Tp-1-blk*K, ...) downward using time-reversed gi/out blocks.
# ----------------------------------------------------------------------------
def _bigru_kernel(lengths_ref, gi_f_ref, gi_b_ref,
                  whh_f_hbm, whh_b_hbm, bhn_f_ref, bhn_b_ref,
                  out_f_ref, out_b_ref, h_sum_ref,
                  whh_f_vmem, whh_b_vmem, dma_sems, h_fwd, h_bwd):
    blk = pl.program_id(0)
    nblk = pl.num_programs(0)
    K = gi_f_ref.shape[0]
    Bp, Hp = h_fwd.shape
    Tp = nblk * K

    @pl.when(blk == 0)
    def _():
        # DMA W_hh for both directions into VMEM once; they stay resident for
        # the whole grid (single-buffered weight residency, not double-buffered
        # constant BlockSpec blocks).
        cf = pltpu.make_async_copy(whh_f_hbm, whh_f_vmem, dma_sems.at[0])
        cb = pltpu.make_async_copy(whh_b_hbm, whh_b_vmem, dma_sems.at[1])
        cf.start()
        cb.start()
        cf.wait()
        cb.wait()
        # nn.GRU hidden init = zeros (get_state)
        h_fwd[...] = jnp.zeros_like(h_fwd)
        h_bwd[...] = jnp.zeros_like(h_bwd)

    lengths = lengths_ref[...]                      # (Bp, 1) int32
    whh_f = whh_f_vmem[...]                         # (Hp, 3Hp) bf16, resident
    whh_b = whh_b_vmem[...]
    # Hoist bias broadcasts out of the time loop (JAX does not CSE broadcast_in_dim).
    bhn_f = jnp.broadcast_to(bhn_f_ref[...], (Bp, Hp))
    bhn_b = jnp.broadcast_to(bhn_b_ref[...], (Bp, Hp))

    def gru_step(gi, h, whh, bhn):
        # gi = x @ W_ih^T + b_ih + [b_hr, b_hz, 0] was precomputed outside; only
        # the recurrent matmul is on the serial path.  Gates stacked [r, z, n].
        gh = jnp.dot(h.astype(jnp.bfloat16), whh,
                     preferred_element_type=jnp.float32)        # (Bp, 3Hp) f32
        r = jax.nn.sigmoid(gi[:, 0:Hp] + gh[:, 0:Hp])
        z = jax.nn.sigmoid(gi[:, Hp:2 * Hp] + gh[:, Hp:2 * Hp])
        n = jnp.tanh(gi[:, 2 * Hp:3 * Hp] + r * (gh[:, 2 * Hp:3 * Hp] + bhn))
        return n + z * (h - n)                       # == (1 - z) * n + z * h

    t0 = blk * K

    def body(k, carry):
        hf, hb = carry
        # ---- forward direction, global time t0 + k ----
        valid_f = (t0 + k) < lengths                              # (Bp, 1) bool
        hf = jnp.where(valid_f, gru_step(gi_f_ref[k], hf, whh_f, bhn_f), hf)
        out_f_ref[k] = jnp.where(valid_f, hf, 0.0).astype(out_f_ref.dtype)

        # ---- backward direction, global time Tp - 1 - (t0 + k) ----
        kb = K - 1 - k
        valid_b = (Tp - 1 - t0 - k) < lengths
        hb = jnp.where(valid_b, gru_step(gi_b_ref[kb], hb, whh_b, bhn_b), hb)
        out_b_ref[kb] = jnp.where(valid_b, hb, 0.0).astype(out_b_ref.dtype)
        return hf, hb

    init = (h_fwd[...], h_bwd[...])
    if K <= 8:
        hf, hb = init
        for k in range(K):                      # small static loop, fully unrolled
            hf, hb = body(k, (hf, hb))
    else:
        # Bounds live ranges / vreg pressure at large K while keeping LLO visibility.
        hf, hb = lax.fori_loop(0, K, body, init, unroll=True)

    h_fwd[...] = hf
    h_bwd[...] = hb

    @pl.when(blk == nblk - 1)
    def _():
        # hidden[0] + hidden[1]; written once, at the end of the grid.
        h_sum_ref[...] = hf + hb


# ----------------------------------------------------------------------------
# Wrapper ≈ EncoderRNN.forward
# ----------------------------------------------------------------------------
def encoder_rnn_forward(input_seqs, input_lengths, params, *, block_t=8):
    """input_seqs: (T, B) int32, input_lengths: (B,) int32 (sorted descending).

    Returns (outputs, hidden) with outputs (B, T, H) and hidden (1, B, H),
    matching the PyTorch module.
    """
    T, B = input_seqs.shape
    H = params["embedding"].shape[1]
    f32, bf16 = jnp.float32, jnp.bfloat16

    # Tile-aligned padded sizes (Bp multiple of 16 so bf16 blocks are (16,128)
    # sublane-pack friendly; Hp multiple of 128 so gate slices are lane-aligned).
    Bp = ((B + 15) // 16) * 16
    Hp = ((H + 127) // 128) * 128
    K = block_t
    Tp = ((T + K - 1) // K) * K
    NT = Tp // K

    # Embedding lookup (gather) — plain-JAX glue.
    embedded = params["embedding"][input_seqs].astype(f32)       # (T, B, H)
    # Pad T and B *before* the projection so gi comes out already (Tp, Bp, 3Hp).
    emb_p = jnp.pad(embedded, ((0, Tp - T), (0, Bp - B), (0, 0))).astype(bf16)
    x2 = emb_p.reshape(Tp * Bp, H)

    def pad_gates(a):
        # Last dim is 3H (gates [r, z, n]); pad each gate block to Hp separately
        # so in-kernel gate slices stay lane-aligned.  Applied to the SMALL
        # weights/biases, never to the big gi activations.
        r, z, n = jnp.split(a, 3, axis=-1)
        pad = [(0, 0)] * (a.ndim - 1) + [(0, Hp - H)]
        return jnp.concatenate(
            [jnp.pad(r, pad), jnp.pad(z, pad), jnp.pad(n, pad)], axis=-1)

    def prep_dir(wih, whh, bih, bhh):
        # Fold b_hh for the r/z gates into the input-side bias (exact identity).
        bih_fold = bih.at[:, :2 * H].add(bhh[:, :2 * H])
        wih_p = pad_gates(wih).astype(bf16)                       # (H, 3Hp)
        bih_p = pad_gates(bih_fold).astype(f32)                   # (1, 3Hp)
        # Hoisted input projection: one big MXU-friendly bf16 matmul.
        gi = jnp.dot(x2, wih_p, preferred_element_type=f32) + bih_p
        gi = gi.astype(bf16).reshape(Tp, Bp, 3 * Hp)
        whh_p = jnp.pad(pad_gates(whh), ((0, Hp - H), (0, 0))).astype(bf16)  # (Hp,3Hp)
        bhn_p = jnp.pad(bhh[:, 2 * H:], ((0, 0), (0, Hp - H))).astype(f32)   # (1, Hp)
        return gi, whh_p, bhn_p

    gi_f, whh_f_p, bhn_f = prep_dir(params["wih_f"], params["whh_f"],
                                    params["bih_f"], params["bhh_f"])
    gi_b, whh_b_p, bhn_b = prep_dir(params["wih_b"], params["whh_b"],
                                    params["bih_b"], params["bhh_b"])

    # Padded batch rows get length 0 -> hidden stays 0, outputs stay 0.
    lengths_p = jnp.pad(input_lengths.astype(jnp.int32), (0, Bp - B)).reshape(Bp, 1)

    in_specs = [
        pl.BlockSpec((Bp, 1), lambda i: (0, 0)),                       # lengths
        pl.BlockSpec((K, Bp, 3 * Hp), lambda i: (i, 0, 0)),            # gi fwd
        pl.BlockSpec((K, Bp, 3 * Hp), lambda i: (NT - 1 - i, 0, 0)),   # gi bwd (rev)
        pl.BlockSpec(memory_space=pl.ANY),                             # whh_f (HBM)
        pl.BlockSpec(memory_space=pl.ANY),                             # whh_b (HBM)
        pl.BlockSpec((1, Hp), lambda i: (0, 0)),                       # b_hn fwd
        pl.BlockSpec((1, Hp), lambda i: (0, 0)),                       # b_hn bwd
    ]
    out_shapes = (
        jax.ShapeDtypeStruct((Tp, Bp, Hp), bf16),   # fwd outputs, time-major
        jax.ShapeDtypeStruct((Tp, Bp, Hp), bf16),   # bwd outputs, time-major
        jax.ShapeDtypeStruct((Bp, Hp), f32),        # hidden[0] + hidden[1]
    )
    out_specs = (
        pl.BlockSpec((K, Bp, Hp), lambda i: (i, 0, 0)),
        pl.BlockSpec((K, Bp, Hp), lambda i: (NT - 1 - i, 0, 0)),
        pl.BlockSpec((Bp, Hp), lambda i: (0, 0)),
    )
    scratch_shapes = [
        pltpu.VMEM((Hp, 3 * Hp), bf16),       # resident W_hh fwd
        pltpu.VMEM((Hp, 3 * Hp), bf16),       # resident W_hh bwd
        pltpu.SemaphoreType.DMA((2,)),        # weight-load semaphores
        pltpu.VMEM((Bp, Hp), f32),            # hidden state fwd (f32)
        pltpu.VMEM((Bp, Hp), f32),            # hidden state bwd (f32)
    ]

    out_f, out_b, h_sum = pl.pallas_call(
        _bigru_kernel,
        out_shape=out_shapes,
        grid=(NT,),
        in_specs=in_specs,
        out_specs=out_specs,
        scratch_shapes=scratch_shapes,
        compiler_params=pltpu.CompilerParams(
            dimension_semantics=("arbitrary",),          # sequential recurrence
            vmem_limit_bytes=48 * 1024 * 1024),          # safe < v7x 64 MiB physical
    )(lengths_p, gi_f, gi_b, whh_f_p, whh_b_p, bhn_f, bhn_b)

    # outputs[:, :, :H] + outputs[:, :, H:]  ==  fwd + bwd halves.
    # XLA fuses the cast + add + slice + transpose epilogue.
    outputs = (out_f.astype(f32) + out_b.astype(f32))[:T, :B, :H].transpose(1, 0, 2)
    hidden = h_sum[:B, :H][None]                        # (1, B, H)
    return outputs, hidden


# ----------------------------------------------------------------------------
# Pure-JAX f32 reference (lax.scan) for correctness check.
# ----------------------------------------------------------------------------
def reference_forward(input_seqs, input_lengths, params):
    T, B = input_seqs.shape
    H = params["embedding"].shape[1]
    emb = params["embedding"][input_seqs].astype(jnp.float32)
    lengths = input_lengths.astype(jnp.int32)

    def cell(x, h, wih, whh, bih, bhh):
        gi = x @ wih + bih
        gh = h @ whh + bhh
        r = jax.nn.sigmoid(gi[:, :H] + gh[:, :H])
        z = jax.nn.sigmoid(gi[:, H:2 * H] + gh[:, H:2 * H])
        n = jnp.tanh(gi[:, 2 * H:] + r * gh[:, 2 * H:])
        return (1.0 - z) * n + z * h

    def make_step(wih, whh, bih, bhh):
        def step(h, xt):
            x, t = xt
            m = (t < lengths)[:, None].astype(jnp.float32)
            hn = cell(x, h, wih, whh, bih, bhh)
            h = m * hn + (1.0 - m) * h
            return h, m * h
        return step

    h0 = jnp.zeros((B, H), jnp.float32)
    ts = jnp.arange(T)
    hf, out_f = jax.lax.scan(
        make_step(params["wih_f"], params["whh_f"],
                  params["bih_f"], params["bhh_f"]), h0, (emb, ts))
    hb, out_b_rev = jax.lax.scan(
        make_step(params["wih_b"], params["whh_b"],
                  params["bih_b"], params["bhh_b"]), h0, (emb[::-1], ts[::-1]))
    out_b = out_b_rev[::-1]
    outputs = out_f + out_b
    return outputs.transpose(1, 0, 2), (hf + hb)[None]


# ----------------------------------------------------------------------------
# Deterministic parameter init (shapes from EncoderRNN.__init__).
# ----------------------------------------------------------------------------
def init_params(key, vocab_size, hidden_size):
    H = hidden_size
    keys = jax.random.split(key, 9)
    k = 1.0 / jnp.sqrt(H)

    def u(kk, shape):
        return jax.random.uniform(kk, shape, jnp.float32, -k, k)

    return {
        # embedding.weight.data.normal_(0, 0.1)
        "embedding": 0.1 * jax.random.normal(keys[0], (vocab_size, H), jnp.float32),
        # GRU weights stored transposed: (H, 3H), gates [r, z, n]
        "wih_f": u(keys[1], (H, 3 * H)), "whh_f": u(keys[2], (H, 3 * H)),
        "bih_f": u(keys[3], (1, 3 * H)), "bhh_f": u(keys[4], (1, 3 * H)),
        "wih_b": u(keys[5], (H, 3 * H)), "whh_b": u(keys[6], (H, 3 * H)),
        "bih_b": u(keys[7], (1, 3 * H)), "bhh_b": u(keys[8], (1, 3 * H)),
    }


if __name__ == "__main__":
    vocab_size, hidden_size = 50, 32
    T, B = 12, 2

    key = jax.random.PRNGKey(0)
    kp, ks = jax.random.split(key)
    params = init_params(kp, vocab_size, hidden_size)

    input_seqs = jax.random.randint(ks, (T, B), 0, vocab_size, dtype=jnp.int32)
    input_lengths = jnp.array([12, 7], dtype=jnp.int32)  # sorted, as pack_padded needs

    run = jax.jit(lambda s, l: encoder_rnn_forward(s, l, params))
    outputs, hidden = run(input_seqs, input_lengths)
    outputs, hidden = jax.block_until_ready((outputs, hidden))

    ref_out, ref_hid = reference_forward(input_seqs, input_lengths, params)
    assert outputs.shape == (B, T, hidden_size)
    assert hidden.shape == (1, B, hidden_size)
    # bf16 weights / gi / streamed outputs -> loosened tolerance vs f32 reference.
    assert jnp.allclose(outputs, ref_out, atol=2e-2, rtol=2e-2), \
        float(jnp.max(jnp.abs(outputs - ref_out)))
    assert jnp.allclose(hidden, ref_hid, atol=2e-2, rtol=2e-2), \
        float(jnp.max(jnp.abs(hidden - ref_hid)))

    print("KERNEL_OK")
</pallas_src>

<mosaic_0001>
module attributes {stable_mosaic.version = 11 : i64} {
  func.func @_bigru_kernel(%arg0: i32, %arg1: memref<16x1xi32, #tpu.memory_space<vmem>>, %arg2: memref<8x16x384xbf16, #tpu.memory_space<vmem>>, %arg3: memref<8x16x384xbf16, #tpu.memory_space<vmem>>, %arg4: memref<128x384xbf16, #tpu.memory_space<any>>, %arg5: memref<128x384xbf16, #tpu.memory_space<any>>, %arg6: memref<1x128xf32, #tpu.memory_space<vmem>>, %arg7: memref<1x128xf32, #tpu.memory_space<vmem>>, %arg8: memref<8x16x128xbf16, #tpu.memory_space<vmem>>, %arg9: memref<8x16x128xbf16, #tpu.memory_space<vmem>>, %arg10: memref<16x128xf32, #tpu.memory_space<vmem>>, %arg11: memref<128x384xbf16, #tpu.memory_space<vmem>>, %arg12: memref<128x384xbf16, #tpu.memory_space<vmem>>, %arg13: memref<2x!tpu.dma_semaphore, #tpu.memory_space<semaphore_mem>>, %arg14: memref<16x128xf32, #tpu.memory_space<vmem>>, %arg15: memref<16x128xf32, #tpu.memory_space<vmem>>) attributes {dimension_semantics = [#tpu.dimension_semantics<arbitrary>], iteration_bounds = array<i64: 2>, scalar_prefetch = 0 : i64, scratch_operands = 5 : i64, tpu.core_type = #tpu.core_type<tc>, window_params = [{pipeline_mode = #tpu.pipeline_mode<synchronous>, transform_indices = @transform_0, window_bounds = array<i64: 16, 1>}, {transform_indices = @transform_1, window_bounds = array<i64: 8, 16, 384>}, {transform_indices = @transform_2, window_bounds = array<i64: 8, 16, 384>}, {}, {}, {pipeline_mode = #tpu.pipeline_mode<synchronous>, transform_indices = @transform_5, window_bounds = array<i64: 1, 128>}, {pipeline_mode = #tpu.pipeline_mode<synchronous>, transform_indices = @transform_6, window_bounds = array<i64: 1, 128>}, {transform_indices = @transform_7, window_bounds = array<i64: 8, 16, 128>}, {transform_indices = @transform_8, window_bounds = array<i64: 8, 16, 128>}, {pipeline_mode = #tpu.pipeline_mode<synchronous>, transform_indices = @transform_9, window_bounds = array<i64: 16, 128>}]} {
    %c0_i32 = arith.constant 0 : i32
    %0 = arith.cmpi eq, %arg0, %c0_i32 : i32
    %1 = arith.extui %0 : i1 to i32
    %c0_i32_0 = arith.constant 0 : i32
    %2 = arith.cmpi ne, %1, %c0_i32_0 : i32
    scf.if %2 {
      %c0_i32_188 = arith.constant 0 : i32
      %764 = tpu.memref_slice %arg13[%c0_i32_188] : memref<2x!tpu.dma_semaphore, #tpu.memory_space<semaphore_mem>> -> memref<1x!tpu.dma_semaphore, #tpu.memory_space<semaphore_mem>>
      %765 = tpu.memref_squeeze %764 : memref<1x!tpu.dma_semaphore, #tpu.memory_space<semaphore_mem>> -> memref<!tpu.dma_semaphore, #tpu.memory_space<semaphore_mem>>
      tpu.enqueue_dma source(%arg4 : memref<128x384xbf16, #tpu.memory_space<any>>) target(%arg11 : memref<128x384xbf16, #tpu.memory_space<vmem>>) target_semaphore(%765 : memref<!tpu.dma_semaphore, #tpu.memory_space<semaphore_mem>>)
      %c1_i32_189 = arith.constant 1 : i32
      %766 = tpu.memref_slice %arg13[%c1_i32_189] : memref<2x!tpu.dma_semaphore, #tpu.memory_space<semaphore_mem>> -> memref<1x!tpu.dma_semaphore, #tpu.memory_space<semaphore_mem>>
      %767 = tpu.memref_squeeze %766 : memref<1x!tpu.dma_semaphore, #tpu.memory_space<semaphore_mem>> -> memref<!tpu.dma_semaphore, #tpu.memory_space<semaphore_mem>>
      tpu.enqueue_dma source(%arg5 : memref<128x384xbf16, #tpu.memory_space<any>>) target(%arg12 : memref<128x384xbf16, #tpu.memory_space<vmem>>) target_semaphore(%767 : memref<!tpu.dma_semaphore, #tpu.memory_space<semaphore_mem>>)
      %c0_i32_190 = arith.constant 0 : i32
      %768 = tpu.memref_slice %arg13[%c0_i32_190] : memref<2x!tpu.dma_semaphore, #tpu.memory_space<semaphore_mem>> -> memref<1x!tpu.dma_semaphore, #tpu.memory_space<semaphore_mem>>
      %769 = tpu.memref_squeeze %768 : memref<1x!tpu.dma_semaphore, #tpu.memory_space<semaphore_mem>> -> memref<!tpu.dma_semaphore, #tpu.memory_space<semaphore_mem>>
      tpu.wait_dma2 semaphore(%769 : memref<!tpu.dma_semaphore, #tpu.memory_space<semaphore_mem>>) src(%arg4 : memref<128x384xbf16, #tpu.memory_space<any>>) dst(%arg11 : memref<128x384xbf16, #tpu.memory_space<vmem>>)
      %c1_i32_191 = arith.constant 1 : i32
      %770 = tpu.memref_slice %arg13[%c1_i32_191] : memref<2x!tpu.dma_semaphore, #tpu.memory_space<semaphore_mem>> -> memref<1x!tpu.dma_semaphore, #tpu.memory_space<semaphore_mem>>
      %771 = tpu.memref_squeeze %770 : memref<1x!tpu.dma_semaphore, #tpu.memory_space<semaphore_mem>> -> memref<!tpu.dma_semaphore, #tpu.memory_space<semaphore_mem>>
      tpu.wait_dma2 semaphore(%771 : memref<!tpu.dma_semaphore, #tpu.memory_space<semaphore_mem>>) src(%arg5 : memref<128x384xbf16, #tpu.memory_space<any>>) dst(%arg12 : memref<128x384xbf16, #tpu.memory_space<vmem>>)
      %cst_192 = arith.constant 0.000000e+00 : f32
      %772 = vector.broadcast %cst_192 : f32 to vector<16x128xf32>
      %c0_193 = arith.constant 0 : index
      %c0_194 = arith.constant 0 : index
      %773 = vector.load %arg14[%c0_193, %c0_194] : memref<16x128xf32, #tpu.memory_space<vmem>>, vector<16x128xf32>
      tpu.vector_store %arg14[%c0_193, %c0_194], %772 {strides = array<i32>} : memref<16x128xf32, #tpu.memory_space<vmem>>, vector<16x128xf32>,
      %cst_195 = arith.constant 0.000000e+00 : f32
      %774 = vector.broadcast %cst_195 : f32 to vector<16x128xf32>
      %c0_196 = arith.constant 0 : index
      %c0_197 = arith.constant 0 : index
      %775 = vector.load %arg15[%c0_196, %c0_197] : memref<16x128xf32, #tpu.memory_space<vmem>>, vector<16x128xf32>
      tpu.vector_store %arg15[%c0_196, %c0_197], %774 {strides = array<i32>} : memref<16x128xf32, #tpu.memory_space<vmem>>, vector<16x128xf32>,
    } else {
    }
    %c0 = arith.constant 0 : index
    %c0_1 = arith.constant 0 : index
    %3 = vector.load %arg1[%c0, %c0_1] : memref<16x1xi32, #tpu.memory_space<vmem>>, vector<16x1xi32>
    %c0_2 = arith.constant 0 : index
    %c0_3 = arith.constant 0 : index
    %4 = vector.load %arg11[%c0_2, %c0_3] : memref<128x384xbf16, #tpu.memory_space<vmem>>, vector<128x384xbf16>
    %c0_4 = arith.constant 0 : index
    %c0_5 = arith.constant 0 : index
    %5 = vector.load %arg12[%c0_4, %c0_5] : memref<128x384xbf16, #tpu.memory_space<vmem>>, vector<128x384xbf16>
    %c0_6 = arith.constant 0 : index
    %c0_7 = arith.constant 0 : index
    %6 = vector.load %arg6[%c0_6, %c0_7] : memref<1x128xf32, #tpu.memory_space<vmem>>, vector<1x128xf32>
    %7 = vector.shape_cast %6 : vector<1x128xf32> to vector<1x128xf32>
    %8 = vector.broadcast %7 : vector<1x128xf32> to vector<16x128xf32>
    %c0_8 = arith.constant 0 : index
    %c0_9 = arith.constant 0 : index
    %9 = vector.load %arg7[%c0_8, %c0_9] : memref<1x128xf32, #tpu.memory_space<vmem>>, vector<1x128xf32>
    %10 = vector.shape_cast %9 : vector<1x128xf32> to vector<1x128xf32>
    %11 = vector.broadcast %10 : vector<1x128xf32> to vector<16x128xf32>
    %c8_i32 = arith.constant 8 : i32
    %12 = arith.muli %arg0, %c8_i32 : i32
    %c0_10 = arith.constant 0 : index
    %c0_11 = arith.constant 0 : index
    %13 = vector.load %arg14[%c0_10, %c0_11] : memref<16x128xf32, #tpu.memory_space<vmem>>, vector<16x128xf32>
    %c0_12 = arith.constant 0 : index
    %c0_13 = arith.constant 0 : index
    %14 = vector.load %arg15[%c0_12, %c0_13] : memref<16x128xf32, #tpu.memory_space<vmem>>, vector<16x128xf32>
    %c0_i32_14 = arith.constant 0 : i32
    %15 = arith.addi %12, %c0_i32_14 : i32
    %16 = vector.broadcast %15 : i32 to vector<16x1xi32>
    %17 = arith.cmpi slt, %16, %3 : vector<16x1xi32>
    %c0_15 = arith.constant 0 : index
    %c0_16 = arith.constant 0 : index
    %c0_17 = arith.constant 0 : index
    %18 = vector.load %arg2[%c0_15, %c0_16, %c0_17] : memref<8x16x384xbf16, #tpu.memory_space<vmem>>, vector<1x16x384xbf16>
    %19 = vector.shape_cast %18 : vector<1x16x384xbf16> to vector<16x384xbf16>
    %20 = arith.truncf %13 : vector<16x128xf32> to vector<16x128xbf16>
    %cst = arith.constant dense<0.000000e+00> : vector<16x384xf32>
    %21 = tpu.matmul %20, %4, %cst {dimension_numbers = #tpu.dot_dimension_numbers<[1], [0], [0], [1], [0, 0, 1, 1], [], []>} : vector<16x128xbf16>, vector<128x384xbf16>, vector<16x384xf32> -> vector<16x384xf32>
    %22 = vector.extract_strided_slice %19 {offsets = [0, 0], sizes = [16, 128], strides = [1, 1]} : vector<16x384xbf16> to vector<16x128xbf16>
    %23 = vector.extract_strided_slice %21 {offsets = [0, 0], sizes = [16, 128], strides = [1, 1]} : vector<16x384xf32> to vector<16x128xf32>
    %24 = arith.extf %22 : vector<16x128xbf16> to vector<16x128xf32>
    %25 = arith.addf %24, %23 : vector<16x128xf32>
    %26 = arith.negf %25 : vector<16x128xf32>
    %27 = math.exp %26 : vector<16x128xf32>
    %cst_18 = arith.constant 1.000000e+00 : f32
    %28 = vector.broadcast %cst_18 : f32 to vector<16x128xf32>
    %29 = arith.addf %28, %27 : vector<16x128xf32>
    %30 = arith.divf %28, %29 : vector<16x128xf32>
    %31 = vector.extract_strided_slice %19 {offsets = [0, 128], sizes = [16, 128], strides = [1, 1]} : vector<16x384xbf16> to vector<16x128xbf16>
    %32 = vector.extract_strided_slice %21 {offsets = [0, 128], sizes = [16, 128], strides = [1, 1]} : vector<16x384xf32> to vector<16x128xf32>
    %33 = arith.extf %31 : vector<16x128xbf16> to vector<16x128xf32>
    %34 = arith.addf %33, %32 : vector<16x128xf32>
    %35 = arith.negf %34 : vector<16x128xf32>
    %36 = math.exp %35 : vector<16x128xf32>
    %cst_19 = arith.constant 1.000000e+00 : f32
    %37 = vector.broadcast %cst_19 : f32 to vector<16x128xf32>
    %38 = arith.addf %37, %36 : vector<16x128xf32>
    %39 = arith.divf %37, %38 : vector<16x128xf32>
    %40 = vector.extract_strided_slice %19 {offsets = [0, 256], sizes = [16, 128], strides = [1, 1]} : vector<16x384xbf16> to vector<16x128xbf16>
    %41 = vector.extract_strided_slice %21 {offsets = [0, 256], sizes = [16, 128], strides = [1, 1]} : vector<16x384xf32> to vector<16x128xf32>
    %42 = arith.addf %41, %8 : vector<16x128xf32>
    %43 = arith.mulf %30, %42 : vector<16x128xf32>
    %44 = arith.extf %40 : vector<16x128xbf16> to vector<16x128xf32>
    %45 = arith.addf %44, %43 : vector<16x128xf32>
    %46 = math.tanh %45 : vector<16x128xf32>
    %47 = arith.subf %13, %46 : vector<16x128xf32>
    %48 = arith.mulf %39, %47 : vector<16x128xf32>
    %49 = arith.addf %46, %48 : vector<16x128xf32>
    %50 = vector.shape_cast %17 : vector<16x1xi1> to vector<16x1xi1>
    %51 = vector.broadcast %50 : vector<16x1xi1> to vector<16x128xi1>
    %52 = arith.select %51, %49, %13 : vector<16x128xi1>, vector<16x128xf32>
    %cst_20 = arith.constant 0.000000e+00 : f32
    %53 = vector.shape_cast %17 : vector<16x1xi1> to vector<16x1xi1>
    %54 = vector.broadcast %53 : vector<16x1xi1> to vector<16x128xi1>
    %55 = vector.broadcast %cst_20 : f32 to vector<16x128xf32>
    %56 = arith.select %54, %52, %55 : vector<16x128xi1>, vector<16x128xf32>
    %57 = arith.truncf %56 : vector<16x128xf32> to vector<16x128xbf16>
    %c0_21 = arith.constant 0 : index
    %c0_22 = arith.constant 0 : index
    %c0_23 = arith.constant 0 : index
    %58 = vector.load %arg8[%c0_21, %c0_22, %c0_23] : memref<8x16x128xbf16, #tpu.memory_space<vmem>>, vector<1x16x128xbf16>
    %59 = vector.shape_cast %58 : vector<1x16x128xbf16> to vector<16x128xbf16>
    %60 = vector.shape_cast %57 : vector<16x128xbf16> to vector<1x16x128xbf16>
    tpu.vector_store %arg8[%c0_21, %c0_22, %c0_23], %60 {strides = array<i32>} : memref<8x16x128xbf16, #tpu.memory_space<vmem>>, vector<1x16x128xbf16>,
    %c15_i32 = arith.constant 15 : i32
    %61 = arith.subi %c15_i32, %12 : i32
    %c0_i32_24 = arith.constant 0 : i32
    %62 = arith.subi %61, %c0_i32_24 : i32
    %63 = vector.broadcast %62 : i32 to vector<16x1xi32>
    %64 = arith.cmpi slt, %63, %3 : vector<16x1xi32>
    %c7 = arith.constant 7 : index
    %c0_25 = arith.constant 0 : index
    %c0_26 = arith.constant 0 : index
    %65 = vector.load %arg3[%c7, %c0_25, %c0_26] : memref<8x16x384xbf16, #tpu.memory_space<vmem>>, vector<1x16x384xbf16>
    %66 = vector.shape_cast %65 : vector<1x16x384xbf16> to vector<16x384xbf16>
    %67 = arith.truncf %14 : vector<16x128xf32> to vector<16x128xbf16>
    %cst_27 = arith.constant dense<0.000000e+00> : vector<16x384xf32>
    %68 = tpu.matmul %67, %5, %cst_27 {dimension_numbers = #tpu.dot_dimension_numbers<[1], [0], [0], [1], [0, 0, 1, 1], [], []>} : vector<16x128xbf16>, vector<128x384xbf16>, vector<16x384xf32> -> vector<16x384xf32>
    %69 = vector.extract_strided_slice %66 {offsets = [0, 0], sizes = [16, 128], strides = [1, 1]} : vector<16x384xbf16> to vector<16x128xbf16>
    %70 = vector.extract_strided_slice %68 {offsets = [0, 0], sizes = [16, 128], strides = [1, 1]} : vector<16x384xf32> to vector<16x128xf32>
    %71 = arith.extf %69 : vector<16x128xbf16> to vector<16x128xf32>
    %72 = arith.addf %71, %70 : vector<16x128xf32>
    %73 = arith.negf %72 : vector<16x128xf32>
    %74 = math.exp %73 : vector<16x128xf32>
    %cst_28 = arith.constant 1.000000e+00 : f32
    %75 = vector.broadcast %cst_28 : f32 to vector<16x128xf32>
    %76 = arith.addf %75, %74 : vector<16x128xf32>
    %77 = arith.divf %75, %76 : vector<16x128xf32>
    %78 = vector.extract_strided_slice %66 {offsets = [0, 128], sizes = [16, 128], strides = [1, 1]} : vector<16x384xbf16> to vector<16x128xbf16>
    %79 = vector.extract_strided_slice %68 {offsets = [0, 128], sizes = [16, 128], strides = [1, 1]} : vector<16x384xf32> to vector<16x128xf32>
    %80 = arith.extf %78 : vector<16x128xbf16> to vector<16x128xf32>
    %81 = arith.addf %80, %79 : vector<16x128xf32>
    %82 = arith.negf %81 : vector<16x128xf32>
    %83 = math.exp %82 : vector<16x128xf32>
    %cst_29 = arith.constant 1.000000e+00 : f32
    %84 = vector.broadcast %cst_29 : f32 to vector<16x128xf32>
    %85 = arith.addf %84, %83 : vector<16x128xf32>
    %86 = arith.divf %84, %85 : vector<16x128xf32>
    %87 = vector.extract_strided_slice %66 {offsets = [0, 256], sizes = [16, 128], strides = [1, 1]} : vector<16x384xbf16> to vector<16x128xbf16>
    %88 = vector.extract_strided_slice %68 {offsets = [0, 256], sizes = [16, 128], strides = [1, 1]} : vector<16x384xf32> to vector<16x128xf32>
    %89 = arith.addf %88, %11 : vector<16x128xf32>
    %90 = arith.mulf %77, %89 : vector<16x128xf32>
    %91 = arith.extf %87 : vector<16x128xbf16> to vector<16x128xf32>
    %92 = arith.addf %91, %90 : vector<16x128xf32>
    %93 = math.tanh %92 : vector<16x128xf32>
    %94 = arith.subf %14, %93 : vector<16x128xf32>
    %95 = arith.mulf %86, %94 : vector<16x128xf32>
    %96 = arith.addf %93, %95 : vector<16x128xf32>
    %97 = vector.shape_cast %64 : vector<16x1xi1> to vector<16x1xi1>
    %98 = vector.broadcast %97 : vector<16x1xi1> to vector<16x128xi1>
    %99 = arith.select %98, %96, %14 : vector<16x128xi1>, vector<16x128xf32>
    %cst_30 = arith.constant 0.000000e+00 : f32
    %100 = vector.shape_cast %64 : vector<16x1xi1> to vector<16x1xi1>
    %101 = vector.broadcast %100 : vector<16x1xi1> to vector<16x128xi1>
    %102 = vector.broadcast %cst_30 : f32 to vector<16x128xf32>
    %103 = arith.select %101, %99, %102 : vector<16x128xi1>, vector<16x128xf32>
    %104 = arith.truncf %103 : vector<16x128xf32> to vector<16x128xbf16>
    %c7_31 = arith.constant 7 : index
    %c0_32 = arith.constant 0 : index
    %c0_33 = arith.constant 0 : index
    %105 = vector.load %arg9[%c7_31, %c0_32, %c0_33] : memref<8x16x128xbf16, #tpu.memory_space<vmem>>, vector<1x16x128xbf16>
    %106 = vector.shape_cast %105 : vector<1x16x128xbf16> to vector<16x128xbf16>
    %107 = vector.shape_cast %104 : vector<16x128xbf16> to vector<1x16x128xbf16>
    tpu.vector_store %arg9[%c7_31, %c0_32, %c0_33], %107 {strides = array<i32>} : memref<8x16x128xbf16, #tpu.memory_space<vmem>>, vector<1x16x128xbf16>,
    %c1_i32 = arith.constant 1 : i32
    %108 = arith.addi %12, %c1_i32 : i32
    %109 = vector.broadcast %108 : i32 to vector<16x1xi32>
    %110 = arith.cmpi slt, %109, %3 : vector<16x1xi32>
    %c1 = arith.constant 1 : index
    %c0_34 = arith.constant 0 : index
    %c0_35 = arith.constant 0 : index
    %111 = vector.load %arg2[%c1, %c0_34, %c0_35] : memref<8x16x384xbf16, #tpu.memory_space<vmem>>, vector<1x16x384xbf16>
    %112 = vector.shape_cast %111 : vector<1x16x384xbf16> to vector<16x384xbf16>
    %113 = arith.truncf %52 : vector<16x128xf32> to vector<16x128xbf16>
    %cst_36 = arith.constant dense<0.000000e+00> : vector<16x384xf32>
    %114 = tpu.matmul %113, %4, %cst_36 {dimension_numbers = #tpu.dot_dimension_numbers<[1], [0], [0], [1], [0, 0, 1, 1], [], []>} : vector<16x128xbf16>, vector<128x384xbf16>, vector<16x384xf32> -> vector<16x384xf32>
    %115 = vector.extract_strided_slice %112 {offsets = [0, 0], sizes = [16, 128], strides = [1, 1]} : vector<16x384xbf16> to vector<16x128xbf16>
    %116 = vector.extract_strided_slice %114 {offsets = [0, 0], sizes = [16, 128], strides = [1, 1]} : vector<16x384xf32> to vector<16x128xf32>
    %117 = arith.extf %115 : vector<16x128xbf16> to vector<16x128xf32>
    %118 = arith.addf %117, %116 : vector<16x128xf32>
    %119 = arith.negf %118 : vector<16x128xf32>
    %120 = math.exp %119 : vector<16x128xf32>
    %cst_37 = arith.constant 1.000000e+00 : f32
    %121 = vector.broadcast %cst_37 : f32 to vector<16x128xf32>
    %122 = arith.addf %121, %120 : vector<16x128xf32>
    %123 = arith.divf %121, %122 : vector<16x128xf32>
    %124 = vector.extract_strided_slice %112 {offsets = [0, 128], sizes = [16, 128], strides = [1, 1]} : vector<16x384xbf16> to vector<16x128xbf16>
    %125 = vector.extract_strided_slice %114 {offsets = [0, 128], sizes = [16, 128], strides = [1, 1]} : vector<16x384xf32> to vector<16x128xf32>
    %126 = arith.extf %124 : vector<16x128xbf16> to vector<16x128xf32>
    %127 = arith.addf %126, %125 : vector<16x128xf32>
    %128 = arith.negf %127 : vector<16x128xf32>
    %129 = math.exp %128 : vector<16x128xf32>
    %cst_38 = arith.constant 1.000000e+00 : f32
    %130 = vector.broadcast %cst_38 : f32 to vector<16x128xf32>
    %131 = arith.addf %130, %129 : vector<16x128xf32>
    %132 = arith.divf %130, %131 : vector<16x128xf32>
    %133 = vector.extract_strided_slice %112 {offsets = [0, 256], sizes = [16, 128], strides = [1, 1]} : vector<16x384xbf16> to vector<16x128xbf16>
    %134 = vector.extract_strided_slice %114 {offsets = [0, 256], sizes = [16, 128], strides = [1, 1]} : vector<16x384xf32> to vector<16x128xf32>
    %135 = arith.addf %134, %8 : vector<16x128xf32>
    %136 = arith.mulf %123, %135 : vector<16x128xf32>
    %137 = arith.extf %133 : vector<16x128xbf16> to vector<16x128xf32>
    %138 = arith.addf %137, %136 : vector<16x128xf32>
    %139 = math.tanh %138 : vector<16x128xf32>
    %140 = arith.subf %52, %139 : vector<16x128xf32>
    %141 = arith.mulf %132, %140 : vector<16x128xf32>
    %142 = arith.addf %139, %141 : vector<16x128xf32>
    %143 = vector.shape_cast %110 : vector<16x1xi1> to vector<16x1xi1>
    %144 = vector.broadcast %143 : vector<16x1xi1> to vector<16x128xi1>
    %145 = arith.select %144, %142, %52 : vector<16x128xi1>, vector<16x128xf32>
    %cst_39 = arith.constant 0.000000e+00 : f32
    %146 = vector.shape_cast %110 : vector<16x1xi1> to vector<16x1xi1>
    %147 = vector.broadcast %146 : vector<16x1xi1> to vector<16x128xi1>
    %148 = vector.broadcast %cst_39 : f32 to vector<16x128xf32>
    %149 = arith.select %147, %145, %148 : vector<16x128xi1>, vector<16x128xf32>
    %150 = arith.truncf %149 : vector<16x128xf32> to vector<16x128xbf16>
    %c1_40 = arith.constant 1 : index
    %c0_41 = arith.constant 0 : index
    %c0_42 = arith.constant 0 : index
    %151 = vector.load %arg8[%c1_40, %c0_41, %c0_42] : memref<8x16x128xbf16, #tpu.memory_space<vmem>>, vector<1x16x128xbf16>
    %152 = vector.shape_cast %151 : vector<1x16x128xbf16> to vector<16x128xbf16>
    %153 = vector.shape_cast %150 : vector<16x128xbf16> to vector<1x16x128xbf16>
    tpu.vector_store %arg8[%c1_40, %c0_41, %c0_42], %153 {strides = array<i32>} : memref<8x16x128xbf16, #tpu.memory_space<vmem>>, vector<1x16x128xbf16>,
    %c15_i32_43 = arith.constant 15 : i32
    %154 = arith.subi %c15_i32_43, %12 : i32
    %c1_i32_44 = arith.constant 1 : i32
    %155 = arith.subi %154, %c1_i32_44 : i32
    %156 = vector.broadcast %155 : i32 to vector<16x1xi32>
    %157 = arith.cmpi slt, %156, %3 : vector<16x1xi32>
    %c6 = arith.constant 6 : index
    %c0_45 = arith.constant 0 : index
    %c0_46 = arith.constant 0 : index
    %158 = vector.load %arg3[%c6, %c0_45, %c0_46] : memref<8x16x384xbf16, #tpu.memory_space<vmem>>, vector<1x16x384xbf16>
    %159 = vector.shape_cast %158 : vector<1x16x384xbf16> to vector<16x384xbf16>
    %160 = arith.truncf %99 : vector<16x128xf32> to vector<16x128xbf16>
    %cst_47 = arith.constant dense<0.000000e+00> : vector<16x384xf32>
    %161 = tpu.matmul %160, %5, %cst_47 {dimension_numbers = #tpu.dot_dimension_numbers<[1], [0], [0], [1], [0, 0, 1, 1], [], []>} : vector<16x128xbf16>, vector<128x384xbf16>, vector<16x384xf32> -> vector<16x384xf32>
    %162 = vector.extract_strided_slice %159 {offsets = [0, 0], sizes = [16, 128], strides = [1, 1]} : vector<16x384xbf16> to vector<16x128xbf16>
    %163 = vector.extract_strided_slice %161 {offsets = [0, 0], sizes = [16, 128], strides = [1, 1]} : vector<16x384xf32> to vector<16x128xf32>
    %164 = arith.extf %162 : vector<16x128xbf16> to vector<16x128xf32>
    %165 = arith.addf %164, %163 : vector<16x128xf32>
    %166 = arith.negf %165 : vector<16x128xf32>
    %167 = math.exp %166 : vector<16x128xf32>
    %cst_48 = arith.constant 1.000000e+00 : f32
    %168 = vector.broadcast %cst_48 : f32 to vector<16x128xf32>
    %169 = arith.addf %168, %167 : vector<16x128xf32>
    %170 = arith.divf %168, %169 : vector<16x128xf32>
    %171 = vector.extract_strided_slice %159 {offsets = [0, 128], sizes = [16, 128], strides = [1, 1]} : vector<16x384xbf16> to vector<16x128xbf16>
    %172 = vector.extract_strided_slice %161 {offsets = [0, 128], sizes = [16, 128], strides = [1, 1]} : vector<16x384xf32> to vector<16x128xf32>
    %173 = arith.extf %171 : vector<16x128xbf16> to vector<16x128xf32>
    %174 = arith.addf %173, %172 : vector<16x128xf32>
    %175 = arith.negf %174 : vector<16x128xf32>
    %176 = math.exp %175 : vector<16x128xf32>
    %cst_49 = arith.constant 1.000000e+00 : f32
    %177 = vector.broadcast %cst_49 : f32 to vector<16x128xf32>
    %178 = arith.addf %177, %176 : vector<16x128xf32>
    %179 = arith.divf %177, %178 : vector<16x128xf32>
    %180 = vector.extract_strided_slice %159 {offsets = [0, 256], sizes = [16, 128], strides = [1, 1]} : vector<16x384xbf16> to vector<16x128xbf16>
    %181 = vector.extract_strided_slice %161 {offsets = [0, 256], sizes = [16, 128], strides = [1, 1]} : vector<16x384xf32> to vector<16x128xf32>
    %182 = arith.addf %181, %11 : vector<16x128xf32>
    %183 = arith.mulf %170, %182 : vector<16x128xf32>
    %184 = arith.extf %180 : vector<16x128xbf16> to vector<16x128xf32>
    %185 = arith.addf %184, %183 : vector<16x128xf32>
    %186 = math.tanh %185 : vector<16x128xf32>
    %187 = arith.subf %99, %186 : vector<16x128xf32>
    %188 = arith.mulf %179, %187 : vector<16x128xf32>
    %189 = arith.addf %186, %188 : vector<16x128xf32>
    %190 = vector.shape_cast %157 : vector<16x1xi1> to vector<16x1xi1>
    %191 = vector.broadcast %190 : vector<16x1xi1> to vector<16x128xi1>
    %192 = arith.select %191, %189, %99 : vector<16x128xi1>, vector<16x128xf32>
    %cst_50 = arith.constant 0.000000e+00 : f32
    %193 = vector.shape_cast %157 : vector<16x1xi1> to vector<16x1xi1>
    %194 = vector.broadcast %193 : vector<16x1xi1> to vector<16x128xi1>
    %195 = vector.broadcast %cst_50 : f32 to vector<16x128xf32>
    %196 = arith.select %194, %192, %195 : vector<16x128xi1>, vector<16x128xf32>
    %197 = arith.truncf %196 : vector<16x128xf32> to vector<16x128xbf16>
    %c6_51 = arith.constant 6 : index
    %c0_52 = arith.constant 0 : index
    %c0_53 = arith.constant 0 : index
    %198 = vector.load %arg9[%c6_51, %c0_52, %c0_53] : memref<8x16x128xbf16, #tpu.memory_space<vmem>>, vector<1x16x128xbf16>
    %199 = vector.shape_cast %198 : vector<1x16x128xbf16> to vector<16x128xbf16>
    %200 = vector.shape_cast %197 : vector<16x128xbf16> to vector<1x16x128xbf16>
    tpu.vector_store %arg9[%c6_51, %c0_52, %c0_53], %200 {strides = array<i32>} : memref<8x16x128xbf16, #tpu.memory_space<vmem>>, vector<1x16x128xbf16>,
    %c2_i32 = arith.constant 2 : i32
    %201 = arith.addi %12, %c2_i32 : i32
    %202 = vector.broadcast %201 : i32 to vector<16x1xi32>
    %203 = arith.cmpi slt, %202, %3 : vector<16x1xi32>
    %c2 = arith.constant 2 : index
    %c0_54 = arith.constant 0 : index
    %c0_55 = arith.constant 0 : index
    %204 = vector.load %arg2[%c2, %c0_54, %c0_55] : memref<8x16x384xbf16, #tpu.memory_space<vmem>>, vector<1x16x384xbf16>
    %205 = vector.shape_cast %204 : vector<1x16x384xbf16> to vector<16x384xbf16>
    %206 = arith.truncf %145 : vector<16x128xf32> to vector<16x128xbf16>
    %cst_56 = arith.constant dense<0.000000e+00> : vector<16x384xf32>
    %207 = tpu.matmul %206, %4, %cst_56 {dimension_numbers = #tpu.dot_dimension_numbers<[1], [0], [0], [1], [0, 0, 1, 1], [], []>} : vector<16x128xbf16>, vector<128x384xbf16>, vector<16x384xf32> -> vector<16x384xf32>
    %208 = vector.extract_strided_slice %205 {offsets = [0, 0], sizes = [16, 128], strides = [1, 1]} : vector<16x384xbf16> to vector<16x128xbf16>
    %209 = vector.extract_strided_slice %207 {offsets = [0, 0], sizes = [16, 128], strides = [1, 1]} : vector<16x384xf32> to vector<16x128xf32>
    %210 = arith.extf %208 : vector<16x128xbf16> to vector<16x128xf32>
    %211 = arith.addf %210, %209 : vector<16x128xf32>
    %212 = arith.negf %211 : vector<16x128xf32>
    %213 = math.exp %212 : vector<16x128xf32>
    %cst_57 = arith.constant 1.000000e+00 : f32
    %214 = vector.broadcast %cst_57 : f32 to vector<16x128xf32>
    %215 = arith.addf %214, %213 : vector<16x128xf32>
    %216 = arith.divf %214, %215 : vector<16x128xf32>
    %217 = vector.extract_strided_slice %205 {offsets = [0, 128], sizes = [16, 128], strides = [1, 1]} : vector<16x384xbf16> to vector<16x128xbf16>
    %218 = vector.extract_strided_slice %207 {offsets = [0, 128], sizes = [16, 128], strides = [1, 1]} : vector<16x384xf32> to vector<16x128xf32>
    %219 = arith.extf %217 : vector<16x128xbf16> to vector<16x128xf32>
    %220 = arith.addf %219, %218 : vector<16x128xf32>
    %221 = arith.negf %220 : vector<16x128xf32>
    %222 = math.exp %221 : vector<16x128xf32>
    %cst_58 = arith.constant 1.000000e+00 : f32
    %223 = vector.broadcast %cst_58 : f32 to vector<16x128xf32>
    %224 = arith.addf %223, %222 : vector<16x128xf32>
    %225 = arith.divf %223, %224 : vector<16x128xf32>
    %226 = vector.extract_strided_slice %205 {offsets = [0, 256], sizes = [16, 128], strides = [1, 1]} : vector<16x384xbf16> to vector<16x128xbf16>
    %227 = vector.extract_strided_slice %207 {offsets = [0, 256], sizes = [16, 128], strides = [1, 1]} : vector<16x384xf32> to vector<16x128xf32>
    %228 = arith.addf %227, %8 : vector<16x128xf32>
    %229 = arith.mulf %216, %228 : vector<16x128xf32>
    %230 = arith.extf %226 : vector<16x128xbf16> to vector<16x128xf32>
    %231 = arith.addf %230, %229 : vector<16x128xf32>
    %232 = math.tanh %231 : vector<16x128xf32>
    %233 = arith.subf %145, %232 : vector<16x128xf32>
    %234 = arith.mulf %225, %233 : vector<16x128xf32>
    %235 = arith.addf %232, %234 : vector<16x128xf32>
    %236 = vector.shape_cast %203 : vector<16x1xi1> to vector<16x1xi1>
    %237 = vector.broadcast %236 : vector<16x1xi1> to vector<16x128xi1>
    %238 = arith.select %237, %235, %145 : vector<16x128xi1>, vector<16x128xf32>
    %cst_59 = arith.constant 0.000000e+00 : f32
    %239 = vector.shape_cast %203 : vector<16x1xi1> to vector<16x1xi1>
    %240 = vector.broadcast %239 : vector<16x1xi1> to vector<16x128xi1>
    %241 = vector.broadcast %cst_59 : f32 to vector<16x128xf32>
    %242 = arith.select %240, %238, %241 : vector<16x128xi1>, vector<16x128xf32>
    %243 = arith.truncf %242 : vector<16x128xf32> to vector<16x128xbf16>
    %c2_60 = arith.constant 2 : index
    %c0_61 = arith.constant 0 : index
    %c0_62 = arith.constant 0 : index
    %244 = vector.load %arg8[%c2_60, %c0_61, %c0_62] : memref<8x16x128xbf16, #tpu.memory_space<vmem>>, vector<1x16x128xbf16>
    %245 = vector.shape_cast %244 : vector<1x16x128xbf16> to vector<16x128xbf16>
    %246 = vector.shape_cast %243 : vector<16x128xbf16> to vector<1x16x128xbf16>
    tpu.vector_store %arg8[%c2_60, %c0_61, %c0_62], %246 {strides = array<i32>} : memref<8x16x128xbf16, #tpu.memory_space<vmem>>, vector<1x16x128xbf16>,
    %c15_i32_63 = arith.constant 15 : i32
    %247 = arith.subi %c15_i32_63, %12 : i32
    %c2_i32_64 = arith.constant 2 : i32
    %248 = arith.subi %247, %c2_i32_64 : i32
    %249 = vector.broadcast %248 : i32 to vector<16x1xi32>
    %250 = arith.cmpi slt, %249, %3 : vector<16x1xi32>
    %c5 = arith.constant 5 : index
    %c0_65 = arith.constant 0 : index
    %c0_66 = arith.constant 0 : index
    %251 = vector.load %arg3[%c5, %c0_65, %c0_66] : memref<8x16x384xbf16, #tpu.memory_space<vmem>>, vector<1x16x384xbf16>
    %252 = vector.shape_cast %251 : vector<1x16x384xbf16> to vector<16x384xbf16>
    %253 = arith.truncf %192 : vector<16x128xf32> to vector<16x128xbf16>
    %cst_67 = arith.constant dense<0.000000e+00> : vector<16x384xf32>
    %254 = tpu.matmul %253, %5, %cst_67 {dimension_numbers = #tpu.dot_dimension_numbers<[1], [0], [0], [1], [0, 0, 1, 1], [], []>} : vector<16x128xbf16>, vector<128x384xbf16>, vector<16x384xf32> -> vector<16x384xf32>
    %255 = vector.extract_strided_slice %252 {offsets = [0, 0], sizes = [16, 128], strides = [1, 1]} : vector<16x384xbf16> to vector<16x128xbf16>
    %256 = vector.extract_strided_slice %254 {offsets = [0, 0], sizes = [16, 128], strides = [1, 1]} : vector<16x384xf32> to vector<16x128xf32>
    %257 = arith.extf %255 : vector<16x128xbf16> to vector<16x128xf32>
    %258 = arith.addf %257, %256 : vector<16x128xf32>
    %259 = arith.negf %258 : vector<16x128xf32>
    %260 = math.exp %259 : vector<16x128xf32>
    %cst_68 = arith.constant 1.000000e+00 : f32
    %261 = vector.broadcast %cst_68 : f32 to vector<16x128xf32>
    %262 = arith.addf %261, %260 : vector<16x128xf32>
    %263 = arith.divf %261, %262 : vector<16x128xf32>
    %264 = vector.extract_strided_slice %252 {offsets = [0, 128], sizes = [16, 128], strides = [1, 1]} : vector<16x384xbf16> to vector<16x128xbf16>
    %265 = vector.extract_strided_slice %254 {offsets = [0, 128], sizes = [16, 128], strides = [1, 1]} : vector<16x384xf32> to vector<16x128xf32>
    %266 = arith.extf %264 : vector<16x128xbf16> to vector<16x128xf32>
    %267 = arith.addf %266, %265 : vector<16x128xf32>
    %268 = arith.negf %267 : vector<16x128xf32>
    %269 = math.exp %268 : vector<16x128xf32>
    %cst_69 = arith.constant 1.000000e+00 : f32
    %270 = vector.broadcast %cst_69 : f32 to vector<16x128xf32>
    %271 = arith.addf %270, %269 : vector<16x128xf32>
    %272 = arith.divf %270, %271 : vector<16x128xf32>
    %273 = vector.extract_strided_slice %252 {offsets = [0, 256], sizes = [16, 128], strides = [1, 1]} : vector<16x384xbf16> to vector<16x128xbf16>
    %274 = vector.extract_strided_slice %254 {offsets = [0, 256], sizes = [16, 128], strides = [1, 1]} : vector<16x384xf32> to vector<16x128xf32>
    %275 = arith.addf %274, %11 : vector<16x128xf32>
    %276 = arith.mulf %263, %275 : vector<16x128xf32>
    %277 = arith.extf %273 : vector<16x128xbf16> to vector<16x128xf32>
    %278 = arith.addf %277, %276 : vector<16x128xf32>
    %279 = math.tanh %278 : vector<16x128xf32>
    %280 = arith.subf %192, %279 : vector<16x128xf32>
    %281 = arith.mulf %272, %280 : vector<16x128xf32>
    %282 = arith.addf %279, %281 : vector<16x128xf32>
    %283 = vector.shape_cast %250 : vector<16x1xi1> to vector<16x1xi1>
    %284 = vector.broadcast %283 : vector<16x1xi1> to vector<16x128xi1>
    %285 = arith.select %284, %282, %192 : vector<16x128xi1>, vector<16x128xf32>
    %cst_70 = arith.constant 0.000000e+00 : f32
    %286 = vector.shape_cast %250 : vector<16x1xi1> to vector<16x1xi1>
    %287 = vector.broadcast %286 : vector<16x1xi1> to vector<16x128xi1>
    %288 = vector.broadcast %cst_70 : f32 to vector<16x128xf32>
    %289 = arith.select %287, %285, %288 : vector<16x128xi1>, vector<16x128xf32>
    %290 = arith.truncf %289 : vector<16x128xf32> to vector<16x128xbf16>
    %c5_71 = arith.constant 5 : index
    %c0_72 = arith.constant 0 : index
    %c0_73 = arith.constant 0 : index
    %291 = vector.load %arg9[%c5_71, %c0_72, %c0_73] : memref<8x16x128xbf16, #tpu.memory_space<vmem>>, vector<1x16x128xbf16>
    %292 = vector.shape_cast %291 : vector<1x16x128xbf16> to vector<16x128xbf16>
    %293 = vector.shape_cast %290 : vector<16x128xbf16> to vector<1x16x128xbf16>
    tpu.vector_store %arg9[%c5_71, %c0_72, %c0_73], %293 {strides = array<i32>} : memref<8x16x128xbf16, #tpu.memory_space<vmem>>, vector<1x16x128xbf16>,
    %c3_i32 = arith.constant 3 : i32
    %294 = arith.addi %12, %c3_i32 : i32
    %295 = vector.broadcast %294 : i32 to vector<16x1xi32>
    %296 = arith.cmpi slt, %295, %3 : vector<16x1xi32>
    %c3 = arith.constant 3 : index
    %c0_74 = arith.constant 0 : index
    %c0_75 = arith.constant 0 : index
    %297 = vector.load %arg2[%c3, %c0_74, %c0_75] : memref<8x16x384xbf16, #tpu.memory_space<vmem>>, vector<1x16x384xbf16>
    %298 = vector.shape_cast %297 : vector<1x16x384xbf16> to vector<16x384xbf16>
    %299 = arith.truncf %238 : vector<16x128xf32> to vector<16x128xbf16>
    %cst_76 = arith.constant dense<0.000000e+00> : vector<16x384xf32>
    %300 = tpu.matmul %299, %4, %cst_76 {dimension_numbers = #tpu.dot_dimension_numbers<[1], [0], [0], [1], [0, 0, 1, 1], [], []>} : vector<16x128xbf16>, vector<128x384xbf16>, vector<16x384xf32> -> vector<16x384xf32>
    %301 = vector.extract_strided_slice %298 {offsets = [0, 0], sizes = [16, 128], strides = [1, 1]} : vector<16x384xbf16> to vector<16x128xbf16>
    %302 = vector.extract_strided_slice %300 {offsets = [0, 0], sizes = [16, 128], strides = [1, 1]} : vector<16x384xf32> to vector<16x128xf32>
    %303 = arith.extf %301 : vector<16x128xbf16> to vector<16x128xf32>
    %304 = arith.addf %303, %302 : vector<16x128xf32>
    %305 = arith.negf %304 : vector<16x128xf32>
    %306 = math.exp %305 : vector<16x128xf32>
    %cst_77 = arith.constant 1.000000e+00 : f32
    %307 = vector.broadcast %cst_77 : f32 to vector<16x128xf32>
    %308 = arith.addf %307, %306 : vector<16x128xf32>
    %309 = arith.divf %307, %308 : vector<16x128xf32>
    %310 = vector.extract_strided_slice %298 {offsets = [0, 128], sizes = [16, 128], strides = [1, 1]} : vector<16x384xbf16> to vector<16x128xbf16>
    %311 = vector.extract_strided_slice %300 {offsets = [0, 128], sizes = [16, 128], strides = [1, 1]} : vector<16x384xf32> to vector<16x128xf32>
    %312 = arith.extf %310 : vector<16x128xbf16> to vector<16x128xf32>
    %313 = arith.addf %312, %311 : vector<16x128xf32>
    %314 = arith.negf %313 : vector<16x128xf32>
    %315 = math.exp %314 : vector<16x128xf32>
    %cst_78 = arith.constant 1.000000e+00 : f32
    %316 = vector.broadcast %cst_78 : f32 to vector<16x128xf32>
    %317 = arith.addf %316, %315 : vector<16x128xf32>
    %318 = arith.divf %316, %317 : vector<16x128xf32>
    %319 = vector.extract_strided_slice %298 {offsets = [0, 256], sizes = [16, 128], strides = [1, 1]} : vector<16x384xbf16> to vector<16x128xbf16>
    %320 = vector.extract_strided_slice %300 {offsets = [0, 256], sizes = [16, 128], strides = [1, 1]} : vector<16x384xf32> to vector<16x128xf32>
    %321 = arith.addf %320, %8 : vector<16x128xf32>
    %322 = arith.mulf %309, %321 : vector<16x128xf32>
    %323 = arith.extf %319 : vector<16x128xbf16> to vector<16x128xf32>
    %324 = arith.addf %323, %322 : vector<16x128xf32>
    %325 = math.tanh %324 : vector<16x128xf32>
    %326 = arith.subf %238, %325 : vector<16x128xf32>
    %327 = arith.mulf %318, %326 : vector<16x128xf32>
    %328 = arith.addf %325, %327 : vector<16x128xf32>
    %329 = vector.shape_cast %296 : vector<16x1xi1> to vector<16x1xi1>
    %330 = vector.broadcast %329 : vector<16x1xi1> to vector<16x128xi1>
    %331 = arith.select %330, %328, %238 : vector<16x128xi1>, vector<16x128xf32>
    %cst_79 = arith.constant 0.000000e+00 : f32
    %332 = vector.shape_cast %296 : vector<16x1xi1> to vector<16x1xi1>
    %333 = vector.broadcast %332 : vector<16x1xi1> to vector<16x128xi1>
    %334 = vector.broadcast %cst_79 : f32 to vector<16x128xf32>
    %335 = arith.select %333, %331, %334 : vector<16x128xi1>, vector<16x128xf32>
    %336 = arith.truncf %335 : vector<16x128xf32> to vector<16x128xbf16>
    %c3_80 = arith.constant 3 : index
    %c0_81 = arith.constant 0 : index
    %c0_82 = arith.constant 0 : index
    %337 = vector.load %arg8[%c3_80, %c0_81, %c0_82] : memref<8x16x128xbf16, #tpu.memory_space<vmem>>, vector<1x16x128xbf16>
    %338 = vector.shape_cast %337 : vector<1x16x128xbf16> to vector<16x128xbf16>
    %339 = vector.shape_cast %336 : vector<16x128xbf16> to vector<1x16x128xbf16>
    tpu.vector_store %arg8[%c3_80, %c0_81, %c0_82], %339 {strides = array<i32>} : memref<8x16x128xbf16, #tpu.memory_space<vmem>>, vector<1x16x128xbf16>,
    %c15_i32_83 = arith.constant 15 : i32
    %340 = arith.subi %c15_i32_83, %12 : i32
    %c3_i32_84 = arith.constant 3 : i32
    %341 = arith.subi %340, %c3_i32_84 : i32
    %342 = vector.broadcast %341 : i32 to vector<16x1xi32>
    %343 = arith.cmpi slt, %342, %3 : vector<16x1xi32>
    %c4 = arith.constant 4 : index
    %c0_85 = arith.constant 0 : index
    %c0_86 = arith.constant 0 : index
    %344 = vector.load %arg3[%c4, %c0_85, %c0_86] : memref<8x16x384xbf16, #tpu.memory_space<vmem>>, vector<1x16x384xbf16>
    %345 = vector.shape_cast %344 : vector<1x16x384xbf16> to vector<16x384xbf16>
    %346 = arith.truncf %285 : vector<16x128xf32> to vector<16x128xbf16>
    %cst_87 = arith.constant dense<0.000000e+00> : vector<16x384xf32>
    %347 = tpu.matmul %346, %5, %cst_87 {dimension_numbers = #tpu.dot_dimension_numbers<[1], [0], [0], [1], [0, 0, 1, 1], [], []>} : vector<16x128xbf16>, vector<128x384xbf16>, vector<16x384xf32> -> vector<16x384xf32>
    %348 = vector.extract_strided_slice %345 {offsets = [0, 0], sizes = [16, 128], strides = [1, 1]} : vector<16x384xbf16> to vector<16x128xbf16>
    %349 = vector.extract_strided_slice %347 {offsets = [0, 0], sizes = [16, 128], strides = [1, 1]} : vector<16x384xf32> to vector<16x128xf32>
    %350 = arith.extf %348 : vector<16x128xbf16> to vector<16x128xf32>
    %351 = arith.addf %350, %349 : vector<16x128xf32>
    %352 = arith.negf %351 : vector<16x128xf32>
    %353 = math.exp %352 : vector<16x128xf32>
    %cst_88 = arith.constant 1.000000e+00 : f32
    %354 = vector.broadcast %cst_88 : f32 to vector<16x128xf32>
    %355 = arith.addf %354, %353 : vector<16x128xf32>
    %356 = arith.divf %354, %355 : vector<16x128xf32>
    %357 = vector.extract_strided_slice %345 {offsets = [0, 128], sizes = [16, 128], strides = [1, 1]} : vector<16x384xbf16> to vector<16x128xbf16>
    %358 = vector.extract_strided_slice %347 {offsets = [0, 128], sizes = [16, 128], strides = [1, 1]} : vector<16x384xf32> to vector<16x128xf32>
    %359 = arith.extf %357 : vector<16x128xbf16> to vector<16x128xf32>
    %360 = arith.addf %359, %358 : vector<16x128xf32>
    %361 = arith.negf %360 : vector<16x128xf32>
    %362 = math.exp %361 : vector<16x128xf32>
    %cst_89 = arith.constant 1.000000e+00 : f32
    %363 = vector.broadcast %cst_89 : f32 to vector<16x128xf32>
    %364 = arith.addf %363, %362 : vector<16x128xf32>
    %365 = arith.divf %363, %364 : vector<16x128xf32>
    %366 = vector.extract_strided_slice %345 {offsets = [0, 256], sizes = [16, 128], strides = [1, 1]} : vector<16x384xbf16> to vector<16x128xbf16>
    %367 = vector.extract_strided_slice %347 {offsets = [0, 256], sizes = [16, 128], strides = [1, 1]} : vector<16x384xf32> to vector<16x128xf32>
    %368 = arith.addf %367, %11 : vector<16x128xf32>
    %369 = arith.mulf %356, %368 : vector<16x128xf32>
    %370 = arith.extf %366 : vector<16x128xbf16> to vector<16x128xf32>
    %371 = arith.addf %370, %369 : vector<16x128xf32>
    %372 = math.tanh %371 : vector<16x128xf32>
    %373 = arith.subf %285, %372 : vector<16x128xf32>
    %374 = arith.mulf %365, %373 : vector<16x128xf32>
    %375 = arith.addf %372, %374 : vector<16x128xf32>
    %376 = vector.shape_cast %343 : vector<16x1xi1> to vector<16x1xi1>
    %377 = vector.broadcast %376 : vector<16x1xi1> to vector<16x128xi1>
    %378 = arith.select %377, %375, %285 : vector<16x128xi1>, vector<16x128xf32>
    %cst_90 = arith.constant 0.000000e+00 : f32
    %379 = vector.shape_cast %343 : vector<16x1xi1> to vector<16x1xi1>
    %380 = vector.broadcast %379 : vector<16x1xi1> to vector<16x128xi1>
    %381 = vector.broadcast %cst_90 : f32 to vector<16x128xf32>
    %382 = arith.select %380, %378, %381 : vector<16x128xi1>, vector<16x128xf32>
    %383 = arith.truncf %382 : vector<16x128xf32> to vector<16x128xbf16>
    %c4_91 = arith.constant 4 : index
    %c0_92 = arith.constant 0 : index
    %c0_93 = arith.constant 0 : index
    %384 = vector.load %arg9[%c4_91, %c0_92, %c0_93] : memref<8x16x128xbf16, #tpu.memory_space<vmem>>, vector<1x16x128xbf16>
    %385 = vector.shape_cast %384 : vector<1x16x128xbf16> to vector<16x128xbf16>
    %386 = vector.shape_cast %383 : vector<16x128xbf16> to vector<1x16x128xbf16>
    tpu.vector_store %arg9[%c4_91, %c0_92, %c0_93], %386 {strides = array<i32>} : memref<8x16x128xbf16, #tpu.memory_space<vmem>>, vector<1x16x128xbf16>,
    %c4_i32 = arith.constant 4 : i32
    %387 = arith.addi %12, %c4_i32 : i32
    %388 = vector.broadcast %387 : i32 to vector<16x1xi32>
    %389 = arith.cmpi slt, %388, %3 : vector<16x1xi32>
    %c4_94 = arith.constant 4 : index
    %c0_95 = arith.constant 0 : index
    %c0_96 = arith.constant 0 : index
    %390 = vector.load %arg2[%c4_94, %c0_95, %c0_96] : memref<8x16x384xbf16, #tpu.memory_space<vmem>>, vector<1x16x384xbf16>
    %391 = vector.shape_cast %390 : vector<1x16x384xbf16> to vector<16x384xbf16>
    %392 = arith.truncf %331 : vector<16x128xf32> to vector<16x128xbf16>
    %cst_97 = arith.constant dense<0.000000e+00> : vector<16x384xf32>
    %393 = tpu.matmul %392, %4, %cst_97 {dimension_numbers = #tpu.dot_dimension_numbers<[1], [0], [0], [1], [0, 0, 1, 1], [], []>} : vector<16x128xbf16>, vector<128x384xbf16>, vector<16x384xf32> -> vector<16x384xf32>
    %394 = vector.extract_strided_slice %391 {offsets = [0, 0], sizes = [16, 128], strides = [1, 1]} : vector<16x384xbf16> to vector<16x128xbf16>
    %395 = vector.extract_strided_slice %393 {offsets = [0, 0], sizes = [16, 128], strides = [1, 1]} : vector<16x384xf32> to vector<16x128xf32>
    %396 = arith.extf %394 : vector<16x128xbf16> to vector<16x128xf32>
    %397 = arith.addf %396, %395 : vector<16x128xf32>
    %398 = arith.negf %397 : vector<16x128xf32>
    %399 = math.exp %398 : vector<16x128xf32>
    %cst_98 = arith.constant 1.000000e+00 : f32
    %400 = vector.broadcast %cst_98 : f32 to vector<16x128xf32>
    %401 = arith.addf %400, %399 : vector<16x128xf32>
    %402 = arith.divf %400, %401 : vector<16x128xf32>
    %403 = vector.extract_strided_slice %391 {offsets = [0, 128], sizes = [16, 128], strides = [1, 1]} : vector<16x384xbf16> to vector<16x128xbf16>
    %404 = vector.extract_strided_slice %393 {offsets = [0, 128], sizes = [16, 128], strides = [1, 1]} : vector<16x384xf32> to vector<16x128xf32>
    %405 = arith.extf %403 : vector<16x128xbf16> to vector<16x128xf32>
    %406 = arith.addf %405, %404 : vector<16x128xf32>
    %407 = arith.negf %406 : vector<16x128xf32>
    %408 = math.exp %407 : vector<16x128xf32>
    %cst_99 = arith.constant 1.000000e+00 : f32
    %409 = vector.broadcast %cst_99 : f32 to vector<16x128xf32>
    %410 = arith.addf %409, %408 : vector<16x128xf32>
    %411 = arith.divf %409, %410 : vector<16x128xf32>
    %412 = vector.extract_strided_slice %391 {offsets = [0, 256], sizes = [16, 128], strides = [1, 1]} : vector<16x384xbf16> to vector<16x128xbf16>
    %413 = vector.extract_strided_slice %393 {offsets = [0, 256], sizes = [16, 128], strides = [1, 1]} : vector<16x384xf32> to vector<16x128xf32>
    %414 = arith.addf %413, %8 : vector<16x128xf32>
    %415 = arith.mulf %402, %414 : vector<16x128xf32>
    %416 = arith.extf %412 : vector<16x128xbf16> to vector<16x128xf32>
    %417 = arith.addf %416, %415 : vector<16x128xf32>
    %418 = math.tanh %417 : vector<16x128xf32>
    %419 = arith.subf %331, %418 : vector<16x128xf32>
    %420 = arith.mulf %411, %419 : vector<16x128xf32>
    %421 = arith.addf %418, %420 : vector<16x128xf32>
    %422 = vector.shape_cast %389 : vector<16x1xi1> to vector<16x1xi1>
    %423 = vector.broadcast %422 : vector<16x1xi1> to vector<16x128xi1>
    %424 = arith.select %423, %421, %331 : vector<16x128xi1>, vector<16x128xf32>
    %cst_100 = arith.constant 0.000000e+00 : f32
    %425 = vector.shape_cast %389 : vector<16x1xi1> to vector<16x1xi1>
    %426 = vector.broadcast %425 : vector<16x1xi1> to vector<16x128xi1>
    %427 = vector.broadcast %cst_100 : f32 to vector<16x128xf32>
    %428 = arith.select %426, %424, %427 : vector<16x128xi1>, vector<16x128xf32>
    %429 = arith.truncf %428 : vector<16x128xf32> to vector<16x128xbf16>
    %c4_101 = arith.constant 4 : index
    %c0_102 = arith.constant 0 : index
    %c0_103 = arith.constant 0 : index
    %430 = vector.load %arg8[%c4_101, %c0_102, %c0_103] : memref<8x16x128xbf16, #tpu.memory_space<vmem>>, vector<1x16x128xbf16>
    %431 = vector.shape_cast %430 : vector<1x16x128xbf16> to vector<16x128xbf16>
    %432 = vector.shape_cast %429 : vector<16x128xbf16> to vector<1x16x128xbf16>
    tpu.vector_store %arg8[%c4_101, %c0_102, %c0_103], %432 {strides = array<i32>} : memref<8x16x128xbf16, #tpu.memory_space<vmem>>, vector<1x16x128xbf16>,
    %c15_i32_104 = arith.constant 15 : i32
    %433 = arith.subi %c15_i32_104, %12 : i32
    %c4_i32_105 = arith.constant 4 : i32
    %434 = arith.subi %433, %c4_i32_105 : i32
    %435 = vector.broadcast %434 : i32 to vector<16x1xi32>
    %436 = arith.cmpi slt, %435, %3 : vector<16x1xi32>
    %c3_106 = arith.constant 3 : index
    %c0_107 = arith.constant 0 : index
    %c0_108 = arith.constant 0 : index
    %437 = vector.load %arg3[%c3_106, %c0_107, %c0_108] : memref<8x16x384xbf16, #tpu.memory_space<vmem>>, vector<1x16x384xbf16>
    %438 = vector.shape_cast %437 : vector<1x16x384xbf16> to vector<16x384xbf16>
    %439 = arith.truncf %378 : vector<16x128xf32> to vector<16x128xbf16>
    %cst_109 = arith.constant dense<0.000000e+00> : vector<16x384xf32>
    %440 = tpu.matmul %439, %5, %cst_109 {dimension_numbers = #tpu.dot_dimension_numbers<[1], [0], [0], [1], [0, 0, 1, 1], [], []>} : vector<16x128xbf16>, vector<128x384xbf16>, vector<16x384xf32> -> vector<16x384xf32>
    %441 = vector.extract_strided_slice %438 {offsets = [0, 0], sizes = [16, 128], strides = [1, 1]} : vector<16x384xbf16> to vector<16x128xbf16>
    %442 = vector.extract_strided_slice %440 {offsets = [0, 0], sizes = [16, 128], strides = [1, 1]} : vector<16x384xf32> to vector<16x128xf32>
    %443 = arith.extf %441 : vector<16x128xbf16> to vector<16x128xf32>
    %444 = arith.addf %443, %442 : vector<16x128xf32>
    %445 = arith.negf %444 : vector<16x128xf32>
    %446 = math.exp %445 : vector<16x128xf32>
    %cst_110 = arith.constant 1.000000e+00 : f32
    %447 = vector.broadcast %cst_110 : f32 to vector<16x128xf32>
    %448 = arith.addf %447, %446 : vector<16x128xf32>
    %449 = arith.divf %447, %448 : vector<16x128xf32>
    %450 = vector.extract_strided_slice %438 {offsets = [0, 128], sizes = [16, 128], strides = [1, 1]} : vector<16x384xbf16> to vector<16x128xbf16>
    %451 = vector.extract_strided_slice %440 {offsets = [0, 128], sizes = [16, 128], strides = [1, 1]} : vector<16x384xf32> to vector<16x128xf32>
    %452 = arith.extf %450 : vector<16x128xbf16> to vector<16x128xf32>
    %453 = arith.addf %452, %451 : vector<16x128xf32>
    %454 = arith.negf %453 : vector<16x128xf32>
    %455 = math.exp %454 : vector<16x128xf32>
    %cst_111 = arith.constant 1.000000e+00 : f32
    %456 = vector.broadcast %cst_111 : f32 to vector<16x128xf32>
    %457 = arith.addf %456, %455 : vector<16x128xf32>
    %458 = arith.divf %456, %457 : vector<16x128xf32>
    %459 = vector.extract_strided_slice %438 {offsets = [0, 256], sizes = [16, 128], strides = [1, 1]} : vector<16x384xbf16> to vector<16x128xbf16>
    %460 = vector.extract_strided_slice %440 {offsets = [0, 256], sizes = [16, 128], strides = [1, 1]} : vector<16x384xf32> to vector<16x128xf32>
    %461 = arith.addf %460, %11 : vector<16x128xf32>
    %462 = arith.mulf %449, %461 : vector<16x128xf32>
    %463 = arith.extf %459 : vector<16x128xbf16> to vector<16x128xf32>
    %464 = arith.addf %463, %462 : vector<16x128xf32>
    %465 = math.tanh %464 : vector<16x128xf32>
    %466 = arith.subf %378, %465 : vector<16x128xf32>
    %467 = arith.mulf %458, %466 : vector<16x128xf32>
    %468 = arith.addf %465, %467 : vector<16x128xf32>
    %469 = vector.shape_cast %436 : vector<16x1xi1> to vector<16x1xi1>
    %470 = vector.broadcast %469 : vector<16x1xi1> to vector<16x128xi1>
    %471 = arith.select %470, %468, %378 : vector<16x128xi1>, vector<16x128xf32>
    %cst_112 = arith.constant 0.000000e+00 : f32
    %472 = vector.shape_cast %436 : vector<16x1xi1> to vector<16x1xi1>
    %473 = vector.broadcast %472 : vector<16x1xi1> to vector<16x128xi1>
    %474 = vector.broadcast %cst_112 : f32 to vector<16x128xf32>
    %475 = arith.select %473, %471, %474 : vector<16x128xi1>, vector<16x128xf32>
    %476 = arith.truncf %475 : vector<16x128xf32> to vector<16x128xbf16>
    %c3_113 = arith.constant 3 : index
    %c0_114 = arith.constant 0 : index
    %c0_115 = arith.constant 0 : index
    %477 = vector.load %arg9[%c3_113, %c0_114, %c0_115] : memref<8x16x128xbf16, #tpu.memory_space<vmem>>, vector<1x16x128xbf16>
    %478 = vector.shape_cast %477 : vector<1x16x128xbf16> to vector<16x128xbf16>
    %479 = vector.shape_cast %476 : vector<16x128xbf16> to vector<1x16x128xbf16>
    tpu.vector_store %arg9[%c3_113, %c0_114, %c0_115], %479 {strides = array<i32>} : memref<8x16x128xbf16, #tpu.memory_space<vmem>>, vector<1x16x128xbf16>,
    %c5_i32 = arith.constant 5 : i32
    %480 = arith.addi %12, %c5_i32 : i32
    %481 = vector.broadcast %480 : i32 to vector<16x1xi32>
    %482 = arith.cmpi slt, %481, %3 : vector<16x1xi32>
    %c5_116 = arith.constant 5 : index
    %c0_117 = arith.constant 0 : index
    %c0_118 = arith.constant 0 : index
    %483 = vector.load %arg2[%c5_116, %c0_117, %c0_118] : memref<8x16x384xbf16, #tpu.memory_space<vmem>>, vector<1x16x384xbf16>
    %484 = vector.shape_cast %483 : vector<1x16x384xbf16> to vector<16x384xbf16>
    %485 = arith.truncf %424 : vector<16x128xf32> to vector<16x128xbf16>
    %cst_119 = arith.constant dense<0.000000e+00> : vector<16x384xf32>
    %486 = tpu.matmul %485, %4, %cst_119 {dimension_numbers = #tpu.dot_dimension_numbers<[1], [0], [0], [1], [0, 0, 1, 1], [], []>} : vector<16x128xbf16>, vector<128x384xbf16>, vector<16x384xf32> -> vector<16x384xf32>
    %487 = vector.extract_strided_slice %484 {offsets = [0, 0], sizes = [16, 128], strides = [1, 1]} : vector<16x384xbf16> to vector<16x128xbf16>
    %488 = vector.extract_strided_slice %486 {offsets = [0, 0], sizes = [16, 128], strides = [1, 1]} : vector<16x384xf32> to vector<16x128xf32>
    %489 = arith.extf %487 : vector<16x128xbf16> to vector<16x128xf32>
    %490 = arith.addf %489, %488 : vector<16x128xf32>
    %491 = arith.negf %490 : vector<16x128xf32>
    %492 = math.exp %491 : vector<16x128xf32>
    %cst_120 = arith.constant 1.000000e+00 : f32
    %493 = vector.broadcast %cst_120 : f32 to vector<16x128xf32>
    %494 = arith.addf %493, %492 : vector<16x128xf32>
    %495 = arith.divf %493, %494 : vector<16x128xf32>
    %496 = vector.extract_strided_slice %484 {offsets = [0, 128], sizes = [16, 128], strides = [1, 1]} : vector<16x384xbf16> to vector<16x128xbf16>
    %497 = vector.extract_strided_slice %486 {offsets = [0, 128], sizes = [16, 128], strides = [1, 1]} : vector<16x384xf32> to vector<16x128xf32>
    %498 = arith.extf %496 : vector<16x128xbf16> to vector<16x128xf32>
    %499 = arith.addf %498, %497 : vector<16x128xf32>
    %500 = arith.negf %499 : vector<16x128xf32>
    %501 = math.exp %500 : vector<16x128xf32>
    %cst_121 = arith.constant 1.000000e+00 : f32
    %502 = vector.broadcast %cst_121 : f32 to vector<16x128xf32>
    %503 = arith.addf %502, %501 : vector<16x128xf32>
    %504 = arith.divf %502, %503 : vector<16x128xf32>
    %505 = vector.extract_strided_slice %484 {offsets = [0, 256], sizes = [16, 128], strides = [1, 1]} : vector<16x384xbf16> to vector<16x128xbf16>
    %506 = vector.extract_strided_slice %486 {offsets = [0, 256], sizes = [16, 128], strides = [1, 1]} : vector<16x384xf32> to vector<16x128xf32>
    %507 = arith.addf %506, %8 : vector<16x128xf32>
    %508 = arith.mulf %495, %507 : vector<16x128xf32>
    %509 = arith.extf %505 : vector<16x128xbf16> to vector<16x128xf32>
    %510 = arith.addf %509, %508 : vector<16x128xf32>
    %511 = math.tanh %510 : vector<16x128xf32>
    %512 = arith.subf %424, %511 : vector<16x128xf32>
    %513 = arith.mulf %504, %512 : vector<16x128xf32>
    %514 = arith.addf %511, %513 : vector<16x128xf32>
    %515 = vector.shape_cast %482 : vector<16x1xi1> to vector<16x1xi1>
    %516 = vector.broadcast %515 : vector<16x1xi1> to vector<16x128xi1>
    %517 = arith.select %516, %514, %424 : vector<16x128xi1>, vector<16x128xf32>
    %cst_122 = arith.constant 0.000000e+00 : f32
    %518 = vector.shape_cast %482 : vector<16x1xi1> to vector<16x1xi1>
    %519 = vector.broadcast %518 : vector<16x1xi1> to vector<16x128xi1>
    %520 = vector.broadcast %cst_122 : f32 to vector<16x128xf32>
    %521 = arith.select %519, %517, %520 : vector<16x128xi1>, vector<16x128xf32>
    %522 = arith.truncf %521 : vector<16x128xf32> to vector<16x128xbf16>
    %c5_123 = arith.constant 5 : index
    %c0_124 = arith.constant 0 : index
    %c0_125 = arith.constant 0 : index
    %523 = vector.load %arg8[%c5_123, %c0_124, %c0_125] : memref<8x16x128xbf16, #tpu.memory_space<vmem>>, vector<1x16x128xbf16>
    %524 = vector.shape_cast %523 : vector<1x16x128xbf16> to vector<16x128xbf16>
    %525 = vector.shape_cast %522 : vector<16x128xbf16> to vector<1x16x128xbf16>
    tpu.vector_store %arg8[%c5_123, %c0_124, %c0_125], %525 {strides = array<i32>} : memref<8x16x128xbf16, #tpu.memory_space<vmem>>, vector<1x16x128xbf16>,
    %c15_i32_126 = arith.constant 15 : i32
    %526 = arith.subi %c15_i32_126, %12 : i32
    %c5_i32_127 = arith.constant 5 : i32
    %527 = arith.subi %526, %c5_i32_127 : i32
    %528 = vector.broadcast %527 : i32 to vector<16x1xi32>
    %529 = arith.cmpi slt, %528, %3 : vector<16x1xi32>
    %c2_128 = arith.constant 2 : index
    %c0_129 = arith.constant 0 : index
    %c0_130 = arith.constant 0 : index
    %530 = vector.load %arg3[%c2_128, %c0_129, %c0_130] : memref<8x16x384xbf16, #tpu.memory_space<vmem>>, vector<1x16x384xbf16>
    %531 = vector.shape_cast %530 : vector<1x16x384xbf16> to vector<16x384xbf16>
    %532 = arith.truncf %471 : vector<16x128xf32> to vector<16x128xbf16>
    %cst_131 = arith.constant dense<0.000000e+00> : vector<16x384xf32>
    %533 = tpu.matmul %532, %5, %cst_131 {dimension_numbers = #tpu.dot_dimension_numbers<[1], [0], [0], [1], [0, 0, 1, 1], [], []>} : vector<16x128xbf16>, vector<128x384xbf16>, vector<16x384xf32> -> vector<16x384xf32>
    %534 = vector.extract_strided_slice %531 {offsets = [0, 0], sizes = [16, 128], strides = [1, 1]} : vector<16x384xbf16> to vector<16x128xbf16>
    %535 = vector.extract_strided_slice %533 {offsets = [0, 0], sizes = [16, 128], strides = [1, 1]} : vector<16x384xf32> to vector<16x128xf32>
    %536 = arith.extf %534 : vector<16x128xbf16> to vector<16x128xf32>
    %537 = arith.addf %536, %535 : vector<16x128xf32>
    %538 = arith.negf %537 : vector<16x128xf32>
    %539 = math.exp %538 : vector<16x128xf32>
    %cst_132 = arith.constant 1.000000e+00 : f32
    %540 = vector.broadcast %cst_132 : f32 to vector<16x128xf32>
    %541 = arith.addf %540, %539 : vector<16x128xf32>
    %542 = arith.divf %540, %541 : vector<16x128xf32>
    %543 = vector.extract_strided_slice %531 {offsets = [0, 128], sizes = [16, 128], strides = [1, 1]} : vector<16x384xbf16> to vector<16x128xbf16>
    %544 = vector.extract_strided_slice %533 {offsets = [0, 128], sizes = [16, 128], strides = [1, 1]} : vector<16x384xf32> to vector<16x128xf32>
    %545 = arith.extf %543 : vector<16x128xbf16> to vector<16x128xf32>
    %546 = arith.addf %545, %544 : vector<16x128xf32>
    %547 = arith.negf %546 : vector<16x128xf32>
    %548 = math.exp %547 : vector<16x128xf32>
    %cst_133 = arith.constant 1.000000e+00 : f32
    %549 = vector.broadcast %cst_133 : f32 to vector<16x128xf32>
    %550 = arith.addf %549, %548 : vector<16x128xf32>
    %551 = arith.divf %549, %550 : vector<16x128xf32>
    %552 = vector.extract_strided_slice %531 {offsets = [0, 256], sizes = [16, 128], strides = [1, 1]} : vector<16x384xbf16> to vector<16x128xbf16>
    %553 = vector.extract_strided_slice %533 {offsets = [0, 256], sizes = [16, 128], strides = [1, 1]} : vector<16x384xf32> to vector<16x128xf32>
    %554 = arith.addf %553, %11 : vector<16x128xf32>
    %555 = arith.mulf %542, %554 : vector<16x128xf32>
    %556 = arith.extf %552 : vector<16x128xbf16> to vector<16x128xf32>
    %557 = arith.addf %556, %555 : vector<16x128xf32>
    %558 = math.tanh %557 : vector<16x128xf32>
    %559 = arith.subf %471, %558 : vector<16x128xf32>
    %560 = arith.mulf %551, %559 : vector<16x128xf32>
    %561 = arith.addf %558, %560 : vector<16x128xf32>
    %562 = vector.shape_cast %529 : vector<16x1xi1> to vector<16x1xi1>
    %563 = vector.broadcast %562 : vector<16x1xi1> to vector<16x128xi1>
    %564 = arith.select %563, %561, %471 : vector<16x128xi1>, vector<16x128xf32>
    %cst_134 = arith.constant 0.000000e+00 : f32
    %565 = vector.shape_cast %529 : vector<16x1xi1> to vector<16x1xi1>
    %566 = vector.broadcast %565 : vector<16x1xi1> to vector<16x128xi1>
    %567 = vector.broadcast %cst_134 : f32 to vector<16x128xf32>
    %568 = arith.select %566, %564, %567 : vector<16x128xi1>, vector<16x128xf32>
    %569 = arith.truncf %568 : vector<16x128xf32> to vector<16x128xbf16>
    %c2_135 = arith.constant 2 : index
    %c0_136 = arith.constant 0 : index
    %c0_137 = arith.constant 0 : index
    %570 = vector.load %arg9[%c2_135, %c0_136, %c0_137] : memref<8x16x128xbf16, #tpu.memory_space<vmem>>, vector<1x16x128xbf16>
    %571 = vector.shape_cast %570 : vector<1x16x128xbf16> to vector<16x128xbf16>
    %572 = vector.shape_cast %569 : vector<16x128xbf16> to vector<1x16x128xbf16>
    tpu.vector_store %arg9[%c2_135, %c0_136, %c0_137], %572 {strides = array<i32>} : memref<8x16x128xbf16, #tpu.memory_space<vmem>>, vector<1x16x128xbf16>,
    %c6_i32 = arith.constant 6 : i32
    %573 = arith.addi %12, %c6_i32 : i32
    %574 = vector.broadcast %573 : i32 to vector<16x1xi32>
    %575 = arith.cmpi slt, %574, %3 : vector<16x1xi32>
    %c6_138 = arith.constant 6 : index
    %c0_139 = arith.constant 0 : index
    %c0_140 = arith.constant 0 : index
    %576 = vector.load %arg2[%c6_138, %c0_139, %c0_140] : memref<8x16x384xbf16, #tpu.memory_space<vmem>>, vector<1x16x384xbf16>
    %577 = vector.shape_cast %576 : vector<1x16x384xbf16> to vector<16x384xbf16>
    %578 = arith.truncf %517 : vector<16x128xf32> to vector<16x128xbf16>
    %cst_141 = arith.constant dense<0.000000e+00> : vector<16x384xf32>
    %579 = tpu.matmul %578, %4, %cst_141 {dimension_numbers = #tpu.dot_dimension_numbers<[1], [0], [0], [1], [0, 0, 1, 1], [], []>} : vector<16x128xbf16>, vector<128x384xbf16>, vector<16x384xf32> -> vector<16x384xf32>
    %580 = vector.extract_strided_slice %577 {offsets = [0, 0], sizes = [16, 128], strides = [1, 1]} : vector<16x384xbf16> to vector<16x128xbf16>
    %581 = vector.extract_strided_slice %579 {offsets = [0, 0], sizes = [16, 128], strides = [1, 1]} : vector<16x384xf32> to vector<16x128xf32>
    %582 = arith.extf %580 : vector<16x128xbf16> to vector<16x128xf32>
    %583 = arith.addf %582, %581 : vector<16x128xf32>
    %584 = arith.negf %583 : vector<16x128xf32>
    %585 = math.exp %584 : vector<16x128xf32>
    %cst_142 = arith.constant 1.000000e+00 : f32
    %586 = vector.broadcast %cst_142 : f32 to vector<16x128xf32>
    %587 = arith.addf %586, %585 : vector<16x128xf32>
    %588 = arith.divf %586, %587 : vector<16x128xf32>
    %589 = vector.extract_strided_slice %577 {offsets = [0, 128], sizes = [16, 128], strides = [1, 1]} : vector<16x384xbf16> to vector<16x128xbf16>
    %590 = vector.extract_strided_slice %579 {offsets = [0, 128], sizes = [16, 128], strides = [1, 1]} : vector<16x384xf32> to vector<16x128xf32>
    %591 = arith.extf %589 : vector<16x128xbf16> to vector<16x128xf32>
    %592 = arith.addf %591, %590 : vector<16x128xf32>
    %593 = arith.negf %592 : vector<16x128xf32>
    %594 = math.exp %593 : vector<16x128xf32>
    %cst_143 = arith.constant 1.000000e+00 : f32
    %595 = vector.broadcast %cst_143 : f32 to vector<16x128xf32>
    %596 = arith.addf %595, %594 : vector<16x128xf32>
    %597 = arith.divf %595, %596 : vector<16x128xf32>
    %598 = vector.extract_strided_slice %577 {offsets = [0, 256], sizes = [16, 128], strides = [1, 1]} : vector<16x384xbf16> to vector<16x128xbf16>
    %599 = vector.extract_strided_slice %579 {offsets = [0, 256], sizes = [16, 128], strides = [1, 1]} : vector<16x384xf32> to vector<16x128xf32>
    %600 = arith.addf %599, %8 : vector<16x128xf32>
    %601 = arith.mulf %588, %600 : vector<16x128xf32>
    %602 = arith.extf %598 : vector<16x128xbf16> to vector<16x128xf32>
    %603 = arith.addf %602, %601 : vector<16x128xf32>
    %604 = math.tanh %603 : vector<16x128xf32>
    %605 = arith.subf %517, %604 : vector<16x128xf32>
    %606 = arith.mulf %597, %605 : vector<16x128xf32>
    %607 = arith.addf %604, %606 : vector<16x128xf32>
    %608 = vector.shape_cast %575 : vector<16x1xi1> to vector<16x1xi1>
    %609 = vector.broadcast %608 : vector<16x1xi1> to vector<16x128xi1>
    %610 = arith.select %609, %607, %517 : vector<16x128xi1>, vector<16x128xf32>
    %cst_144 = arith.constant 0.000000e+00 : f32
    %611 = vector.shape_cast %575 : vector<16x1xi1> to vector<16x1xi1>
    %612 = vector.broadcast %611 : vector<16x1xi1> to vector<16x128xi1>
    %613 = vector.broadcast %cst_144 : f32 to vector<16x128xf32>
    %614 = arith.select %612, %610, %613 : vector<16x128xi1>, vector<16x128xf32>
    %615 = arith.truncf %614 : vector<16x128xf32> to vector<16x128xbf16>
    %c6_145 = arith.constant 6 : index
    %c0_146 = arith.constant 0 : index
    %c0_147 = arith.constant 0 : index
    %616 = vector.load %arg8[%c6_145, %c0_146, %c0_147] : memref<8x16x128xbf16, #tpu.memory_space<vmem>>, vector<1x16x128xbf16>
    %617 = vector.shape_cast %616 : vector<1x16x128xbf16> to vector<16x128xbf16>
    %618 = vector.shape_cast %615 : vector<16x128xbf16> to vector<1x16x128xbf16>
    tpu.vector_store %arg8[%c6_145, %c0_146, %c0_147], %618 {strides = array<i32>} : memref<8x16x128xbf16, #tpu.memory_space<vmem>>, vector<1x16x128xbf16>,
    %c15_i32_148 = arith.constant 15 : i32
    %619 = arith.subi %c15_i32_148, %12 : i32
    %c6_i32_149 = arith.constant 6 : i32
    %620 = arith.subi %619, %c6_i32_149 : i32
    %621 = vector.broadcast %620 : i32 to vector<16x1xi32>
    %622 = arith.cmpi slt, %621, %3 : vector<16x1xi32>
    %c1_150 = arith.constant 1 : index
    %c0_151 = arith.constant 0 : index
    %c0_152 = arith.constant 0 : index
    %623 = vector.load %arg3[%c1_150, %c0_151, %c0_152] : memref<8x16x384xbf16, #tpu.memory_space<vmem>>, vector<1x16x384xbf16>
    %624 = vector.shape_cast %623 : vector<1x16x384xbf16> to vector<16x384xbf16>
    %625 = arith.truncf %564 : vector<16x128xf32> to vector<16x128xbf16>
    %cst_153 = arith.constant dense<0.000000e+00> : vector<16x384xf32>
    %626 = tpu.matmul %625, %5, %cst_153 {dimension_numbers = #tpu.dot_dimension_numbers<[1], [0], [0], [1], [0, 0, 1, 1], [], []>} : vector<16x128xbf16>, vector<128x384xbf16>, vector<16x384xf32> -> vector<16x384xf32>
    %627 = vector.extract_strided_slice %624 {offsets = [0, 0], sizes = [16, 128], strides = [1, 1]} : vector<16x384xbf16> to vector<16x128xbf16>
    %628 = vector.extract_strided_slice %626 {offsets = [0, 0], sizes = [16, 128], strides = [1, 1]} : vector<16x384xf32> to vector<16x128xf32>
    %629 = arith.extf %627 : vector<16x128xbf16> to vector<16x128xf32>
    %630 = arith.addf %629, %628 : vector<16x128xf32>
    %631 = arith.negf %630 : vector<16x128xf32>
    %632 = math.exp %631 : vector<16x128xf32>
    %cst_154 = arith.constant 1.000000e+00 : f32
    %633 = vector.broadcast %cst_154 : f32 to vector<16x128xf32>
    %634 = arith.addf %633, %632 : vector<16x128xf32>
    %635 = arith.divf %633, %634 : vector<16x128xf32>
    %636 = vector.extract_strided_slice %624 {offsets = [0, 128], sizes = [16, 128], strides = [1, 1]} : vector<16x384xbf16> to vector<16x128xbf16>
    %637 = vector.extract_strided_slice %626 {offsets = [0, 128], sizes = [16, 128], strides = [1, 1]} : vector<16x384xf32> to vector<16x128xf32>
    %638 = arith.extf %636 : vector<16x128xbf16> to vector<16x128xf32>
    %639 = arith.addf %638, %637 : vector<16x128xf32>
    %640 = arith.negf %639 : vector<16x128xf32>
    %641 = math.exp %640 : vector<16x128xf32>
    %cst_155 = arith.constant 1.000000e+00 : f32
    %642 = vector.broadcast %cst_155 : f32 to vector<16x128xf32>
    %643 = arith.addf %642, %641 : vector<16x128xf32>
    %644 = arith.divf %642, %643 : vector<16x128xf32>
    %645 = vector.extract_strided_slice %624 {offsets = [0, 256], sizes = [16, 128], strides = [1, 1]} : vector<16x384xbf16> to vector<16x128xbf16>
    %646 = vector.extract_strided_slice %626 {offsets = [0, 256], sizes = [16, 128], strides = [1, 1]} : vector<16x384xf32> to vector<16x128xf32>
    %647 = arith.addf %646, %11 : vector<16x128xf32>
    %648 = arith.mulf %635, %647 : vector<16x128xf32>
    %649 = arith.extf %645 : vector<16x128xbf16> to vector<16x128xf32>
    %650 = arith.addf %649, %648 : vector<16x128xf32>
    %651 = math.tanh %650 : vector<16x128xf32>
    %652 = arith.subf %564, %651 : vector<16x128xf32>
    %653 = arith.mulf %644, %652 : vector<16x128xf32>
    %654 = arith.addf %651, %653 : vector<16x128xf32>
    %655 = vector.shape_cast %622 : vector<16x1xi1> to vector<16x1xi1>
    %656 = vector.broadcast %655 : vector<16x1xi1> to vector<16x128xi1>
    %657 = arith.select %656, %654, %564 : vector<16x128xi1>, vector<16x128xf32>
    %cst_156 = arith.constant 0.000000e+00 : f32
    %658 = vector.shape_cast %622 : vector<16x1xi1> to vector<16x1xi1>
    %659 = vector.broadcast %658 : vector<16x1xi1> to vector<16x128xi1>
    %660 = vector.broadcast %cst_156 : f32 to vector<16x128xf32>
    %661 = arith.select %659, %657, %660 : vector<16x128xi1>, vector<16x128xf32>
    %662 = arith.truncf %661 : vector<16x128xf32> to vector<16x128xbf16>
    %c1_157 = arith.constant 1 : index
    %c0_158 = arith.constant 0 : index
    %c0_159 = arith.constant 0 : index
    %663 = vector.load %arg9[%c1_157, %c0_158, %c0_159] : memref<8x16x128xbf16, #tpu.memory_space<vmem>>, vector<1x16x128xbf16>
    %664 = vector.shape_cast %663 : vector<1x16x128xbf16> to vector<16x128xbf16>
    %665 = vector.shape_cast %662 : vector<16x128xbf16> to vector<1x16x128xbf16>
    tpu.vector_store %arg9[%c1_157, %c0_158, %c0_159], %665 {strides = array<i32>} : memref<8x16x128xbf16, #tpu.memory_space<vmem>>, vector<1x16x128xbf16>,
    %c7_i32 = arith.constant 7 : i32
    %666 = arith.addi %12, %c7_i32 : i32
    %667 = vector.broadcast %666 : i32 to vector<16x1xi32>
    %668 = arith.cmpi slt, %667, %3 : vector<16x1xi32>
    %c7_160 = arith.constant 7 : index
    %c0_161 = arith.constant 0 : index
    %c0_162 = arith.constant 0 : index
    %669 = vector.load %arg2[%c7_160, %c0_161, %c0_162] : memref<8x16x384xbf16, #tpu.memory_space<vmem>>, vector<1x16x384xbf16>
    %670 = vector.shape_cast %669 : vector<1x16x384xbf16> to vector<16x384xbf16>
    %671 = arith.truncf %610 : vector<16x128xf32> to vector<16x128xbf16>
    %cst_163 = arith.constant dense<0.000000e+00> : vector<16x384xf32>
    %672 = tpu.matmul %671, %4, %cst_163 {dimension_numbers = #tpu.dot_dimension_numbers<[1], [0], [0], [1], [0, 0, 1, 1], [], []>} : vector<16x128xbf16>, vector<128x384xbf16>, vector<16x384xf32> -> vector<16x384xf32>
    %673 = vector.extract_strided_slice %670 {offsets = [0, 0], sizes = [16, 128], strides = [1, 1]} : vector<16x384xbf16> to vector<16x128xbf16>
    %674 = vector.extract_strided_slice %672 {offsets = [0, 0], sizes = [16, 128], strides = [1, 1]} : vector<16x384xf32> to vector<16x128xf32>
    %675 = arith.extf %673 : vector<16x128xbf16> to vector<16x128xf32>
    %676 = arith.addf %675, %674 : vector<16x128xf32>
    %677 = arith.negf %676 : vector<16x128xf32>
    %678 = math.exp %677 : vector<16x128xf32>
    %cst_164 = arith.constant 1.000000e+00 : f32
    %679 = vector.broadcast %cst_164 : f32 to vector<16x128xf32>
    %680 = arith.addf %679, %678 : vector<16x128xf32>
    %681 = arith.divf %679, %680 : vector<16x128xf32>
    %682 = vector.extract_strided_slice %670 {offsets = [0, 128], sizes = [16, 128], strides = [1, 1]} : vector<16x384xbf16> to vector<16x128xbf16>
    %683 = vector.extract_strided_slice %672 {offsets = [0, 128], sizes = [16, 128], strides = [1, 1]} : vector<16x384xf32> to vector<16x128xf32>
    %684 = arith.extf %682 : vector<16x128xbf16> to vector<16x128xf32>
    %685 = arith.addf %684, %683 : vector<16x128xf32>
    %686 = arith.negf %685 : vector<16x128xf32>
    %687 = math.exp %686 : vector<16x128xf32>
    %cst_165 = arith.constant 1.000000e+00 : f32
    %688 = vector.broadcast %cst_165 : f32 to vector<16x128xf32>
    %689 = arith.addf %688, %687 : vector<16x128xf32>
    %690 = arith.divf %688, %689 : vector<16x128xf32>
    %691 = vector.extract_strided_slice %670 {offsets = [0, 256], sizes = [16, 128], strides = [1, 1]} : vector<16x384xbf16> to vector<16x128xbf16>
    %692 = vector.extract_strided_slice %672 {offsets = [0, 256], sizes = [16, 128], strides = [1, 1]} : vector<16x384xf32> to vector<16x128xf32>
    %693 = arith.addf %692, %8 : vector<16x128xf32>
    %694 = arith.mulf %681, %693 : vector<16x128xf32>
    %695 = arith.extf %691 : vector<16x128xbf16> to vector<16x128xf32>
    %696 = arith.addf %695, %694 : vector<16x128xf32>
    %697 = math.tanh %696 : vector<16x128xf32>
    %698 = arith.subf %610, %697 : vector<16x128xf32>
    %699 = arith.mulf %690, %698 : vector<16x128xf32>
    %700 = arith.addf %697, %699 : vector<16x128xf32>
    %701 = vector.shape_cast %668 : vector<16x1xi1> to vector<16x1xi1>
    %702 = vector.broadcast %701 : vector<16x1xi1> to vector<16x128xi1>
    %703 = arith.select %702, %700, %610 : vector<16x128xi1>, vector<16x128xf32>
    %cst_166 = arith.constant 0.000000e+00 : f32
    %704 = vector.shape_cast %668 : vector<16x1xi1> to vector<16x1xi1>
    %705 = vector.broadcast %704 : vector<16x1xi1> to vector<16x128xi1>
    %706 = vector.broadcast %cst_166 : f32 to vector<16x128xf32>
    %707 = arith.select %705, %703, %706 : vector<16x128xi1>, vector<16x128xf32>
    %708 = arith.truncf %707 : vector<16x128xf32> to vector<16x128xbf16>
    %c7_167 = arith.constant 7 : index
    %c0_168 = arith.constant 0 : index
    %c0_169 = arith.constant 0 : index
    %709 = vector.load %arg8[%c7_167, %c0_168, %c0_169] : memref<8x16x128xbf16, #tpu.memory_space<vmem>>, vector<1x16x128xbf16>
    %710 = vector.shape_cast %709 : vector<1x16x128xbf16> to vector<16x128xbf16>
    %711 = vector.shape_cast %708 : vector<16x128xbf16> to vector<1x16x128xbf16>
    tpu.vector_store %arg8[%c7_167, %c0_168, %c0_169], %711 {strides = array<i32>} : memref<8x16x128xbf16, #tpu.memory_space<vmem>>, vector<1x16x128xbf16>,
    %c15_i32_170 = arith.constant 15 : i32
    %712 = arith.subi %c15_i32_170, %12 : i32
    %c7_i32_171 = arith.constant 7 : i32
    %713 = arith.subi %712, %c7_i32_171 : i32
    %714 = vector.broadcast %713 : i32 to vector<16x1xi32>
    %715 = arith.cmpi slt, %714, %3 : vector<16x1xi32>
    %c0_172 = arith.constant 0 : index
    %c0_173 = arith.constant 0 : index
    %c0_174 = arith.constant 0 : index
    %716 = vector.load %arg3[%c0_172, %c0_173, %c0_174] : memref<8x16x384xbf16, #tpu.memory_space<vmem>>, vector<1x16x384xbf16>
    %717 = vector.shape_cast %716 : vector<1x16x384xbf16> to vector<16x384xbf16>
    %718 = arith.truncf %657 : vector<16x128xf32> to vector<16x128xbf16>
    %cst_175 = arith.constant dense<0.000000e+00> : vector<16x384xf32>
    %719 = tpu.matmul %718, %5, %cst_175 {dimension_numbers = #tpu.dot_dimension_numbers<[1], [0], [0], [1], [0, 0, 1, 1], [], []>} : vector<16x128xbf16>, vector<128x384xbf16>, vector<16x384xf32> -> vector<16x384xf32>
    %720 = vector.extract_strided_slice %717 {offsets = [0, 0], sizes = [16, 128], strides = [1, 1]} : vector<16x384xbf16> to vector<16x128xbf16>
    %721 = vector.extract_strided_slice %719 {offsets = [0, 0], sizes = [16, 128], strides = [1, 1]} : vector<16x384xf32> to vector<16x128xf32>
    %722 = arith.extf %720 : vector<16x128xbf16> to vector<16x128xf32>
    %723 = arith.addf %722, %721 : vector<16x128xf32>
    %724 = arith.negf %723 : vector<16x128xf32>
    %725 = math.exp %724 : vector<16x128xf32>
    %cst_176 = arith.constant 1.000000e+00 : f32
    %726 = vector.broadcast %cst_176 : f32 to vector<16x128xf32>
    %727 = arith.addf %726, %725 : vector<16x128xf32>
    %728 = arith.divf %726, %727 : vector<16x128xf32>
    %729 = vector.extract_strided_slice %717 {offsets = [0, 128], sizes = [16, 128], strides = [1, 1]} : vector<16x384xbf16> to vector<16x128xbf16>
    %730 = vector.extract_strided_slice %719 {offsets = [0, 128], sizes = [16, 128], strides = [1, 1]} : vector<16x384xf32> to vector<16x128xf32>
    %731 = arith.extf %729 : vector<16x128xbf16> to vector<16x128xf32>
    %732 = arith.addf %731, %730 : vector<16x128xf32>
    %733 = arith.negf %732 : vector<16x128xf32>
    %734 = math.exp %733 : vector<16x128xf32>
    %cst_177 = arith.constant 1.000000e+00 : f32
    %735 = vector.broadcast %cst_177 : f32 to vector<16x128xf32>
    %736 = arith.addf %735, %734 : vector<16x128xf32>
    %737 = arith.divf %735, %736 : vector<16x128xf32>
    %738 = vector.extract_strided_slice %717 {offsets = [0, 256], sizes = [16, 128], strides = [1, 1]} : vector<16x384xbf16> to vector<16x128xbf16>
    %739 = vector.extract_strided_slice %719 {offsets = [0, 256], sizes = [16, 128], strides = [1, 1]} : vector<16x384xf32> to vector<16x128xf32>
    %740 = arith.addf %739, %11 : vector<16x128xf32>
    %741 = arith.mulf %728, %740 : vector<16x128xf32>
    %742 = arith.extf %738 : vector<16x128xbf16> to vector<16x128xf32>
    %743 = arith.addf %742, %741 : vector<16x128xf32>
    %744 = math.tanh %743 : vector<16x128xf32>
    %745 = arith.subf %657, %744 : vector<16x128xf32>
    %746 = arith.mulf %737, %745 : vector<16x128xf32>
    %747 = arith.addf %744, %746 : vector<16x128xf32>
    %748 = vector.shape_cast %715 : vector<16x1xi1> to vector<16x1xi1>
    %749 = vector.broadcast %748 : vector<16x1xi1> to vector<16x128xi1>
    %750 = arith.select %749, %747, %657 : vector<16x128xi1>, vector<16x128xf32>
    %cst_178 = arith.constant 0.000000e+00 : f32
    %751 = vector.shape_cast %715 : vector<16x1xi1> to vector<16x1xi1>
    %752 = vector.broadcast %751 : vector<16x1xi1> to vector<16x128xi1>
    %753 = vector.broadcast %cst_178 : f32 to vector<16x128xf32>
    %754 = arith.select %752, %750, %753 : vector<16x128xi1>, vector<16x128xf32>
    %755 = arith.truncf %754 : vector<16x128xf32> to vector<16x128xbf16>
    %c0_179 = arith.constant 0 : index
    %c0_180 = arith.constant 0 : index
    %c0_181 = arith.constant 0 : index
    %756 = vector.load %arg9[%c0_179, %c0_180, %c0_181] : memref<8x16x128xbf16, #tpu.memory_space<vmem>>, vector<1x16x128xbf16>
    %757 = vector.shape_cast %756 : vector<1x16x128xbf16> to vector<16x128xbf16>
    %758 = vector.shape_cast %755 : vector<16x128xbf16> to vector<1x16x128xbf16>
    tpu.vector_store %arg9[%c0_179, %c0_180, %c0_181], %758 {strides = array<i32>} : memref<8x16x128xbf16, #tpu.memory_space<vmem>>, vector<1x16x128xbf16>,
    %c0_182 = arith.constant 0 : index
    %c0_183 = arith.constant 0 : index
    %759 = vector.load %arg14[%c0_182, %c0_183] : memref<16x128xf32, #tpu.memory_space<vmem>>, vector<16x128xf32>
    tpu.vector_store %arg14[%c0_182, %c0_183], %703 {strides = array<i32>} : memref<16x128xf32, #tpu.memory_space<vmem>>, vector<16x128xf32>,
    %c0_184 = arith.constant 0 : index
    %c0_185 = arith.constant 0 : index
    %760 = vector.load %arg15[%c0_184, %c0_185] : memref<16x128xf32, #tpu.memory_space<vmem>>, vector<16x128xf32>
    tpu.vector_store %arg15[%c0_184, %c0_185], %750 {strides = array<i32>} : memref<16x128xf32, #tpu.memory_space<vmem>>, vector<16x128xf32>,
    %c1_i32_186 = arith.constant 1 : i32
    %761 = arith.cmpi eq, %arg0, %c1_i32_186 : i32
    %762 = arith.extui %761 : i1 to i32
    %c0_i32_187 = arith.constant 0 : i32
    %763 = arith.cmpi ne, %762, %c0_i32_187 : i32
    scf.if %763 {
      %764 = arith.addf %703, %750 : vector<16x128xf32>
      %c0_188 = arith.constant 0 : index
      %c0_189 = arith.constant 0 : index
      %765 = vector.load %arg10[%c0_188, %c0_189] : memref<16x128xf32, #tpu.memory_space<vmem>>, vector<16x128xf32>
      tpu.vector_store %arg10[%c0_188, %c0_189], %764 {strides = array<i32>} : memref<16x128xf32, #tpu.memory_space<vmem>>, vector<16x128xf32>,
    } else {
    }
    return
  }
  func.func @transform_0(%arg0: i32) -> (i32, i32) {
    %c0_i32 = arith.constant 0 : i32
    %c0_i32_0 = arith.constant 0 : i32
    %c0_i32_1 = arith.constant 0 : i32
    return %c0_i32, %c0_i32_0 : i32, i32
  }
  func.func @transform_1(%arg0: i32) -> (i32, i32, i32) {
    %c0_i32 = arith.constant 0 : i32
    %c0_i32_0 = arith.constant 0 : i32
    %c0_i32_1 = arith.constant 0 : i32
    return %arg0, %c0_i32, %c0_i32_0 : i32, i32, i32
  }
  func.func @transform_2(%arg0: i32) -> (i32, i32, i32) {
    %c1_i32 = arith.constant 1 : i32
    %0 = arith.subi %c1_i32, %arg0 : i32
    %c0_i32 = arith.constant 0 : i32
    %c0_i32_0 = arith.constant 0 : i32
    %c0_i32_1 = arith.constant 0 : i32
    return %0, %c0_i32, %c0_i32_0 : i32, i32, i32
  }
  func.func @transform_5(%arg0: i32) -> (i32, i32) {
    %c0_i32 = arith.constant 0 : i32
    %c0_i32_0 = arith.constant 0 : i32
    %c0_i32_1 = arith.constant 0 : i32
    return %c0_i32, %c0_i32_0 : i32, i32
  }
  func.func @transform_6(%arg0: i32) -> (i32, i32) {
    %c0_i32 = arith.constant 0 : i32
    %c0_i32_0 = arith.constant 0 : i32
    %c0_i32_1 = arith.constant 0 : i32
    return %c0_i32, %c0_i32_0 : i32, i32
  }
  func.func @transform_7(%arg0: i32) -> (i32, i32, i32) {
    %c0_i32 = arith.constant 0 : i32
    %c0_i32_0 = arith.constant 0 : i32
    %c0_i32_1 = arith.constant 0 : i32
    return %arg0, %c0_i32, %c0_i32_0 : i32, i32, i32
  }
  func.func @transform_8(%arg0: i32) -> (i32, i32, i32) {
    %c1_i32 = arith.constant 1 : i32
    %0 = arith.subi %c1_i32, %arg0 : i32
    %c0_i32 = arith.constant 0 : i32
    %c0_i32_0 = arith.constant 0 : i32
    %c0_i32_1 = arith.constant 0 : i32
    return %0, %c0_i32, %c0_i32_0 : i32, i32, i32
  }
  func.func @transform_9(%arg0: i32) -> (i32, i32) {
    %c0_i32 = arith.constant 0 : i32
    %c0_i32_0 = arith.constant 0 : i32
    %c0_i32_1 = arith.constant 0 : i32
    return %c0_i32, %c0_i32_0 : i32, i32
  }
}

</mosaic_0001>

<bundles_post_ra>
// kernel: _lambda_.1
= control target key start
LH: loop header
LB: loop body
LE: loop exit
PB: predicated region body
PF: predicated region fallthrough
CT: control target
= control target key end

     0   :  { %s4707_s30 = smov 0   ;;  %s6634_s0 = inlined_call_operand.vmem [shape: s32[16,1], index: 0, kind: input, shape index: {}]   ;;  %s6635_s1 = inlined_call_operand.vmem [shape: bf16[16,16,384], index: 1, kind: input, shape index: {}]   ;;  %s6636_s2 = inlined_call_operand.vmem [shape: bf16[16,16,384], index: 2, kind: input, shape index: {}]   ;;  %s6637_s3 = inlined_call_operand.vmem [shape: bf16[128,384], index: 3, kind: input, shape index: {}]   ;;  %s6638_s4 = inlined_call_operand.vmem [shape: bf16[128,384], index: 4, kind: input, shape index: {}]   ;;  %s6639_s5 = inlined_call_operand.vmem [shape: f32[1,128], index: 5, kind: input, shape index: {}]   ;;  %s6640_s6 = inlined_call_operand.vmem [shape: f32[1,128], index: 6, kind: input, shape index: {}]   ;;  %s6641_s7 = inlined_call_operand.vmem [shape: bf16[16,16,128], index: 7, kind: output, shape index: {0}]   ;;  %s6642_s8 = inlined_call_operand.vmem [shape: bf16[16,16,128], index: 8, kind: output, shape index: {1}]   ;;  %s6643_s9 = inlined_call_operand.vmem [shape: f32[16,128], index: 9, kind: output, shape index: {2}]  }
   0x1 LB: > { %s4713_s10 = sadd.s32 4294967295, %s4653_s30   ;;  %p3796_p0 = scmp.ge.s32.totalorder %s4653_s30, 1  ;;  %s4653_s30 = sphi %s4707_s30, %s20_s30  }
   0x2   : > { %p259_p1 = scmp.lt.s32.totalorder %s4653_s30, 3 }
   0x4   : > { %p260_p2 = pnand %p3796_p0, %p259_p1 }
   0x6   : > { %263 = sbr.rel (%p260_p2) target bundleno = 1643 (0x66b), region = 40 }
   0xb   : > { %s4718_s11 = sshll.u32 %s4713_s10, 3  ;;  %s314_s12 = ssub.s32 1, %s4713_s10 }
   0xc   : > { %p308_p3 = scmp.lt.s32.totalorder %s4718_s11, 15  ;;  %s3799_s13 = sshll.u32 %s314_s12, 3 }
   0xd   : > { %p316_p4 = scmp.lt.s32.totalorder %s3799_s13, 15  ;;  %p3807_p5 = scmp.ne.s32.totalorder %s4713_s10, 0 }
   0xe   : > { %s309_s14 = scalar_select %p308_p3, %s4718_s11, 15 }
   0xf   : > { %s6925_s13 = smov (!%p316_p4, %s3799_s13), 15  ;;  %342 = sbr.rel (%p3807_p5) target bundleno = 79 (0x4f), region = 44 }
  0x10   : > { %s4298_s15 = smul.u32 24, %s309_s14  ;;  %s4154_s16 = sshll.u32 %s309_s14, 3 }
  0x11   : > { %s4299_s17 = smul.u32 24, %s6925_s13  ;;  %s4726_s20 = scalar_lea.vmem %s6641_s7, %s4154_s16 }
  0x12   : > { %s4731_s23 = scalar_lea.vmem %s6635_s1, %s4298_s15  ;;  %s4155_s24 = sshll.u32 %s6925_s13, 3 }
  0x13   : > { %s4736_s27 = scalar_lea.vmem %s6636_s2, %s4299_s17  ;;  %s4741_s12 = scalar_lea.vmem %s6642_s8, %s4155_s24 }
  0x14   : > { %v353_v0 = vld [vmem:[%s6637_s3] sm:$0xff]  ;;  %v355_v1 = vld [vmem:[%s6637_s3 + $0x8] sm:$0xff]  ;;  %v357_v2 = vld [vmem:[%s6637_s3 + $0x10] sm:$0xff] }
  0x15   : > { %354 = vst [vmem:[#allocation2] sm:$0xff] %v353_v0  ;;  %v359_v3 = vld [vmem:[%s6637_s3 + $0x18] sm:$0xff]  ;;  %v361_v4 = vld [vmem:[%s6637_s3 + $0x20] sm:$0xff]  ;;  %v363_v5 = vld [vmem:[%s6637_s3 + $0x28] sm:$0xff] }
  0x16   : > { %356 = vst [vmem:[#allocation2 + $0x8] sm:$0xff] %v355_v1  ;;  %v365_v6 = vld [vmem:[%s6637_s3 + $0x30] sm:$0xff]  ;;  %v367_v7 = vld [vmem:[%s6637_s3 + $0x38] sm:$0xff]  ;;  %v369_v8 = vld [vmem:[%s6637_s3 + $0x40] sm:$0xff] }
  0x17   : > { %358 = vst [vmem:[#allocation2 + $0x10] sm:$0xff] %v357_v2  ;;  %v371_v9 = vld [vmem:[%s6637_s3 + $0x48] sm:$0xff]  ;;  %v373_v10 = vld [vmem:[%s6637_s3 + $0x50] sm:$0xff]  ;;  %v375_v11 = vld [vmem:[%s6637_s3 + $0x58] sm:$0xff] }
  0x18   : > { %360 = vst [vmem:[#allocation2 + $0x18] sm:$0xff] %v359_v3  ;;  %v377_v12 = vld [vmem:[%s6637_s3 + $0x60] sm:$0xff]  ;;  %v379_v13 = vld [vmem:[%s6637_s3 + $0x68] sm:$0xff]  ;;  %v381_v14 = vld [vmem:[%s6637_s3 + $0x70] sm:$0xff] }
  0x19   : > { %362 = vst [vmem:[#allocation2 + $0x20] sm:$0xff] %v361_v4  ;;  %v383_v15 = vld [vmem:[%s6637_s3 + $0x78] sm:$0xff]  ;;  %v385_v16 = vld [vmem:[%s6637_s3 + $0x80] sm:$0xff]  ;;  %v387_v17 = vld [vmem:[%s6637_s3 + $0x88] sm:$0xff] }
  0x1a   : > { %364 = vst [vmem:[#allocation2 + $0x28] sm:$0xff] %v363_v5  ;;  %v389_v18 = vld [vmem:[%s6637_s3 + $0x90] sm:$0xff]  ;;  %v391_v19 = vld [vmem:[%s6637_s3 + $0x98] sm:$0xff]  ;;  %v393_v20 = vld [vmem:[%s6637_s3 + $0xa0] sm:$0xff] }
  0x1b   : > { %366 = vst [vmem:[#allocation2 + $0x30] sm:$0xff] %v365_v6  ;;  %v395_v21 = vld [vmem:[%s6637_s3 + $0xa8] sm:$0xff]  ;;  %v397_v22 = vld [vmem:[%s6637_s3 + $0xb0] sm:$0xff]  ;;  %v399_v23 = vld [vmem:[%s6637_s3 + $0xb8] sm:$0xff] }
  0x1c   : > { %368 = vst [vmem:[#allocation2 + $0x38] sm:$0xff] %v367_v7 }
  0x1d   : > { %370 = vst [vmem:[#allocation2 + $0x40] sm:$0xff] %v369_v8 }
  0x1e   : > { %372 = vst [vmem:[#allocation2 + $0x48] sm:$0xff] %v371_v9 }
  0x1f   : > { %374 = vst [vmem:[#allocation2 + $0x50] sm:$0xff] %v373_v10 }
  0x20   : > { %376 = vst [vmem:[#allocation2 + $0x58] sm:$0xff] %v375_v11 }
  0x21   : > { %378 = vst [vmem:[#allocation2 + $0x60] sm:$0xff] %v377_v12 }
  0x22   : > { %380 = vst [vmem:[#allocation2 + $0x68] sm:$0xff] %v379_v13 }
  0x23   : > { %382 = vst [vmem:[#allocation2 + $0x70] sm:$0xff] %v381_v14 }
  0x24   : > { %384 = vst [vmem:[#allocation2 + $0x78] sm:$0xff] %v383_v15 }
  0x25   : > { %386 = vst [vmem:[#allocation2 + $0x80] sm:$0xff] %v385_v16 }
  0x26   : > { %388 = vst [vmem:[#allocation2 + $0x88] sm:$0xff] %v387_v17 }
  0x27   : > { %390 = vst [vmem:[#allocation2 + $0x90] sm:$0xff] %v389_v18 }
  0x28   : > { %392 = vst [vmem:[#allocation2 + $0x98] sm:$0xff] %v391_v19 }
  0x29   : > { %394 = vst [vmem:[#allocation2 + $0xa0] sm:$0xff] %v393_v20 }
  0x2a   : > { %396 = vst [vmem:[#allocation2 + $0xa8] sm:$0xff] %v395_v21 }
  0x2b   : > { %398 = vst [vmem:[#allocation2 + $0xb0] sm:$0xff] %v397_v22 }
  0x2c   : > { %400 = vst [vmem:[#allocation2 + $0xb8] sm:$0xff] %v399_v23 }
  0x2d   : > { %406 = vsyncadd [#allocation4], 3072  ;;  %v418_v24 = vld [vmem:[%s6638_s4] sm:$0xff]  ;;  %v420_v25 = vld [vmem:[%s6638_s4 + $0x8] sm:$0xff] }
  0x2e   : > { %419 = vst [vmem:[#allocation3] sm:$0xff] %v418_v24  ;;  %v422_v26 = vld [vmem:[%s6638_s4 + $0x10] sm:$0xff]  ;;  %v424_v27 = vld [vmem:[%s6638_s4 + $0x18] sm:$0xff]  ;;  %v426_v28 = vld [vmem:[%s6638_s4 + $0x20] sm:$0xff] }
  0x2f   : > { %421 = vst [vmem:[#allocation3 + $0x8] sm:$0xff] %v420_v25  ;;  %v428_v29 = vld [vmem:[%s6638_s4 + $0x28] sm:$0xff]  ;;  %v430_v30 = vld [vmem:[%s6638_s4 + $0x30] sm:$0xff]  ;;  %v432_v31 = vld [vmem:[%s6638_s4 + $0x38] sm:$0xff] }
  0x30   : > { %423 = vst [vmem:[#allocation3 + $0x10] sm:$0xff] %v422_v26  ;;  %v434_v32 = vld [vmem:[%s6638_s4 + $0x40] sm:$0xff]  ;;  %v436_v33 = vld [vmem:[%s6638_s4 + $0x48] sm:$0xff]  ;;  %v438_v34 = vld [vmem:[%s6638_s4 + $0x50] sm:$0xff] }
  0x31   : > { %425 = vst [vmem:[#allocation3 + $0x18] sm:$0xff] %v424_v27  ;;  %v440_v35 = vld [vmem:[%s6638_s4 + $0x58] sm:$0xff]  ;;  %v442_v36 = vld [vmem:[%s6638_s4 + $0x60] sm:$0xff]  ;;  %v444_v37 = vld [vmem:[%s6638_s4 + $0x68] sm:$0xff] }
  0x32   : > { %427 = vst [vmem:[#allocation3 + $0x20] sm:$0xff] %v426_v28  ;;  %v446_v38 = vld [vmem:[%s6638_s4 + $0x70] sm:$0xff]  ;;  %v448_v39 = vld [vmem:[%s6638_s4 + $0x78] sm:$0xff]  ;;  %v450_v40 = vld [vmem:[%s6638_s4 + $0x80] sm:$0xff] }
  0x33   : > { %429 = vst [vmem:[#allocation3 + $0x28] sm:$0xff] %v428_v29  ;;  %v452_v41 = vld [vmem:[%s6638_s4 + $0x88] sm:$0xff]  ;;  %v454_v42 = vld [vmem:[%s6638_s4 + $0x90] sm:$0xff]  ;;  %v456_v43 = vld [vmem:[%s6638_s4 + $0x98] sm:$0xff] }
  0x34   : > { %431 = vst [vmem:[#allocation3 + $0x30] sm:$0xff] %v430_v30  ;;  %v458_v44 = vld [vmem:[%s6638_s4 + $0xa0] sm:$0xff]  ;;  %v460_v45 = vld [vmem:[%s6638_s4 + $0xa8] sm:$0xff]  ;;  %v462_v46 = vld [vmem:[%s6638_s4 + $0xb0] sm:$0xff] }
  0x35   : > { %433 = vst [vmem:[#allocation3 + $0x38] sm:$0xff] %v432_v31  ;;  %v464_v47 = vld [vmem:[%s6638_s4 + $0xb8] sm:$0xff] }
  0x36   : > { %435 = vst [vmem:[#allocation3 + $0x40] sm:$0xff] %v434_v32 }
  0x37   : > { %437 = vst [vmem:[#allocation3 + $0x48] sm:$0xff] %v436_v33 }
  0x38   : > { %439 = vst [vmem:[#allocation3 + $0x50] sm:$0xff] %v438_v34 }
  0x39   : > { %441 = vst [vmem:[#allocation3 + $0x58] sm:$0xff] %v440_v35 }
  0x3a   : > { %443 = vst [vmem:[#allocation3 + $0x60] sm:$0xff] %v442_v36 }
  0x3b   : > { %445 = vst [vmem:[#allocation3 + $0x68] sm:$0xff] %v444_v37 }
  0x3c   : > { %447 = vst [vmem:[#allocation3 + $0x70] sm:$0xff] %v446_v38 }
  0x3d   : > { %449 = vst [vmem:[#allocation3 + $0x78] sm:$0xff] %v448_v39 }
  0x3e   : > { %451 = vst [vmem:[#allocation3 + $0x80] sm:$0xff] %v450_v40 }
  0x3f   : > { %453 = vst [vmem:[#allocation3 + $0x88] sm:$0xff] %v452_v41 }
  0x40   : > { %455 = vst [vmem:[#allocation3 + $0x90] sm:$0xff] %v454_v42 }
  0x41   : > { %457 = vst [vmem:[#allocation3 + $0x98] sm:$0xff] %v456_v43 }
  0x42   : > { %459 = vst [vmem:[#allocation3 + $0xa0] sm:$0xff] %v458_v44 }
  0x43   : > { %461 = vst [vmem:[#allocation3 + $0xa8] sm:$0xff] %v460_v45 }
  0x44   : > { %463 = vst [vmem:[#allocation3 + $0xb0] sm:$0xff] %v462_v46 }
  0x45   : > { %465 = vst [vmem:[#allocation3 + $0xb8] sm:$0xff] %v464_v47 }
  0x46   : > { %471 = vsyncadd [#allocation4 + $0x1], 3072 }
  0x47   : > { %4647 = dma.done.wait [#allocation4], 3072 }
  0x48   : > { %4648 = vsyncadd [#allocation4], 4294964224 }
  0x49   : > { %4649 = dma.done.wait [#allocation4 + $0x1], 3072 }
  0x4a   : > { %4650 = vsyncadd [#allocation4 + $0x1], 4294964224  ;;  %v4655_v48 = vmov 0.0  }
  0x4b   : > { %478 = vst [vmem:[#allocation5] sm:$0xff] %v4655_v48 }
  0x4c   : > { %479 = vst [vmem:[#allocation5 + $0x8] sm:$0xff] %v4655_v48 }
  0x4d   : > { %480 = vst [vmem:[#allocation6 + $0x8] sm:$0xff] %v4655_v48 }
  0x4e   : > { %481 = vst [vmem:[#allocation6] sm:$0xff] %v4655_v48 }
  0x4f PF: > { %v3895_v49 = vld [vmem:[#allocation2 + $0xa8] sm:$0xf]  ;;  %v4178_v50 = vld [vmem:[#allocation2 + $0xb0] sm:$0xf0]  ;;  %v4177_v51 = vld [vmem:[#allocation2 + $0xac] sm:$0xf]  ;;  %v561_v9 = vstv %s4718_s11 }
  0x50   : > { %v4888_v52 = vor.u32 %v4178_v50, %v3895_v49  ;;  %v3897_v53 = vld [vmem:[#allocation2 + $0xb4] sm:$0xf0]  ;;  %v3999_v54 = vld [vmem:[#allocation3 + $0xa8] sm:$0xf]  ;;  %v4202_v55 = vld [vmem:[#allocation3 + $0xb0] sm:$0xf0] }
  0x51   : > { %v4890_v56 = vor.u32 %v4177_v51, %v3897_v53  ;;  %v4892_v57 = vor.u32 %v4202_v55, %v3999_v54  ;;  %v3883_v58 = vld [vmem:[#allocation2 + $0x90] sm:$0xf]  ;;  %v4175_v59 = vld [vmem:[#allocation2 + $0x98] sm:$0xf0]  ;;  %v4174_v60 = vld [vmem:[#allocation2 + $0x94] sm:$0xf] }
  0x52   : > { %6714 = vst [vmem:[#allocation11_spill] sm:$0xff] %v4888_v52  ;;  %697 = vmatpush.bf16.msra.mxu0 %v4888_v52  ;;  %v4895_v61 = vor.u32 %v4175_v59, %v3883_v58  ;;  %v3885_v62 = vld [vmem:[#allocation2 + $0x9c] sm:$0xf0]  ;;  %v3987_v63 = vld [vmem:[#allocation3 + $0x90] sm:$0xf]  ;;  %v6644_v20 = vmov 0  }
  0x53   : > { %6715 = vst [vmem:[#allocation12_spill] sm:$0xff] %v4890_v56  ;;  %v4199_v0 = vld [vmem:[#allocation3 + $0x98] sm:$0xf0]  ;;  %711 = vmatpush.bf16.msra.mxu1 %v4890_v56  ;;  %1001 = vmatpush.bf16.msra.mxu3 %v4892_v57  ;;  %v4899_v1 = vor.u32 %v4174_v60, %v3885_v62  ;;  %v3871_v3 = vld [vmem:[#allocation2 + $0x78] sm:$0xf]  ;;  %v4916_v16 = vld [vmem:[%s6634_s0] sm:$0xff] }
  0x54   : > { %6716 = vst [vmem:[#allocation13_spill] sm:$0xff] %v4895_v61  ;;  %v4901_v2 = vor.u32 %v4199_v0, %v3987_v63  ;;  %v4172_v4 = vld [vmem:[#allocation2 + $0x80] sm:$0xf0]  ;;  %v4171_v5 = vld [vmem:[#allocation2 + $0x7c] sm:$0xf]  ;;  %4310 = vset.pattern.permute.xlu0 %v6644_v20  ;;  %vm562_vm0 = vcmp.lt.s32.totalorder %v561_v9, %v4916_v16  ;;  %4311 = vset.pattern.permute.xlu1 %v6644_v20  ;;  %v4925_v22 = vld [vmem:[%s6634_s0 + $0x8] sm:$0xff] }
  0x55   : > { %6717 = vst [vmem:[#allocation14_spill] sm:$0xff] %v4899_v1  ;;  %v3873_v6 = vld [vmem:[#allocation2 + $0x84] sm:$0xf0]  ;;  %v3975_v7 = vld [vmem:[#allocation3 + $0x78] sm:$0xf]  ;;  %v4905_v10 = vor.u32 %v4172_v4, %v3871_v3  ;;  %v845_v21 = vsel %vm562_vm0, 1, %v6644_v20  ;;  %4312 = vset.pattern.permute.xlu2 %v6644_v20  ;;  %vm563_vm1 = vcmp.lt.s32.totalorder %v561_v9, %v4925_v22 }
  0x56   : > { %v4196_v8 = vld [vmem:[#allocation3 + $0x80] sm:$0xf0]  ;;  %698 = vmatpush.bf16.msra.mxu0 %v4895_v61  ;;  %v3859_v11 = vld [vmem:[#allocation2 + $0x60] sm:$0xf]  ;;  %v4909_v12 = vor.u32 %v4171_v5, %v3873_v6  ;;  %v4169_v14 = vld [vmem:[#allocation2 + $0x68] sm:$0xf0]  ;;  %848 = vperm.xlu0 %4310, %v845_v21  }
  0x57   : > { %6718 = vst [vmem:[#allocation15_spill] sm:$0xff] %v4905_v10  ;;  %712 = vmatpush.bf16.msra.mxu1 %v4899_v1  ;;  %1002 = vmatpush.bf16.msra.mxu3 %v4901_v2  ;;  %v4911_v13 = vor.u32 %v4196_v8, %v3975_v7  ;;  %v4168_v15 = vld [vmem:[#allocation2 + $0x64] sm:$0xf]  ;;  %v3861_v17 = vld [vmem:[#allocation2 + $0x6c] sm:$0xf0]  ;;  %v4929_v23 = vor.u32 %v4169_v14, %v3859_v11  ;;  %s863_s15 = ssub.s32 15, %s4718_s11 }
  0x58   : > { %6719 = vst [vmem:[#allocation16_spill] sm:$0xff] %v4909_v12  ;;  %v3963_v18 = vld [vmem:[#allocation3 + $0x60] sm:$0xf]  ;;  %v4193_v19 = vld [vmem:[#allocation3 + $0x68] sm:$0xf0]  ;;  %v4933_v27 = vor.u32 %v4168_v15, %v3861_v17  ;;  %v864_v35 = vstv %s863_s15  ;;  %v846_v43 = vsel %vm563_vm1, 1, %v6644_v20 }
  0x59   : > { %6720 = vst [vmem:[#allocation17_spill] sm:$0xff] %v4929_v23  ;;  %v3847_v24 = vld [vmem:[#allocation2 + $0x48] sm:$0xf]  ;;  %v4166_v25 = vld [vmem:[#allocation2 + $0x50] sm:$0xf0]  ;;  %v4935_v28 = vor.u32 %v4193_v19, %v3963_v18  ;;  %vm865_vm2 = vcmp.lt.s32.totalorder %v864_v35, %v4916_v16  ;;  %vm866_vm3 = vcmp.lt.s32.totalorder %v864_v35, %v4925_v22  ;;  %s1345_s18 = ssub.s32 14, %s4718_s11 }
  0x5a   : > { %699 = vmatpush.bf16.msra.mxu0 %v4905_v10  ;;  %v4165_v26 = vld [vmem:[#allocation2 + $0x4c] sm:$0xf]  ;;  %6721 = vst [vmem:[#allocation18_spill] sm:$0xff] %v4933_v27  ;;  %v3849_v29 = vld [vmem:[#allocation2 + $0x54] sm:$0xf0]  ;;  %v4942_v36 = vor.u32 %v4166_v25, %v3847_v24  ;;  %v1149_v44 = vsel %vm865_vm2, 1, %v6644_v20  ;;  %v4970_v4 = vstv %s1345_s18 }
  0x5b   : > { %713 = vmatpush.bf16.msra.mxu1 %v4909_v12  ;;  %1003 = vmatpush.bf16.msra.mxu3 %v4911_v13  ;;  %v3951_v30 = vld [vmem:[#allocation3 + $0x48] sm:$0xf]  ;;  %v3903_v31 = vld [vmem:[#allocation2 + $0xb0] sm:$0xf]  ;;  %v4190_v32 = vld [vmem:[#allocation3 + $0x50] sm:$0xf0]  ;;  %v4947_v40 = vor.u32 %v4165_v26, %v3849_v29  ;;  %vm1347_vm4 = vcmp.lt.s32.totalorder %v4970_v4, %v4916_v16  ;;  %vm1348_vm6 = vcmp.lt.s32.totalorder %v4970_v4, %v4925_v22 }
  0x5c   : > { %v4179_v33 = vld [vmem:[#allocation2 + $0xb8] sm:$0xf0]  ;;  %6722 = vst [vmem:[#allocation19_spill] sm:$0xff] %v4942_v36  ;;  %v3835_v37 = vld [vmem:[#allocation2 + $0x30] sm:$0xf]  ;;  %v4949_v41 = vor.u32 %v4190_v32, %v3951_v30  ;;  %1152 = vperm.xlu1 %4311, %v1149_v44   ;;  %v1150_v5 = vsel %vm866_vm3, 1, %v6644_v20 }
  0x5d   : > { %v4939_v34 = vor.u32 %v4179_v33, %v3903_v31  ;;  %v4163_v38 = vld [vmem:[#allocation2 + $0x38] sm:$0xf0]  ;;  %v3891_v39 = vld [vmem:[#allocation2 + $0x98] sm:$0xf]  ;;  %6723 = vst [vmem:[#allocation20_spill] sm:$0xff] %v4947_v40  ;;  %v1503_v19 = vsel %vm1347_vm4, 1, %v6644_v20 }
  0x5e   : > { %700 = vmatpush.bf16.msra.mxu0 %v4929_v23  ;;  %v4162_v42 = vld [vmem:[#allocation2 + $0x34] sm:$0xf]  ;;  %v4176_v45 = vld [vmem:[#allocation2 + $0xa0] sm:$0xf0]  ;;  %v3837_v46 = vld [vmem:[#allocation2 + $0x3c] sm:$0xf0]  ;;  %v4957_v51 = vor.u32 %v4163_v38, %v3835_v37  ;;  %851 = vperm.xlu0 %4310, %v846_v43  }
  0x5f   : > { %714 = vmatpush.bf16.msra.mxu1 %v4933_v27  ;;  %1004 = vmatpush.bf16.msra.mxu3 %v4935_v28  ;;  %v3939_v47 = vld [vmem:[#allocation3 + $0x30] sm:$0xf]  ;;  %v4187_v48 = vld [vmem:[#allocation3 + $0x38] sm:$0xf0]  ;;  %v4954_v49 = vor.u32 %v4176_v45, %v3891_v39  ;;  %v3879_v50 = vld [vmem:[#allocation2 + $0x80] sm:$0xf]  ;;  %v4962_v55 = vor.u32 %v4162_v42, %v3837_v46 }
  0x60   : > { %725 = vmatpush.bf16.msra.mxu2 %v4939_v34  ;;  %6724 = vst [vmem:[#allocation21_spill] sm:$0xff] %v4957_v51  ;;  %v3823_v53 = vld [vmem:[#allocation2 + $0x18] sm:$0xf]  ;;  %v4173_v54 = vld [vmem:[#allocation2 + $0x88] sm:$0xf0]  ;;  %v4964_v58 = vor.u32 %v4187_v48, %v3939_v47  ;;  %s1522_s13 = sadd.s32 2, %s4718_s11 }
  0x61   : > { %6725 = vst [vmem:[#allocation22_spill] sm:$0xff] %v4962_v55  ;;  %v4160_v59 = vld [vmem:[#allocation2 + $0x20] sm:$0xf0]  ;;  %v4159_v60 = vld [vmem:[#allocation2 + $0x1c] sm:$0xf]  ;;  %v4968_v3 = vor.u32 %v4173_v54, %v3879_v50  ;;  %v4994_v35 = vld [vmem:[#allocation5 + $0x8] sm:$0xff]  ;;  %v4996_v39 = vstv %s1522_s13 }
  0x62   : > { %701 = vmatpush.bf16.msra.mxu0 %v4942_v36  ;;  %v3825_v62 = vld [vmem:[#allocation2 + $0x24] sm:$0xf0]  ;;  %v3927_v63 = vld [vmem:[#allocation3 + $0x18] sm:$0xf]  ;;  %v4184_v0 = vld [vmem:[#allocation3 + $0x20] sm:$0xf0]  ;;  %v4976_v8 = vor.u32 %v4160_v59, %v3823_v53  ;;  %vm1525_vm5 = vcmp.lt.s32.totalorder %v4996_v39, %v4925_v22 }
  0x63   : > { %715 = vmatpush.bf16.msra.mxu1 %v4947_v40  ;;  %1005 = vmatpush.bf16.msra.mxu3 %v4949_v41  ;;  %v3867_v6 = vld [vmem:[#allocation2 + $0x68] sm:$0xf]  ;;  %v4170_v7 = vld [vmem:[#allocation2 + $0x70] sm:$0xf0]  ;;  %v3811_v9 = vld [vmem:[#allocation2] sm:$0xf]  ;;  %v4980_v14 = vor.u32 %v4159_v60, %v3825_v62  ;;  %v4982_v15 = vor.u32 %v4184_v0, %v3927_v63 }
  0x64   : > { %726 = vmatpush.bf16.msra.mxu2 %v4954_v49  ;;  %6726 = vst [vmem:[#allocation23_spill] sm:$0xff] %v4976_v8  ;;  %v4157_v11 = vld [vmem:[#allocation2 + $0x8] sm:$0xf0]  ;;  %v4156_v17 = vld [vmem:[#allocation2 + $0x4] sm:$0xf]  ;;  %1155 = vperm.xlu1 %4311, %v1150_v5   ;;  %v4989_v29 = vor.u32 %v4170_v7, %v3867_v6  ;;  %v5004_v44 = vld [vmem:[#allocation6 + $0x8] sm:$0xff] }
  0x65   : > { %6727 = vst [vmem:[#allocation24_spill] sm:$0xff] %v4980_v14  ;;  %v3813_v18 = vld [vmem:[#allocation2 + $0xc] sm:$0xf0]  ;;  %v3915_v21 = vld [vmem:[#allocation3] sm:$0xf]  ;;  %v4992_v33 = vor.u32 %v4157_v11, %v3811_v9  ;;  %s1876_s19 = sadd.s32 3, %s4718_s11 }
  0x66   : > { %702 = vmatpush.bf16.msra.mxu0 %v4957_v51  ;;  %v4181_v24 = vld [vmem:[#allocation3 + $0x8] sm:$0xf0]  ;;  %v4987_v26 = vld [vmem:[#allocation5] sm:$0xff]  ;;  %v4001_v30 = vld [vmem:[#allocation3 + $0xb4] sm:$0xf0]  ;;  %1506 = vperm.xlu0 %4310, %v1503_v19   ;;  %6729 = vst [vmem:[#allocation26_spill] sm:$0xff] %v4996_v39  ;;  %v5000_v42 = vor.u32 %v4156_v17, %v3813_v18 }
  0x67   : > { %716 = vmatpush.bf16.msra.mxu1 %v4962_v55  ;;  %1006 = vmatpush.bf16.msra.mxu3 %v4964_v58  ;;  %v4201_v25 = vld [vmem:[#allocation3 + $0xac] sm:$0xf]  ;;  %v4007_v31 = vld [vmem:[#allocation3 + $0xb0] sm:$0xf]  ;;  %v4203_v32 = vld [vmem:[#allocation3 + $0xb8] sm:$0xf0]  ;;  %v5002_v43 = vor.u32 %v4181_v24, %v3915_v21  ;;  %v5015_v50 = vpack.c.bf16 %v4994_v35, %v4987_v26 }
  0x68   : > { %727 = vmatpush.bf16.msra.mxu2 %v4968_v3  ;;  %6728 = vst [vmem:[#allocation25_spill] sm:$0xff] %v4992_v33  ;;  %v3855_v37 = vld [vmem:[#allocation2 + $0x50] sm:$0xf]  ;;  %v4167_v38 = vld [vmem:[#allocation2 + $0x58] sm:$0xf0]  ;;  %v5008_v46 = vor.u32 %v4201_v25, %v4001_v30  ;;  %v5011_v48 = vor.u32 %v4203_v32, %v4007_v31  ;;  %s1699_s17 = ssub.s32 13, %s4718_s11  ;;  %v1877_v25 = vstv %s1876_s19 }
  0x69   : > { %6730 = vst [vmem:[#allocation27_spill] sm:$0xff] %v5000_v42  ;;  %v5006_v45 = vld [vmem:[#allocation6] sm:$0xff]  ;;  %v3989_v53 = vld [vmem:[#allocation3 + $0x9c] sm:$0xf0]  ;;  %v5017_v54 = vor.u32 %v4167_v38, %v3855_v37  ;;  %v3995_v59 = vld [vmem:[#allocation3 + $0x98] sm:$0xf]  ;;  %v5046_v30 = vstv %s1699_s17  ;;  %vm1878_vm7 = vcmp.lt.s32.totalorder %v1877_v25, %v4916_v16  ;;  %vm1879_vm10 = vcmp.lt.s32.totalorder %v1877_v25, %v4925_v22 }
  0x6a   : > { %703 = vmatpush.bf16.msra.mxu0 %v4976_v8  ;;  %6731 = vst [vmem:[#allocation28_spill] sm:$0xff] %v5002_v43  ;;  %v4198_v47 = vld [vmem:[#allocation3 + $0x94] sm:$0xf]  ;;  %v4200_v60 = vld [vmem:[#allocation3 + $0xa0] sm:$0xf0]  ;;  %v5026_v62 = vpack.c.bf16 %v5006_v45, %v5004_v44  ;;  %v1681_v7 = vsel %vm1525_vm5, 1, %v6644_v20  ;;  %vm1701_vm8 = vcmp.lt.s32.totalorder %v5046_v30, %v4916_v16 }
  0x6b   : > { %717 = vmatpush.bf16.msra.mxu1 %v4980_v14  ;;  %1007 = vmatpush.bf16.msra.mxu3 %v4982_v15  ;;  %6732 = vst [vmem:[#allocation29_spill] sm:$0xff] %v5004_v44  ;;  %v3843_v63 = vld [vmem:[#allocation2 + $0x38] sm:$0xf]  ;;  %v4164_v0 = vld [vmem:[#allocation2 + $0x40] sm:$0xf0]  ;;  %v5033_v5 = vor.u32 %v4198_v47, %v3989_v53  ;;  %v5036_v6 = vor.u32 %v4200_v60, %v3995_v59  ;;  %v1504_v9 = vsel %vm1348_vm6, 1, %v6644_v20 }
  0x6c   : > { %6733 = vst [vmem:[#allocation30_spill] sm:$0xff] %v5006_v45  ;;  %728 = vmatpush.bf16.msra.mxu2 %v4989_v29  ;;  %v4195_v4 = vld [vmem:[#allocation3 + $0x7c] sm:$0xf]  ;;  %v3977_v11 = vld [vmem:[#allocation3 + $0x84] sm:$0xf0]  ;;  %v5042_v17 = vor.u32 %v4164_v0, %v3843_v63  ;;  %1509 = vperm.xlu1 %4311, %v1504_v9   ;;  %s2053_s21 = ssub.s32 12, %s4718_s11 }
  0x6d   : > { %6734 = vst [vmem:[#allocation31_spill] sm:$0xff] %v5036_v6  ;;  %v3983_v18 = vld [vmem:[#allocation3 + $0x80] sm:$0xf]  ;;  %v4197_v19 = vld [vmem:[#allocation3 + $0x88] sm:$0xf0]  ;;  %v5049_v31 = vor.u32 %v4195_v4, %v3977_v11  ;;  %v2034_v9 = vsel %vm1878_vm7, 1, %v6644_v20 }
  0x6e   : > { %704 = vmatpush.bf16.msra.mxu0 %v4992_v33  ;;  %v3831_v21 = vld [vmem:[#allocation2 + $0x20] sm:$0xf]  ;;  %v4161_v24 = vld [vmem:[#allocation2 + $0x28] sm:$0xf0]  ;;  %6735 = vst [vmem:[#allocation32_spill] sm:$0xff] %v5046_v30  ;;  %1686 = vperm.xlu0 %4310, %v1681_v7   ;;  %v5052_v38 = vor.u32 %v4197_v19, %v3983_v18  ;;  %v1857_v11 = vsel %vm1701_vm8, 1, %v6644_v20 }
  0x6f   : > { %718 = vmatpush.bf16.msra.mxu1 %v5000_v42  ;;  %1008 = vmatpush.bf16.msra.mxu3 %v5002_v43  ;;  %v4192_v32 = vld [vmem:[#allocation3 + $0x64] sm:$0xf]  ;;  %v3965_v37 = vld [vmem:[#allocation3 + $0x6c] sm:$0xf0]  ;;  %v5055_v47 = vor.u32 %v4161_v24, %v3831_v21  ;;  %v3971_v53 = vld [vmem:[#allocation3 + $0x68] sm:$0xf] }
  0x70   : > { %729 = vmatpush.bf16.msra.mxu2 %v5017_v54  ;;  %6736 = vst [vmem:[#allocation33_spill] sm:$0xff] %v5052_v38  ;;  %v4194_v59 = vld [vmem:[#allocation3 + $0x70] sm:$0xf0]  ;;  %v3819_v60 = vld [vmem:[#allocation2 + $0x8] sm:$0xf]  ;;  %v5063_v0 = vor.u32 %v4192_v32, %v3965_v37  ;;  %v5074_v32 = vstv %s2053_s21  ;;  %s2407_s22 = ssub.s32 11, %s4718_s11 }
  0x71   : > { %705 = vmatmul.bf16.vlgmr.msra.gmra.mxu0 %v5015_v50  ;;  %v4158_v63 = vld [vmem:[#allocation2 + $0x10] sm:$0xf0]  ;;  %v4189_v4 = vld [vmem:[#allocation3 + $0x4c] sm:$0xf]  ;;  %v5066_v7 = vor.u32 %v4194_v59, %v3971_v53  ;;  %v3953_v18 = vld [vmem:[#allocation3 + $0x54] sm:$0xf0]  ;;  %vm2056_vm9 = vcmp.lt.s32.totalorder %v5074_v32, %v4925_v22  ;;  %v2408_v45 = vstv %s2407_s22 }
  0x72   : > { %1015 = vmatpush.bf16.msrb.mxu0 %v5008_v46  ;;  %719 = vmatmul.bf16.vlgmr.msra.gmra.mxu1 %v5015_v50  ;;  %v5071_v19 = vor.u32 %v4158_v63, %v3819_v60  ;;  %v3959_v21 = vld [vmem:[#allocation3 + $0x50] sm:$0xf]  ;;  %v4191_v24 = vld [vmem:[#allocation3 + $0x58] sm:$0xf0]  ;;  %6739 = vst [vmem:[#allocation36_spill] sm:$0xff] %v5074_v32  ;;  %v5077_v37 = vor.u32 %v4189_v4, %v3953_v18  ;;  %s2230_s24 = sadd.s32 4, %s4718_s11 }
  0x73   : > { %1029 = vmatpush.bf16.msrb.mxu1 %v5011_v48  ;;  %1009 = vmatmul.bf16.vlgmr.msra.gmra.mxu3 %v5026_v62  ;;  %6737 = vst [vmem:[#allocation34_spill] sm:$0xff] %v5066_v7  ;;  %v4186_v53 = vld [vmem:[#allocation3 + $0x34] sm:$0xf]  ;;  %v5080_v59 = vor.u32 %v4191_v24, %v3959_v21  ;;  %v3941_v60 = vld [vmem:[#allocation3 + $0x3c] sm:$0xf0]  ;;  %v6742_v18 = vmov 0   ;;  %v5100_v44 = vstv %s2230_s24  ;;  %vm2409_vm11 = vcmp.lt.s32.totalorder %v2408_v45, %v4916_v16 }
  0x74   : > { %730 = vmatpush.bf16.msra.mxu2 %v5042_v17  ;;  %1192 = vmatpush.bf16.msrb.mxu3 %v4890_v56  ;;  %6738 = vst [vmem:[#allocation35_spill] sm:$0xff] %v5071_v19  ;;  %v3947_v63 = vld [vmem:[#allocation3 + $0x38] sm:$0xf]  ;;  %v4188_v20 = vld [vmem:[#allocation3 + $0x40] sm:$0xf0]  ;;  %v5091_v4 = vor.u32 %v4186_v53, %v3941_v60  ;;  %v2212_v21 = vsel %vm2056_vm9, 1, %v6742_v18  ;;  %vm2232_vm12 = vcmp.lt.s32.totalorder %v5100_v44, %v4916_v16 }
  0x75   : > { %1860 = vperm.xlu1 %4311, %v1857_v11   ;;  %6740 = vst [vmem:[#allocation37_spill] sm:$0xff] %v5080_v59  ;;  %v5094_v11 = vor.u32 %v4188_v20, %v3947_v63  ;;  %v2035_v24 = vsel %vm1879_vm10, 1, %v6742_v18  ;;  %v3929_v25 = vld [vmem:[#allocation3 + $0x24] sm:$0xf0]  ;;  %v3935_v32 = vld [vmem:[#allocation3 + $0x20] sm:$0xf]  ;;  %vm2410_vm14 = vcmp.lt.s32.totalorder %v2408_v45, %v4925_v22 }
  0x76   : > { %1016 = vmatpush.bf16.msrb.mxu0 %v5033_v5  ;;  %2037 = vperm.xlu0 %4310, %v2034_v9   ;;  %v4183_v9 = vld [vmem:[#allocation3 + $0x1c] sm:$0xf]  ;;  %v4185_v30 = vld [vmem:[#allocation3 + $0x28] sm:$0xf0]  ;;  %v3917_v60 = vld [vmem:[#allocation3 + $0xc] sm:$0xf0] }
  0x77   : > { %1030 = vmatpush.bf16.msrb.mxu1 %v5036_v6  ;;  %6741 = vst [vmem:[#allocation38_spill] sm:$0xff] %v5094_v11  ;;  %v5104_v20 = vor.u32 %v4183_v9, %v3929_v25  ;;  %v5107_v53 = vor.u32 %v4185_v30, %v3935_v32  ;;  %v3923_v63 = vld [vmem:[#allocation3 + $0x8] sm:$0xf]  ;;  %v4182_v39 = vld [vmem:[#allocation3 + $0x10] sm:$0xf0]  ;;  %s2584_s25 = sadd.s32 5, %s4718_s11 }
  0x78   : > { %731 = vmatpush.bf16.msra.mxu2 %v5055_v47  ;;  %1193 = vmatpush.bf16.msrb.mxu3 %v4899_v1  ;;  %v5119_v30 = vor.u32 %v4182_v39, %v3923_v63  ;;  %v2565_v32 = vsel %vm2409_vm11, 1, %v6742_v18  ;;  %s2938_s26 = sadd.s32 6, %s4718_s11  ;;  %s2761_s28 = ssub.s32 10, %s4718_s11  ;;  %v2566_v25 = vsel %vm2410_vm14, 1, %v6742_v18 }
  0x79   : > { %6743 = vst [vmem:[#allocation39_spill] sm:$0xff] %v5104_v20  ;;  %v2939_v45 = vstv %s2938_s26  ;;  %s3115_s29 = ssub.s32 9, %s4718_s11  ;;  %s3469_s14 = ssub.s32 8, %s4718_s11 }
  0x7a   : > { %1017 = vmatpush.bf16.msrb.mxu0 %v5049_v31  ;;  %6744 = vst [vmem:[#allocation40_spill] sm:$0xff] %v5107_v53  ;;  %vm2940_vm15 = vcmp.lt.s32.totalorder %v2939_v45, %v4916_v16  ;;  %v5160_v63 = vstv %s3115_s29  ;;  %vm2941_vm2 = vcmp.lt.s32.totalorder %v2939_v45, %v4925_v22  ;;  %s3292_s16 = sadd.s32 7, %s4718_s11  ;;  %s1168_s17 = sadd.s32 1, %s4718_s11 }
  0x7b   : > { %1031 = vmatpush.bf16.msrb.mxu1 %v5052_v38  ;;  %6746 = vst [vmem:[#allocation42_spill] sm:$0xff] %v5119_v30  ;;  %vm3118_vm1 = vcmp.lt.s32.totalorder %v5160_v63, %v4925_v22  ;;  %p4149_p6 = scmp.ne.s32.totalorder %s4713_s10, 1 }
  0x7c   : > { %732 = vmatpush.bf16.msra.mxu2 %v5071_v19  ;;  %1194 = vmatpush.bf16.msrb.mxu3 %v4909_v12  ;;  %6749 = vst [vmem:[#allocation45_spill] sm:$0xff] %v5160_v63 }
  0x7d   : > { %2040 = vperm.xlu1 %4311, %v2035_v24   ;;  %v5124_v24 = vstv %s2584_s25 }
  0x7e   : > { %1018 = vmatpush.bf16.msrb.mxu0 %v5063_v0  ;;  %2217 = vperm.xlu0 %4310, %v2212_v21   ;;  %v2388_v21 = vsel %vm2232_vm12, 1, %v6742_v18  ;;  %6747 = vst [vmem:[#allocation43_spill] sm:$0xff] %v5124_v24  ;;  %vm2587_vm13 = vcmp.lt.s32.totalorder %v5124_v24, %v4925_v22 }
  0x7f   : > { %1032 = vmatpush.bf16.msrb.mxu1 %v5066_v7  ;;  %733 = vmatmul.bf16.vlgmr.msra.gmra.mxu2 %v5015_v50  ;;  %v4180_v50 = vld [vmem:[#allocation3 + $0x4] sm:$0xf]  ;;  %v2743_v39 = vsel %vm2587_vm13, 1, %v6742_v18 }
  0x80   : > { %1178 = vmatpush.bf16.msrb.mxu2 %v4888_v52  ;;  %1195 = vmatpush.bf16.msrb.mxu3 %v4933_v27  ;;  %v5116_v9 = vor.u32 %v4180_v50, %v3917_v60  ;;  %v5144_v50 = vstv %s2761_s28 }
  0x81   : > { %6748 = vst [vmem:[#allocation44_spill] sm:$0xff] %v5144_v50  ;;  %vm2763_vm0 = vcmp.lt.s32.totalorder %v5144_v50, %v4916_v16 }
  0x82   : > { %1019 = vmatpush.bf16.msrb.mxu0 %v5077_v37  ;;  %6745 = vst [vmem:[#allocation41_spill] sm:$0xff] %v5116_v9  ;;  %v2919_v60 = vsel %vm2763_vm0, 1, %v6742_v18 }
  0x83   : > { %1033 = vmatpush.bf16.msrb.mxu1 %v5080_v59 }
  0x84   : > { %1179 = vmatpush.bf16.msrb.mxu2 %v4895_v61  ;;  %1196 = vmatpush.bf16.msrb.mxu3 %v4947_v40 }
  0x85   : > { %2391 = vperm.xlu1 %4311, %v2388_v21   ;;  %v3097_v21 = vsel %vm2941_vm2, 1, %v6742_v18 }
  0x86   : > { %1020 = vmatpush.bf16.msrb.mxu0 %v5091_v4  ;;  %2568 = vperm.xlu0 %4310, %v2565_v32   ;;  %v3274_v32 = vsel %vm3118_vm1, 1, %v6742_v18 }
  0x87   : > { %1034 = vmatpush.bf16.msrb.mxu1 %v5094_v11 }
  0x88   : > { %1180 = vmatpush.bf16.msrb.mxu2 %v4905_v10  ;;  %1197 = vmatpush.bf16.msrb.mxu3 %v4962_v55 }
  0x8a   : > { %1021 = vmatpush.bf16.msrb.mxu0 %v5104_v20 }
  0x8b   : > { %1035 = vmatpush.bf16.msrb.mxu1 %v5107_v53 }
  0x8c   : > { %1181 = vmatpush.bf16.msrb.mxu2 %v4929_v23  ;;  %1198 = vmatpush.bf16.msrb.mxu3 %v4980_v14 }
  0x8d   : > { %2571 = vperm.xlu1 %4311, %v2566_v25   ;;  %v5178_v25 = vstv %s3292_s16 }
  0x8e   : > { %1022 = vmatpush.bf16.msrb.mxu0 %v5116_v9  ;;  %2748 = vperm.xlu0 %4310, %v2743_v39   ;;  %v3470_v39 = vstv %s3469_s14  ;;  %6750 = vst [vmem:[#allocation46_spill] sm:$0xff] %v5178_v25  ;;  %vm3294_vm4 = vcmp.lt.s32.totalorder %v5178_v25, %v4916_v16  ;;  %v3909_v25 = vld [vmem:[%s4736_s27 + $0xa8] sm:$0xff] }
  0x8f   : > { %1036 = vmatpush.bf16.msrb.mxu1 %v5119_v30  ;;  %vm3471_vm3 = vcmp.lt.s32.totalorder %v3470_v39, %v4916_v16  ;;  %vm3472_vm5 = vcmp.lt.s32.totalorder %v3470_v39, %v4925_v22  ;;  %v564_v22 = vld [vmem:[%s4731_s23] sm:$0xff]  ;;  %v566_v39 = vld [vmem:[%s4731_s23 + $0xc] sm:$0xff]  ;;  %v1043_v63 = vunpack.c.l.bf16 %v3909_v25 }
  0x90   : > { %1182 = vmatpush.bf16.msrb.mxu2 %v4942_v36  ;;  %1199 = vmatpush.bf16.msrb.mxu3 %v5000_v42  ;;  %v3626_v45 = vsel %vm3471_vm3, 1, %v6742_v18  ;;  %v3627_v16 = vsel %vm3472_vm5, 1, %v6742_v18 }
  0x91   : > { %1023 = vmatmul.bf16.vlgmr.msrb.gmra.mxu0 %v5026_v62 }
  0x92   : > { %1206 = vmatpush.bf16.msra.mxu0 %v4939_v34  ;;  %1037 = vmatmul.bf16.vlgmr.msrb.gmra.mxu1 %v5026_v62  ;;  %v3096_v62 = vsel %vm2940_vm15, 1, %v6742_v18 }
  0x93   : > { %1355 = vmatpush.bf16.msra.mxu1 %v4892_v57 }
  0x94   : > { %1183 = vmatpush.bf16.msrb.mxu2 %v4957_v51  ;;  %1383 = vmatpush.bf16.msra.mxu3 %v5011_v48 }
  0x95   : > { %2922 = vperm.xlu1 %4311, %v2919_v60   ;;  %v783_v60 = vrot.slane %v564_v22, 4 }
  0x96   : > { %1207 = vmatpush.bf16.msra.mxu0 %v4954_v49  ;;  %3099 = vperm.xlu0 %4310, %v3096_v62   ;;  %v3450_v62 = vsel %vm3294_vm4, 1, %v6742_v18 }
  0x97   : > { %1356 = vmatpush.bf16.msra.mxu1 %v4901_v2 }
  0x98   : > { %1184 = vmatpush.bf16.msrb.mxu2 %v4976_v8  ;;  %1384 = vmatpush.bf16.msra.mxu3 %v5036_v6 }
  0x9a   : > { %1208 = vmatpush.bf16.msra.mxu0 %v4968_v3 }
  0x9b   : > { %1357 = vmatpush.bf16.msra.mxu1 %v4911_v13 }
  0x9c   : > { %1185 = vmatpush.bf16.msrb.mxu2 %v4992_v33  ;;  %1385 = vmatpush.bf16.msra.mxu3 %v5052_v38 }
  0x9d   : > { %3102 = vperm.xlu1 %4311, %v3097_v21   ;;  %v787_v21 = vunpack.c.l.bf16 %v783_v60 }
  0x9e   : > { %1209 = vmatpush.bf16.msra.mxu0 %v4989_v29  ;;  %3279 = vperm.xlu0 %4310, %v3274_v32   ;;  %v739_v32 = vunpack.c.l.bf16 %v564_v22 }
  0x9f   : > { %1358 = vmatpush.bf16.msra.mxu1 %v4935_v28 }
  0xa0   : > { %1369 = vmatpush.bf16.msra.mxu2 %v5008_v46  ;;  %1386 = vmatpush.bf16.msra.mxu3 %v5066_v7 }
  0xa2   : > { %1210 = vmatpush.bf16.msra.mxu0 %v5017_v54 }
  0xa3   : > { %1359 = vmatpush.bf16.msra.mxu1 %v4949_v41 }
  0xa4   : > { %1370 = vmatpush.bf16.msra.mxu2 %v5033_v5  ;;  %1387 = vmatpush.bf16.msra.mxu3 %v5080_v59 }
  0xa5   : > { %3453 = vperm.xlu1 %4311, %v3450_v62  }
  0xa6   : > { %1211 = vmatpush.bf16.msra.mxu0 %v5042_v17  ;;  %3629 = vperm.xlu0 %4310, %v3626_v45  }
  0xa7   : > { %1360 = vmatpush.bf16.msra.mxu1 %v4964_v58 }
  0xa8   : > { %1371 = vmatpush.bf16.msra.mxu2 %v5049_v31  ;;  %1388 = vmatpush.bf16.msra.mxu3 %v5094_v11 }
  0xaa   : > { %1212 = vmatpush.bf16.msra.mxu0 %v5055_v47 }
  0xab   : > { %1361 = vmatpush.bf16.msra.mxu1 %v4982_v15 }
  0xac   : > { %1372 = vmatpush.bf16.msra.mxu2 %v5063_v0  ;;  %1389 = vmatpush.bf16.msra.mxu3 %v5107_v53 }
  0xad   : > { %3632 = vperm.xlu1 %4311, %v3627_v16  }
  0xae   : > { %1213 = vmatpush.bf16.msra.mxu0 %v5071_v19 }
  0xaf   : > { %1362 = vmatpush.bf16.msra.mxu1 %v5002_v43 }
  0xb0   : > { %1373 = vmatpush.bf16.msra.mxu2 %v5077_v37  ;;  %1390 = vmatpush.bf16.msra.mxu3 %v5119_v30 }
  0xb2   : > { %1532 = vmatpush.bf16.msrb.mxu0 %v4888_v52 }
  0xb3   : > { %1546 = vmatpush.bf16.msrb.mxu1 %v4890_v56 }
  0xb4   : > { %1374 = vmatpush.bf16.msra.mxu2 %v5091_v4 }
  0xb6   : > { %1533 = vmatpush.bf16.msrb.mxu0 %v4895_v61 }
  0xb7   : > { %1547 = vmatpush.bf16.msrb.mxu1 %v4899_v1 }
  0xb8   : > { %1375 = vmatpush.bf16.msra.mxu2 %v5104_v20 }
  0xba   : > { %1534 = vmatpush.bf16.msrb.mxu0 %v4905_v10 }
  0xbb   : > { %1548 = vmatpush.bf16.msrb.mxu1 %v4909_v12 }
  0xbc   : > { %1376 = vmatpush.bf16.msra.mxu2 %v5116_v9 }
  0xbe   : > { %1535 = vmatpush.bf16.msrb.mxu0 %v4929_v23 }
  0xbf   : > { %1549 = vmatpush.bf16.msrb.mxu1 %v4933_v27  ;;  %v3911_v27 = vld [vmem:[%s4736_s27 + $0xb4] sm:$0xff] }
  0xc2   : > { %1536 = vmatpush.bf16.msrb.mxu0 %v4942_v36 }
  0xc3   : > { %1550 = vmatpush.bf16.msrb.mxu1 %v4947_v40 }
  0xc6   : > { %1537 = vmatpush.bf16.msrb.mxu0 %v4957_v51 }
  0xc7   : > { %1551 = vmatpush.bf16.msrb.mxu1 %v4962_v55  ;;  %v784_v55 = vrot.slane %v566_v39, 4 }
  0xca   : > { %1538 = vmatpush.bf16.msrb.mxu0 %v4976_v8 }
  0xcb   : > { %1552 = vmatpush.bf16.msrb.mxu1 %v4980_v14  ;;  %v740_v14 = vunpack.c.l.bf16 %v566_v39  ;;  %v565_v39 = vld [vmem:[%s4731_s23 + $0x8] sm:$0xf] }
  0xce   : > { %1539 = vmatpush.bf16.msrb.mxu0 %v4992_v33  ;;  %v788_v33 = vunpack.c.l.bf16 %v784_v55 }
  0xcf   : > { %1553 = vmatpush.bf16.msrb.mxu1 %v5000_v42 }
  0xee   : > { %v706_v45 = vpop.f32.mrf.mxu0 }
  0xef   : > { %v741_v62 = vadd.f32 %v739_v32, %v706_v45  ;;  %v720_v16 = vpop.f32.mrf.mxu1 }
  0xf0   : > { %v789_v51 = vadd.f32 %v787_v21, %v720_v16 }
  0xf1   : > { %v3905_v40 = vmul.f32 -1.442695, %v741_v62 }
  0xf2   : > { %v3907_v8 = vmul.f32 -1.442695, %v789_v51  ;;  %v1044_v51 = vunpack.c.l.bf16 %v3911_v27 }
  0xf3   : > { %4315 = vpow2.f32 %v3905_v40 }
  0xf4   : > { %4317 = vpow2.f32 %v3907_v8 }
  0xf6   : > { %v1010_v42 = vpop.f32.mrf.mxu3  ;;  %v708_v36 = vpop.f32.mrf.mxu0 }
  0xf7   : > { %v1045_v30 = vadd.f32 %v1043_v63, %v1010_v42  ;;  %v742_v22 = vadd.f32 %v740_v14, %v708_v36  ;;  %v722_v60 = vpop.f32.mrf.mxu1 }
  0xf8   : > { %v790_v32 = vadd.f32 %v788_v33, %v722_v60 }
  0xf9   : > { %v4009_v53 = vmul.f32 -1.442695, %v1045_v30  ;;  %v4316_v45 = vpop.eup %4315  ;;  %v3906_v23 = vmul.f32 -1.442695, %v742_v22 }
  0xfa   : > { %v4318_v12 = vpop.eup %4317  ;;  %v749_v21 = vadd.f32 1.0, %v4316_v45  ;;  %v3908_v62 = vmul.f32 -1.442695, %v790_v32 }
  0xfb   : > { %4319 = vpow2.f32 %v4009_v53  ;;  %v5222_v16 = vadd.f32 1.0, %v4318_v12  ;;  %v1088_v53 = vrot.slane %v3911_v27, 4 }
  0xfc   : > { %4321 = vpow2.f32 %v3906_v23  ;;  %v1087_v23 = vrot.slane %v3909_v25, 4  ;;  %v762_v27 = vand.u32 2147483648, %v749_v21  ;;  %v833_v25 = vunpack.c.l.bf16 %v565_v39 }
  0xfd   : > { %4323 = vrcp.f32 %v749_v21  ;;  %v810_v32 = vand.u32 2147483648, %v5222_v16  ;;  %vm756_vm6 = vweird.f32 %v749_v21  ;;  %v808_v11 = vand.u32 2147483647, %v5222_v16 }
  0xfe   : > { %v1012_v40 = vpop.f32.mrf.mxu3  ;;  %4325 = vpow2.f32 %v3908_v62  ;;  %v763_v59 = vor.u32 1.1754944e-38, %v762_v27  ;;  %vm804_vm11 = vweird.f32 %v5222_v16 }
  0xff   : > { %v1046_v55 = vadd.f32 %v1044_v51, %v1012_v40  ;;  %4327 = vrcp.f32 %v5222_v16  ;;  %v760_v51 = vand.u32 2147483647, %v749_v21  ;;  %v5240_v40 = vld [vmem:[%s6639_s5] ss:$0 sm:$0xff]  ;;  %v5253_v10 = vor.u32 1.1754944e-38, %v810_v32 }
 0x100   : > { %vm5290_vm0 = vcmp.eq.f32.partialorder %v808_v11, 8.507059e+37 }
 0x101   : > { %v4320_v36 = vpop.eup %4319  ;;  %v4010_v8 = vmul.f32 -1.442695, %v1046_v55  ;;  %v1091_v55 = vunpack.c.l.bf16 %v1087_v23  ;;  %vm5257_vm8 = vcmp.eq.f32.partialorder %v760_v51, 8.507059e+37 }
 0x102   : > { %v4322_v14 = vpop.eup %4321  ;;  %v5225_v33 = vadd.f32 1.0, %v4320_v36  ;;  %v734_v22 = vpop.f32.mrf.mxu2  ;;  %v5243_v36 = vunpack.c.l.bf16 %v1088_v53 }
 0x103   : > { %v4324_v42 = vpop.eup %4323  ;;  %v5227_v30 = vadd.f32 1.0, %v4322_v14  ;;  %4329 = vpow2.f32 %v4010_v8 }
 0x104   : > { %4331 = vrcp.f32 %v5225_v33  ;;  %v752_v12 = vmul.f32 %v4324_v42, %v749_v21  ;;  %v4326_v63 = vpop.eup %4325  ;;  %vm757_vm7 = vweird.f32 %v4324_v42  ;;  %v829_v21 = vadd.f32 %v5240_v40, %v734_v22 }
 0x105   : > { %4333 = vrcp.f32 %v5227_v30  ;;  %v5232_v60 = vpop.eup %4327  ;;  %v5235_v45 = vadd.f32 1.0, %v4326_v63  ;;  %vm758_vm9 = vmor %vm756_vm6, %vm757_vm7  ;;  %vm1060_vm10 = vweird.f32 %v5225_v33  ;;  %v1064_v22 = vand.u32 2147483647, %v5225_v33 }
 0x106   : > { %v753_v62 = vsub.f32 1.0, %v752_v12  ;;  %v800_v14 = vmul.f32 %v5232_v60, %v5222_v16  ;;  %v5248_v12 = vld [vmem:[%s4731_s23 + $0x14] sm:$0xf]  ;;  %v777_v7 = vand.u32 2147483648, %v5227_v30  ;;  %v775_v20 = vand.u32 2147483647, %v5227_v30  ;;  %v849_v16 = vpop.permute.xlu0 %848 }
 0x107   : > { %4335 = vrcp.f32 %v5235_v45  ;;  %v834_v51 = vunpack.c.l.bf16 %v5248_v12  ;;  %vm771_vm14 = vweird.f32 %v5227_v30  ;;  %vm805_vm1 = vweird.f32 %v5232_v60 }
 0x108   : > { %v754_v63 = vmul.f32 %v4324_v42, %v753_v62  ;;  %vm5295_vm2 = vcmp.eq.f32.partialorder %v1064_v22, 8.507059e+37  ;;  %vm776_vm3 = vcmp.eq.f32.partialorder %v775_v20, 8.507059e+37  ;;  %vm819_vm4 = vweird.f32 %v5235_v45  ;;  %vm5326_vm6 = vmor %vm804_vm11, %vm805_vm1 }
 0x109   : > { %v4330_v8 = vpop.eup %4329 }
 0x10a   : > { %v5250_v50 = vpop.eup %4331  ;;  %v5255_v1 = vadd.f32 1.0, %v4330_v8  ;;  %v755_v39 = vadd.f32 %v4324_v42, %v754_v63  ;;  %v801_v8 = vsub.f32 1.0, %v800_v14 }
 0x10b   : > { %v4334_v53 = vpop.eup %4333  ;;  %v1056_v62 = vmul.f32 %v5250_v50, %v5225_v33  ;;  %vm1061_vm13 = vweird.f32 %v5250_v50 }
 0x10c   : > { %4337 = vrcp.f32 %v5255_v1  ;;  %v767_v32 = vmul.f32 %v4334_v53, %v5227_v30  ;;  %v759_v61 = vsel %vm758_vm9, %v4324_v42, %v755_v39  ;;  %v1066_v42 = vand.u32 2147483648, %v5225_v33  ;;  %v736_v39 = vpop.f32.mrf.mxu2  ;;  %v5304_v30 = vld [vmem:[%s6640_s6] ss:$0 sm:$0xff]  ;;  %vm5311_vm5 = vmor %vm1060_vm10, %vm1061_vm13 }
 0x10d   : > { %v1057_v27 = vsub.f32 1.0, %v1056_v62  ;;  %v5270_v56 = vpop.eup %4335  ;;  %v764_v24 = vsel %vm5257_vm8, %v763_v59, %v759_v61  ;;  %vm772_vm12 = vweird.f32 %v4334_v53  ;;  %v802_v61 = vmul.f32 %v5232_v60, %v801_v8 }
 0x10e   : > { %v1024_v63 = vpop.f32.mrf.mxu0  ;;  %v768_v43 = vsub.f32 1.0, %v767_v32  ;;  %v815_v12 = vmul.f32 %v5270_v56, %v5235_v45  ;;  %v831_v14 = vmul.f32 %v829_v21, %v764_v24  ;;  %v778_v21 = vor.u32 1.1754944e-38, %v777_v7  ;;  %vm773_vm15 = vmor %vm771_vm14, %vm772_vm12 }
 0x10f   : > { %v1093_v9 = vadd.f32 %v1091_v55, %v1024_v63  ;;  %v1058_v52 = vmul.f32 %v5250_v50, %v1057_v27  ;;  %v1038_v55 = vpop.f32.mrf.mxu1  ;;  %v830_v32 = vadd.f32 %v5240_v40, %v736_v39  ;;  %v803_v39 = vadd.f32 %v5232_v60, %v802_v61 }
 0x110   : > { %v769_v19 = vmul.f32 %v4334_v53, %v768_v43  ;;  %v835_v59 = vadd.f32 %v833_v25, %v831_v14  ;;  %vm820_vm7 = vweird.f32 %v5270_v56  ;;  %vm1075_vm9 = vweird.f32 %v5255_v1 }
 0x111   : > { %v4011_v62 = vmul.f32 -1.442695, %v1093_v9  ;;  %v816_v9 = vsub.f32 1.0, %v815_v12  ;;  %v1059_v43 = vadd.f32 %v5250_v50, %v1058_v52  ;;  %v823_v52 = vand.u32 2147483647, %v5235_v45  ;;  %vm5347_vm10 = vmor %vm819_vm4, %vm820_vm7 }
 0x112   : > { %v5283_v23 = vpop.eup %4337  ;;  %v770_v24 = vadd.f32 %v4334_v53, %v769_v19  ;;  %v825_v12 = vand.u32 2147483648, %v5235_v45 }
 0x113   : > { %4339 = vpow2.f32 %v4011_v62  ;;  %v1071_v25 = vmul.f32 %v5283_v23, %v5255_v1  ;;  %v817_v62 = vmul.f32 %v5270_v56, %v816_v9  ;;  %vm1076_vm8 = vweird.f32 %v5283_v23 }
 0x114   : > { %4341 = vtanh.f32 %v835_v59  ;;  %v774_v7 = vsel %vm773_vm15, %v4334_v53, %v770_v24  ;;  %v1067_v53 = vor.u32 1.1754944e-38, %v1066_v42  ;;  %v1063_v59 = vsel %vm5311_vm5, %v5250_v50, %v1059_v43  ;;  %v3910_v50 = vld [vmem:[%s4736_s27 + $0xb0] sm:$0xf]  ;;  %vm5359_vm11 = vmor %vm1075_vm9, %vm1076_vm8 }
 0x115   : > { %v779_v11 = vsel %vm776_vm3, %v778_v21, %v774_v7  ;;  %v1072_v27 = vsub.f32 1.0, %v1071_v25  ;;  %v1079_v21 = vand.u32 2147483647, %v5255_v1  ;;  %v1133_v43 = vadd.f32 %v5304_v30, %v1038_v55 }
 0x116   : > { %v1026_v63 = vpop.f32.mrf.mxu0  ;;  %v832_v22 = vmul.f32 %v830_v32, %v779_v11  ;;  %v1068_v7 = vsel %vm5295_vm2, %v1067_v53, %v1063_v59  ;;  %v818_v11 = vadd.f32 %v5270_v56, %v817_v62  ;;  %v826_v20 = vor.u32 1.1754944e-38, %v825_v12  ;;  %v3912_v59 = vld [vmem:[%s4736_s27 + $0xbc] sm:$0xf] }
 0x117   : > { %v1094_v14 = vadd.f32 %v5243_v36, %v1026_v63  ;;  %v1073_v24 = vmul.f32 %v5283_v23, %v1072_v27  ;;  %v1040_v19 = vpop.f32.mrf.mxu1  ;;  %v1137_v27 = vunpack.c.l.bf16 %v3910_v50  ;;  %v1135_v53 = vmul.f32 %v1133_v43, %v1068_v7 }
 0x118   : > { %v836_v36 = vadd.f32 %v834_v51, %v832_v22  ;;  %v1081_v51 = vand.u32 2147483648, %v5255_v1  ;;  %v807_v1 = vsel %vm5326_vm6, %v5232_v60, %v803_v39  ;;  %vm1080_vm12 = vcmp.eq.f32.partialorder %v1079_v21, 8.507059e+37 }
 0x119   : > { %v4340_v33 = vpop.eup %4339  ;;  %v4012_v61 = vmul.f32 -1.442695, %v1094_v14  ;;  %v1074_v25 = vadd.f32 %v5283_v23, %v1073_v24  ;;  %v1134_v62 = vadd.f32 %v5304_v30, %v1040_v19  ;;  %v812_v60 = vsel %vm5290_vm0, %v5253_v10, %v807_v1 }
 0x11a   : > { %v4342_v32 = vpop.eup %4341  ;;  %v5332_v9 = vadd.f32 1.0, %v4340_v33  ;;  %4343 = vtanh.f32 %v836_v36  ;;  %v1082_v14 = vor.u32 1.1754944e-38, %v1081_v51  ;;  %v1169_v39 = vstv %s1168_s17 }
 0x11b   : > { %v839_v63 = vsub.f32 %v4987_v26, %v4342_v32  ;;  %v1078_v22 = vsel %vm5359_vm11, %v5283_v23, %v1074_v25  ;;  %v822_v24 = vsel %vm5347_vm10, %v5270_v56, %v818_v11  ;;  %vm824_vm13 = vcmp.eq.f32.partialorder %v823_v52, 8.507059e+37  ;;  %v5377_v23 = vld [vmem:[%s6634_s0] sm:$0xff]  ;;  %v852_v11 = vpop.permute.xlu0 %851 }
 0x11c   : > { %4345 = vrcp.f32 %v5332_v9  ;;  %vm1170_vm14 = vcmp.lt.s32.totalorder %v1169_v39, %v5377_v23  ;;  %v1083_v42 = vsel %vm1080_vm12, %v1082_v14, %v1078_v22  ;;  %v1139_v56 = vadd.f32 %v1137_v27, %v1135_v53 }
 0x11d   : > { %4347 = vpow2.f32 %v4012_v61  ;;  %v841_v12 = vmul.f32 %v839_v63, %v812_v60  ;;  %v1326_v8 = vsel %vm1170_vm14, 1, %v6742_v18  ;;  %v1138_v52 = vunpack.c.l.bf16 %v3912_v59  ;;  %v5388_v63 = vld [vmem:[%s6634_s0 + $0x8] sm:$0xff] }
 0x11e   : > { %v827_v50 = vsel %vm824_vm13, %v826_v20, %v822_v24  ;;  %1329 = vperm.xlu2 %4312, %v1326_v8   ;;  %v1136_v25 = vmul.f32 %v1134_v62, %v1083_v42  ;;  %vm853_vm15 = vcmp.eq.s32.totalorder %v849_v16, 1  ;;  %vm1171_vm0 = vcmp.lt.s32.totalorder %v1169_v39, %v5388_v63  ;;  %v1153_v42 = vpop.permute.xlu1 %1152 }
 0x11f   : > { %v843_v51 = vadd.f32 %v4342_v32, %v841_v12  ;;  %vm854_vm1 = vcmp.eq.s32.totalorder %v852_v11, 1  ;;  %v1327_v16 = vsel %vm1171_vm0, 1, %v6742_v18  ;;  %v1114_v14 = vand.u32 2147483648, %v5332_v9 }
 0x120   : > { %v4344_v33 = vpop.eup %4343  ;;  %v1140_v27 = vadd.f32 %v1138_v52, %v1136_v25  ;;  %vm1108_vm3 = vweird.f32 %v5332_v9  ;;  %vm1157_vm12 = vcmp.eq.s32.totalorder %v1153_v42, 1  ;;  %v6773_v42 = vld [vmem:[#allocation35_spill] sm:$0xff] }
 0x121   : > { %v840_v10 = vsub.f32 %v4994_v35, %v4344_v33  ;;  %v5393_v45 = vsel %vm853_vm15, %v843_v51, %v4987_v26  ;;  %v857_v32 = vsel %vm853_vm15, %v843_v51, 0.0  ;;  %v1112_v26 = vand.u32 2147483647, %v5332_v9 }
 0x122   : > { %v4346_v36 = vpop.eup %4345  ;;  %vm2233_vm15 = vcmp.lt.s32.totalorder %v5100_v44, %v5388_v63  ;;  %v6777_v44 = vld [vmem:[#allocation41_spill] sm:$0xff] }
 0x123   : > { %v4348_v61 = vpop.eup %4347  ;;  %v1104_v21 = vmul.f32 %v4346_v36, %v5332_v9  ;;  %v842_v7 = vmul.f32 %v840_v10, %v827_v50  ;;  %vm1109_vm2 = vweird.f32 %v4346_v36  ;;  %v1115_v9 = vor.u32 1.1754944e-38, %v1114_v14 }
 0x124   : > { %v5383_v43 = vadd.f32 1.0, %v4348_v61  ;;  %vm5404_vm4 = vmor %vm1108_vm3, %vm1109_vm2  ;;  %vm1113_vm6 = vcmp.eq.f32.partialorder %v1112_v26, 8.507059e+37 }
 0x125   : > { %v1105_v55 = vsub.f32 1.0, %v1104_v21  ;;  %v844_v1 = vadd.f32 %v4344_v33, %v842_v7  ;;  %v6767_v33 = vld [vmem:[#allocation26_spill] sm:$0xff]  ;;  %v6768_v21 = vld [vmem:[#allocation29_spill] sm:$0xff] }
 0x126   : > { %4349 = vrcp.f32 %v5383_v43  ;;  %1332 = vperm.xlu2 %4312, %v1327_v16   ;;  %vm1524_vm5 = vcmp.lt.s32.totalorder %v6767_v33, %v5377_v23  ;;  %v1129_v61 = vand.u32 2147483648, %v5383_v43  ;;  %v1127_v50 = vand.u32 2147483647, %v5383_v43 }
 0x127   : > { %v1106_v19 = vmul.f32 %v4346_v36, %v1105_v55  ;;  %4351 = vtanh.f32 %v1139_v56  ;;  %v5397_v53 = vsel %vm854_vm1, %v844_v1, %v4994_v35  ;;  %v858_v22 = vsel %vm854_vm1, %v844_v1, 0.0 }
 0x128   : > { %v4207_v62 = vpack.c.bf16 %v858_v22, %v857_v32  ;;  %v1177_v60 = vpack.c.bf16 %v5397_v53, %v5393_v45  ;;  %4353 = vtanh.f32 %v1140_v27  ;;  %vm1123_vm8 = vweird.f32 %v5383_v43  ;;  %v6770_v27 = vld [vmem:[#allocation32_spill] sm:$0xff]  ;;  %v1156_v22 = vpop.permute.xlu1 %1155 }
 0x129   : > { %v1107_v20 = vadd.f32 %v4346_v36, %v1106_v19  ;;  %v1130_v11 = vor.u32 1.1754944e-38, %v1129_v61  ;;  %vm1128_vm10 = vcmp.eq.f32.partialorder %v1127_v50, 8.507059e+37  ;;  %v6769_v19 = vld [vmem:[#allocation30_spill] sm:$0xff]  ;;  %vm1702_vm11 = vcmp.lt.s32.totalorder %v6770_v27, %v5388_v63  ;;  %v6776_v61 = vld [vmem:[#allocation28_spill] sm:$0xff] }
 0x12a   : > { %4208 = vst [vmem:[%s4726_s20] sm:$0xff] %v4207_v62   ;;  %1186 = vmatmul.bf16.vlgmr.msrb.gmra.mxu2 %v1177_v60  ;;  %1200 = vmatmul.bf16.vlgmr.msrb.gmra.mxu3 %v1177_v60  ;;  %vm1158_vm13 = vcmp.eq.s32.totalorder %v1156_v22, 1  ;;  %v2389_v33 = vsel %vm2233_vm15, 1, %v6742_v18  ;;  %v6793_v22 = vld [vmem:[#allocation20_spill] sm:$0xff] }
 0x12b   : > { %v1111_v24 = vsel %vm5404_vm4, %v4346_v36, %v1107_v20  ;;  %1214 = vmatmul.bf16.vlgmr.msra.gmra.mxu0 %v1177_v60  ;;  %1560 = vmatpush.bf16.msrb.mxu2 %v4939_v34  ;;  %v1680_v36 = vsel %vm1524_vm5, 1, %v6742_v18 }
 0x12c   : > { %v4350_v39 = vpop.eup %4349  ;;  %1709 = vmatpush.bf16.msrb.mxu3 %v4892_v57  ;;  %1723 = vmatpush.bf16.msra.mxu0 %v5008_v46  ;;  %v1116_v8 = vsel %vm1113_vm6, %v1115_v9, %v1111_v24  ;;  %v6771_v24 = vld [vmem:[#allocation36_spill] sm:$0xff]  ;;  %v6772_v9 = vld [vmem:[#allocation39_spill] sm:$0xff] }
 0x12d   : > { %v4352_v35 = vpop.eup %4351  ;;  %v1119_v12 = vmul.f32 %v4350_v39, %v5383_v43  ;;  %vm1124_vm7 = vweird.f32 %v4350_v39  ;;  %v1858_v43 = vsel %vm1702_vm11, 1, %v6742_v18  ;;  %vm2055_vm14 = vcmp.lt.s32.totalorder %v6771_v24, %v5377_v23  ;;  %v6798_v24 = vld [vmem:[#allocation24_spill] sm:$0xff] }
 0x12e   : > { %v1143_v56 = vsub.f32 %v6768_v21, %v4352_v35  ;;  %v4354_v25 = vpop.eup %4353  ;;  %1683 = vperm.xlu2 %4312, %v1680_v36   ;;  %vm1125_vm9 = vmor %vm1123_vm8, %vm1124_vm7  ;;  %v6778_v36 = vld [vmem:[#allocation43_spill] sm:$0xff] }
 0x12f   : > { %v1120_v10 = vsub.f32 1.0, %v1119_v12  ;;  %1561 = vmatpush.bf16.msrb.mxu2 %v4954_v49  ;;  %v1144_v1 = vsub.f32 %v6769_v19, %v4354_v25  ;;  %v2211_v12 = vsel %vm2055_vm14, 1, %v6742_v18  ;;  %vm2586_vm0 = vcmp.lt.s32.totalorder %v6778_v36, %v5377_v23  ;;  %v4015_v36 = vld [vmem:[%s4731_s23 + $0x18] sm:$0xff] }
 0x130   : > { %1710 = vmatpush.bf16.msrb.mxu3 %v4901_v2  ;;  %1724 = vmatpush.bf16.msra.mxu0 %v5033_v5  ;;  %v1145_v7 = vmul.f32 %v1143_v56, %v1116_v8  ;;  %v6775_v8 = vld [vmem:[#allocation34_spill] sm:$0xff]  ;;  %v6780_v56 = vld [vmem:[#allocation13_spill] sm:$0xff]  ;;  %v2742_v50 = vsel %vm2586_vm0, 1, %v6742_v18 }
 0x131   : > { %v1121_v52 = vmul.f32 %v4350_v39, %v1120_v10  ;;  %v6774_v10 = vld [vmem:[#allocation11_spill] sm:$0xff] }
 0x132   : > { %v1147_v16 = vadd.f32 %v4352_v35, %v1145_v7  ;;  %v6783_v7 = vld [vmem:[#allocation15_spill] sm:$0xff] }
 0x133   : > { %v1122_v51 = vadd.f32 %v4350_v39, %v1121_v52  ;;  %1562 = vmatpush.bf16.msrb.mxu2 %v4968_v3  ;;  %v6781_v52 = vld [vmem:[#allocation37_spill] sm:$0xff] }
 0x134   : > { %1711 = vmatpush.bf16.msrb.mxu3 %v4911_v13  ;;  %1725 = vmatpush.bf16.msra.mxu0 %v5049_v31  ;;  %v1161_v62 = vsel %vm1157_vm12, %v1147_v16, 0.0  ;;  %v5436_v26 = vsel %vm1157_vm12, %v1147_v16, %v6768_v21  ;;  %v6779_v21 = vld [vmem:[#allocation12_spill] sm:$0xff]  ;;  %v6790_v16 = vld [vmem:[#allocation19_spill] sm:$0xff] }
 0x135   : > { %v1126_v55 = vsel %vm1125_vm9, %v4350_v39, %v1122_v51  ;;  %v6784_v51 = vld [vmem:[#allocation38_spill] sm:$0xff] }
 0x136   : > { %v1131_v32 = vsel %vm1128_vm10, %v1130_v11, %v1126_v55  ;;  %1863 = vperm.xlu2 %4312, %v1858_v43   ;;  %v6785_v11 = vld [vmem:[#allocation44_spill] sm:$0xff]  ;;  %v6792_v43 = vld [vmem:[#allocation45_spill] sm:$0xff] }
 0x137   : > { %v1146_v20 = vmul.f32 %v1144_v1, %v1131_v32  ;;  %1563 = vmatpush.bf16.msrb.mxu2 %v4989_v29  ;;  %vm2764_vm1 = vcmp.lt.s32.totalorder %v6785_v11, %v5388_v63  ;;  %v6786_v55 = vld [vmem:[#allocation16_spill] sm:$0xff]  ;;  %v6789_v32 = vld [vmem:[#allocation18_spill] sm:$0xff]  ;;  %vm3117_vm2 = vcmp.lt.s32.totalorder %v6792_v43, %v5377_v23  ;;  %v1220_v11 = vunpack.c.l.bf16 %v4015_v36 }
 0x138   : > { %1712 = vmatpush.bf16.msrb.mxu3 %v4935_v28  ;;  %1726 = vmatpush.bf16.msra.mxu0 %v5063_v0  ;;  %v6788_v1 = vld [vmem:[#allocation40_spill] sm:$0xff]  ;;  %v2920_v27 = vsel %vm2764_vm1, 1, %v6742_v18 }
 0x139   : > { %v1148_v14 = vadd.f32 %v4354_v25, %v1146_v20  ;;  %v6782_v25 = vld [vmem:[#allocation14_spill] sm:$0xff]  ;;  %v4017_v43 = vld [vmem:[%s4731_s23 + $0x24] sm:$0xff] }
 0x13a   : > { %v6791_v20 = vld [vmem:[#allocation42_spill] sm:$0xff] }
 0x13b   : > { %v1162_v60 = vsel %vm1158_vm13, %v1148_v14, 0.0  ;;  %v5439_v39 = vsel %vm1158_vm13, %v1148_v14, %v6769_v19  ;;  %1564 = vmatpush.bf16.msrb.mxu2 %v5017_v54  ;;  %v6787_v19 = vld [vmem:[#allocation17_spill] sm:$0xff] }
 0x13c   : > { %v4212_v59 = vpack.c.bf16 %v1162_v60, %v1161_v62  ;;  %v1354_v35 = vpack.c.bf16 %v5439_v39, %v5436_v26  ;;  %1713 = vmatpush.bf16.msrb.mxu3 %v4949_v41  ;;  %1727 = vmatpush.bf16.msra.mxu0 %v5077_v37  ;;  %v6794_v14 = vld [vmem:[#allocation21_spill] sm:$0xff]  ;;  %v3273_v62 = vsel %vm3117_vm2, 1, %v6742_v18  ;;  %v6795_v60 = vld [vmem:[#allocation22_spill] sm:$0xff] }
 0x13e   : > { %4284 = vst [vmem:[%s4741_s12 + $0x38] sm:$0xff] %v4212_v59   ;;  %1363 = vmatmul.bf16.vlgmr.msra.gmra.mxu1 %v1354_v35  ;;  %1377 = vmatmul.bf16.vlgmr.msra.gmra.mxu2 %v1354_v35  ;;  %v6796_v59 = vld [vmem:[#allocation23_spill] sm:$0xff] }
 0x13f   : > { %1391 = vmatmul.bf16.vlgmr.msra.gmra.mxu3 %v1354_v35  ;;  %1737 = vmatpush.bf16.msra.mxu1 %v5011_v48  ;;  %v6797_v35 = vld [vmem:[#allocation46_spill] sm:$0xff] }
 0x140   : > { %1565 = vmatpush.bf16.msrb.mxu2 %v5042_v17  ;;  %2214 = vperm.xlu2 %4312, %v2211_v12   ;;  %vm3295_vm3 = vcmp.lt.s32.totalorder %v6797_v35, %v5388_v63  ;;  %v6799_v12 = vld [vmem:[#allocation25_spill] sm:$0xff]  ;;  %v1265_v63 = vrot.slane %v4017_v43, 4 }
 0x141   : > { %1714 = vmatpush.bf16.msrb.mxu3 %v4964_v58  ;;  %1728 = vmatpush.bf16.msra.mxu0 %v5091_v4  ;;  %v3451_v23 = vsel %vm3295_vm3, 1, %v6742_v18  ;;  %v4025_v18 = vld [vmem:[%s4736_s27 + $0x90] sm:$0xff] }
 0x143   : > { %1738 = vmatpush.bf16.msra.mxu1 %v5036_v6 }
 0x144   : > { %1566 = vmatpush.bf16.msrb.mxu2 %v5055_v47 }
 0x145   : > { %1715 = vmatpush.bf16.msrb.mxu3 %v4982_v15  ;;  %1729 = vmatpush.bf16.msra.mxu0 %v6772_v9 }
 0x147   : > { %1739 = vmatpush.bf16.msra.mxu1 %v5052_v38 }
 0x148   : > { %1567 = vmatpush.bf16.msrb.mxu2 %v6773_v42  ;;  %2394 = vperm.xlu2 %4312, %v2389_v33   ;;  %v6800_v33 = vld [vmem:[#allocation27_spill] sm:$0xff] }
 0x149   : > { %1716 = vmatpush.bf16.msrb.mxu3 %v6776_v61  ;;  %1730 = vmatpush.bf16.msra.mxu0 %v6777_v44 }
 0x14b   : > { %1740 = vmatpush.bf16.msra.mxu1 %v6775_v8 }
 0x14c   : > { %1886 = vmatpush.bf16.msra.mxu2 %v6774_v10 }
 0x14d   : > { %1900 = vmatpush.bf16.msra.mxu3 %v6779_v21  ;;  %v4018_v21 = vld [vmem:[%s4731_s23 + $0x2c] sm:$0xf] }
 0x14e   : > { %v1315_v44 = vunpack.c.l.bf16 %v4018_v21 }
 0x14f   : > { %1741 = vmatpush.bf16.msra.mxu1 %v6781_v52 }
 0x150   : > { %1887 = vmatpush.bf16.msra.mxu2 %v6780_v56  ;;  %2745 = vperm.xlu2 %4312, %v2742_v50   ;;  %v1264_v50 = vrot.slane %v4015_v36, 4  ;;  %v1397_v36 = vunpack.c.l.bf16 %v4025_v18 }
 0x151   : > { %1901 = vmatpush.bf16.msra.mxu3 %v6782_v25 }
 0x153   : > { %1742 = vmatpush.bf16.msra.mxu1 %v6784_v51 }
 0x154   : > { %1888 = vmatpush.bf16.msra.mxu2 %v6783_v7 }
 0x155   : > { %1902 = vmatpush.bf16.msra.mxu3 %v6786_v55 }
 0x157   : > { %1743 = vmatpush.bf16.msra.mxu1 %v6788_v1 }
 0x158   : > { %1889 = vmatpush.bf16.msra.mxu2 %v6787_v19  ;;  %2925 = vperm.xlu2 %4312, %v2920_v27   ;;  %v1268_v27 = vunpack.c.l.bf16 %v1264_v50 }
 0x159   : > { %1903 = vmatpush.bf16.msra.mxu3 %v6789_v32 }
 0x15b   : > { %1744 = vmatpush.bf16.msra.mxu1 %v6791_v20  ;;  %v1441_v20 = vrot.slane %v4025_v18, 4 }
 0x15c   : > { %1890 = vmatpush.bf16.msra.mxu2 %v6790_v16 }
 0x15d   : > { %1904 = vmatpush.bf16.msra.mxu3 %v6793_v22  ;;  %v1269_v22 = vunpack.c.l.bf16 %v1265_v63 }
 0x160   : > { %1891 = vmatpush.bf16.msra.mxu2 %v6794_v14  ;;  %3276 = vperm.xlu2 %4312, %v3273_v62  }
 0x161   : > { %1905 = vmatpush.bf16.msra.mxu3 %v6795_v60 }
 0x164   : > { %1892 = vmatpush.bf16.msra.mxu2 %v6796_v59 }
 0x165   : > { %1906 = vmatpush.bf16.msra.mxu3 %v6798_v24 }
 0x168   : > { %1893 = vmatpush.bf16.msra.mxu2 %v6799_v12  ;;  %3456 = vperm.xlu2 %4312, %v3451_v23   ;;  %v1221_v12 = vunpack.c.l.bf16 %v4017_v43  ;;  %v1445_v43 = vunpack.c.l.bf16 %v1441_v20 }
 0x169   : > { %1907 = vmatpush.bf16.msra.mxu3 %v6800_v33 }
 0x1a8   : > { %v1215_v18 = vpop.f32.mrf.mxu0 }
 0x1ad   : > { %v1187_v59 = vpop.f32.mrf.mxu2  ;;  %v1201_v62 = vpop.f32.mrf.mxu3 }
 0x1ae   : > { %v1222_v60 = vadd.f32 %v1220_v11, %v1187_v59  ;;  %v1270_v14 = vadd.f32 %v1268_v27, %v1201_v62  ;;  %v4027_v27 = vld [vmem:[%s4736_s27 + $0x9c] sm:$0xff] }
 0x1af   : > { %v1398_v63 = vunpack.c.l.bf16 %v4027_v27 }
 0x1b0   : > { %v4019_v35 = vmul.f32 -1.442695, %v1222_v60  ;;  %v4021_v24 = vmul.f32 -1.442695, %v1270_v14 }
 0x1b2   : > { %4355 = vpow2.f32 %v4019_v35 }
 0x1b3   : > { %4357 = vpow2.f32 %v4021_v24 }
 0x1b5   : > { %v1189_v23 = vpop.f32.mrf.mxu2  ;;  %v1203_v33 = vpop.f32.mrf.mxu3 }
 0x1b6   : > { %v1223_v16 = vadd.f32 %v1221_v12, %v1189_v23  ;;  %v1271_v32 = vadd.f32 %v1269_v22, %v1203_v33 }
 0x1b8   : > { %v4356_v50 = vpop.eup %4355  ;;  %v4020_v19 = vmul.f32 -1.442695, %v1223_v16  ;;  %v4022_v59 = vmul.f32 -1.442695, %v1271_v32 }
 0x1b9   : > { %v1230_v55 = vadd.f32 1.0, %v4356_v50  ;;  %v4358_v14 = vpop.eup %4357  ;;  %v1442_v50 = vrot.slane %v4027_v27, 4 }
 0x1ba   : > { %4359 = vpow2.f32 %v4020_v19  ;;  %v5502_v62 = vadd.f32 1.0, %v4358_v14 }
 0x1bb   : > { %v1364_v11 = vpop.f32.mrf.mxu1  ;;  %4361 = vrcp.f32 %v1230_v55  ;;  %vm1237_vm5 = vweird.f32 %v1230_v55 }
 0x1bc   : > { %v1399_v60 = vadd.f32 %v1397_v36, %v1364_v11  ;;  %4363 = vpow2.f32 %v4022_v59  ;;  %vm1285_vm11 = vweird.f32 %v5502_v62 }
 0x1be   : > { %v4029_v24 = vmul.f32 -1.442695, %v1399_v60 }
 0x1c0   : > { %4365 = vpow2.f32 %v4029_v24  ;;  %v4360_v12 = vpop.eup %4359  ;;  %v1243_v24 = vand.u32 2147483648, %v1230_v55 }
 0x1c1   : > { %v1378_v22 = vpop.f32.mrf.mxu2  ;;  %v4362_v16 = vpop.eup %4361  ;;  %v5504_v35 = vadd.f32 1.0, %v4360_v12  ;;  %4367 = vrcp.f32 %v5502_v62 }
 0x1c2   : > { %v1447_v33 = vadd.f32 %v1445_v43, %v1378_v22  ;;  %v1233_v19 = vmul.f32 %v4362_v16, %v1230_v55  ;;  %v4364_v20 = vpop.eup %4363  ;;  %vm1238_vm4 = vweird.f32 %v4362_v16  ;;  %v1446_v22 = vunpack.c.l.bf16 %v1442_v50 }
 0x1c3   : > { %v1366_v32 = vpop.f32.mrf.mxu1  ;;  %4369 = vrcp.f32 %v5504_v35  ;;  %v5508_v11 = vadd.f32 1.0, %v4364_v20  ;;  %vm5515_vm6 = vmor %vm1237_vm5, %vm1238_vm4  ;;  %v1258_v56 = vand.u32 2147483648, %v5504_v35  ;;  %v1256_v10 = vand.u32 2147483647, %v5504_v35 }
 0x1c4   : > { %v4031_v23 = vmul.f32 -1.442695, %v1447_v33  ;;  %v1400_v36 = vadd.f32 %v1398_v63, %v1366_v32  ;;  %v1234_v59 = vsub.f32 1.0, %v1233_v19  ;;  %v1241_v33 = vand.u32 2147483647, %v1230_v55 }
 0x1c5   : > { %v1244_v55 = vor.u32 1.1754944e-38, %v1243_v24  ;;  %vm1252_vm9 = vweird.f32 %v5504_v35  ;;  %vm1257_vm12 = vcmp.eq.f32.partialorder %v1256_v10, 8.507059e+37  ;;  %vm1300_vm5 = vweird.f32 %v5508_v11 }
 0x1c6   : > { %v4366_v60 = vpop.eup %4365  ;;  %4371 = vpow2.f32 %v4031_v23  ;;  %v4030_v14 = vmul.f32 -1.442695, %v1400_v36  ;;  %v1235_v43 = vmul.f32 %v4362_v16, %v1234_v59  ;;  %v4016_v36 = vld [vmem:[%s4731_s23 + $0x20] sm:$0xf]  ;;  %vm1242_vm7 = vcmp.eq.f32.partialorder %v1241_v33, 8.507059e+37 }
 0x1c7   : > { %4373 = vrcp.f32 %v5508_v11  ;;  %v5511_v12 = vpop.eup %4367  ;;  %v5513_v32 = vadd.f32 1.0, %v4366_v60  ;;  %v1314_v19 = vunpack.c.l.bf16 %v4016_v36 }
 0x1c8   : > { %v1236_v63 = vadd.f32 %v4362_v16, %v1235_v43  ;;  %4375 = vpow2.f32 %v4030_v14  ;;  %v1281_v60 = vmul.f32 %v5511_v12, %v5502_v62  ;;  %v1217_v43 = vpop.f32.mrf.mxu0  ;;  %vm1286_vm14 = vweird.f32 %v5511_v12 }
 0x1c9   : > { %v4370_v27 = vpop.eup %4369  ;;  %v1380_v23 = vpop.f32.mrf.mxu2  ;;  %4377 = vrcp.f32 %v5513_v32  ;;  %v1420_v52 = vand.u32 2147483648, %v5513_v32  ;;  %v1418_v10 = vand.u32 2147483647, %v5513_v32  ;;  %vm1414_vm0 = vweird.f32 %v5513_v32  ;;  %vm5574_vm3 = vmor %vm1285_vm11, %vm1286_vm14 }
 0x1ca   : > { %v1240_v20 = vsel %vm5515_vm6, %v4362_v16, %v1236_v63  ;;  %v1248_v59 = vmul.f32 %v4370_v27, %v5504_v35  ;;  %v1448_v25 = vadd.f32 %v1446_v22, %v1380_v23  ;;  %v1310_v16 = vadd.f32 %v5240_v40, %v1215_v18 }
 0x1cb   : > { %v1245_v63 = vsel %vm1242_vm7, %v1244_v55, %v1240_v20  ;;  %vm1253_vm8 = vweird.f32 %v4370_v27  ;;  %v1282_v33 = vsub.f32 1.0, %v1281_v60  ;;  %v1259_v55 = vor.u32 1.1754944e-38, %v1258_v56 }
 0x1cc   : > { %v4372_v50 = vpop.eup %4371  ;;  %v1249_v7 = vsub.f32 1.0, %v1248_v59  ;;  %v1311_v59 = vadd.f32 %v5240_v40, %v1217_v43  ;;  %v1312_v23 = vmul.f32 %v1310_v16, %v1245_v63  ;;  %vm1254_vm10 = vmor %vm1252_vm9, %vm1253_vm8  ;;  %v1289_v40 = vand.u32 2147483647, %v5502_v62  ;;  %v1392_v63 = vpop.f32.mrf.mxu3 }
 0x1cd   : > { %v5526_v14 = vpop.eup %4373  ;;  %v5528_v1 = vadd.f32 1.0, %v4372_v50  ;;  %v1291_v50 = vand.u32 2147483648, %v5502_v62  ;;  %v1283_v21 = vmul.f32 %v5511_v12, %v1282_v33  ;;  %vm1419_vm2 = vcmp.eq.f32.partialorder %v1418_v10, 8.507059e+37 }
 0x1ce   : > { %v4376_v51 = vpop.eup %4375  ;;  %v1250_v24 = vmul.f32 %v4370_v27, %v1249_v7  ;;  %v1296_v18 = vmul.f32 %v5526_v14, %v5508_v11  ;;  %v4032_v7 = vmul.f32 -1.442695, %v1448_v25  ;;  %v1316_v56 = vadd.f32 %v1314_v19, %v1312_v23 }
 0x1cf   : > { %4379 = vrcp.f32 %v5528_v1  ;;  %v4378_v22 = vpop.eup %4377  ;;  %v5539_v20 = vadd.f32 1.0, %v4376_v51  ;;  %v4026_v51 = vld [vmem:[%s4736_s27 + $0x98] sm:$0xf]  ;;  %v1292_v42 = vor.u32 1.1754944e-38, %v1291_v50  ;;  %vm5556_vm15 = vcmp.eq.f32.partialorder %v1289_v40, 8.507059e+37 }
 0x1d0   : > { %v1251_v36 = vadd.f32 %v4370_v27, %v1250_v24  ;;  %v1410_v60 = vmul.f32 %v4378_v22, %v5513_v32  ;;  %v1297_v16 = vsub.f32 1.0, %v1296_v18  ;;  %vm1415_vm13 = vweird.f32 %v4378_v22 }
 0x1d1   : > { %4381 = vrcp.f32 %v5539_v20  ;;  %vm1416_vm1 = vmor %vm1414_vm0, %vm1415_vm13  ;;  %v1421_v50 = vor.u32 1.1754944e-38, %v1420_v52  ;;  %v1306_v40 = vand.u32 2147483648, %v5508_v11  ;;  %vm1301_vm4 = vweird.f32 %v5526_v14 }
 0x1d2   : > { %v1255_v35 = vsel %vm1254_vm10, %v4370_v27, %v1251_v36  ;;  %v1411_v25 = vsub.f32 1.0, %v1410_v60  ;;  %4383 = vpow2.f32 %v4032_v7  ;;  %v1487_v36 = vadd.f32 %v5304_v30, %v1392_v63  ;;  %v5564_v60 = vpop.permute.xlu2 %1329  ;;  %vm5588_vm7 = vmor %vm1300_vm5, %vm1301_vm4 }
 0x1d3   : > { %v1260_v43 = vsel %vm1257_vm12, %v1259_v55, %v1255_v35  ;;  %v1491_v7 = vunpack.c.l.bf16 %v4026_v51  ;;  %v1298_v33 = vmul.f32 %v5526_v14, %v1297_v16  ;;  %4385 = vtanh.f32 %v1316_v56 }
 0x1d4   : > { %v1313_v61 = vmul.f32 %v1311_v59, %v1260_v43  ;;  %v1412_v9 = vmul.f32 %v4378_v22, %v1411_v25  ;;  %v1435_v62 = vand.u32 2147483648, %v5539_v20  ;;  %v1394_v10 = vpop.f32.mrf.mxu3  ;;  %vm1429_vm9 = vweird.f32 %v5539_v20 }
 0x1d5   : > { %v5547_v24 = vpop.eup %4379  ;;  %v1299_v51 = vadd.f32 %v5526_v14, %v1298_v33  ;;  %vm1334_vm13 = vcmp.eq.s32.totalorder %v5564_v60, 1 }
 0x1d6   : > { %v1317_v27 = vadd.f32 %v1315_v44, %v1313_v61  ;;  %v1458_v18 = vmul.f32 %v5547_v24, %v5528_v1  ;;  %v1413_v59 = vadd.f32 %v4378_v22, %v1412_v9  ;;  %v1284_v61 = vadd.f32 %v5511_v12, %v1283_v21  ;;  %v4028_v21 = vld [vmem:[%s4736_s27 + $0xa4] sm:$0xf] }
 0x1d7   : > { %v4382_v23 = vpop.eup %4381  ;;  %v1304_v44 = vand.u32 2147483647, %v5508_v11  ;;  %v1307_v11 = vor.u32 1.1754944e-38, %v1306_v40  ;;  %vm1463_vm12 = vweird.f32 %v5547_v24 }
 0x1d8   : > { %v4384_v55 = vpop.eup %4383  ;;  %v1417_v35 = vsel %vm1416_vm1, %v4378_v22, %v1413_v59  ;;  %v1425_v9 = vmul.f32 %v4382_v23, %v5539_v20  ;;  %v1459_v43 = vsub.f32 1.0, %v1458_v18  ;;  %4387 = vtanh.f32 %v1317_v27 }
 0x1d9   : > { %v1422_v32 = vsel %vm1419_vm2, %v1421_v50, %v1417_v35  ;;  %v5568_v16 = vadd.f32 1.0, %v4384_v55  ;;  %v1288_v25 = vsel %vm5574_vm3, %v5511_v12, %v1284_v61  ;;  %vm1430_vm6 = vweird.f32 %v4382_v23  ;;  %v4386_v33 = vpop.eup %4385 }
 0x1da   : > { %v1489_v22 = vmul.f32 %v1487_v36, %v1422_v32  ;;  %v1426_v63 = vsub.f32 1.0, %v1425_v9  ;;  %v1433_v18 = vand.u32 2147483647, %v5539_v20  ;;  %vm5592_vm8 = vcmp.eq.f32.partialorder %v1304_v44, 8.507059e+37  ;;  %vm1431_vm10 = vmor %vm1429_vm9, %vm1430_vm6 }
 0x1db   : > { %4389 = vrcp.f32 %v5568_v16  ;;  %v1460_v59 = vmul.f32 %v5547_v24, %v1459_v43  ;;  %v1320_v50 = vsub.f32 %v5393_v45, %v4386_v33  ;;  %v1436_v35 = vor.u32 1.1754944e-38, %v1435_v62  ;;  %v6816_v62 = vld [vmem:[#allocation28_spill] sm:$0xff] }
 0x1dc   : > { %v1493_v56 = vadd.f32 %v1491_v7, %v1489_v22  ;;  %v1427_v27 = vmul.f32 %v4382_v23, %v1426_v63  ;;  %v1303_v7 = vsel %vm5588_vm7, %v5526_v14, %v1299_v51  ;;  %v1488_v44 = vadd.f32 %v5304_v30, %v1394_v10  ;;  %v1333_v30 = vpop.permute.xlu2 %1332 }
 0x1dd   : > { %v1492_v9 = vunpack.c.l.bf16 %v4028_v21  ;;  %v1293_v40 = vsel %vm5556_vm15, %v1292_v42, %v1288_v25  ;;  %vm1434_vm11 = vcmp.eq.f32.partialorder %v1433_v18, 8.507059e+37  ;;  %v1461_v14 = vadd.f32 %v5547_v24, %v1460_v59 }
 0x1de   : > { %4391 = vtanh.f32 %v1493_v56  ;;  %v1428_v61 = vadd.f32 %v4382_v23, %v1427_v27  ;;  %v4388_v55 = vpop.eup %4387  ;;  %v1322_v32 = vmul.f32 %v1320_v50, %v1293_v40  ;;  %v1308_v22 = vsel %vm5592_vm8, %v1307_v11, %v1303_v7 }
 0x1df   : > { %v1321_v20 = vsub.f32 %v5397_v53, %v4388_v55  ;;  %vm1335_vm14 = vcmp.eq.s32.totalorder %v1333_v30, 1  ;;  %vm1462_vm15 = vweird.f32 %v5528_v1  ;;  %v1468_v56 = vand.u32 2147483648, %v5528_v1 }
 0x1e0   : > { %v1432_v43 = vsel %vm1431_vm10, %v4382_v23, %v1428_v61  ;;  %v1324_v63 = vadd.f32 %v4386_v33, %v1322_v32  ;;  %vm5613_vm0 = vmor %vm1462_vm15, %vm1463_vm12  ;;  %v1466_v18 = vand.u32 2147483647, %v5528_v1  ;;  %v1483_v60 = vand.u32 2147483648, %v5568_v16 }
 0x1e1   : > { %v4390_v52 = vpop.eup %4389  ;;  %v1437_v51 = vsel %vm1434_vm11, %v1436_v35, %v1432_v43  ;;  %v1323_v23 = vmul.f32 %v1321_v20, %v1308_v22  ;;  %v1465_v36 = vsel %vm5613_vm0, %v5547_v24, %v1461_v14  ;;  %v1469_v61 = vor.u32 1.1754944e-38, %v1468_v56  ;;  %v1510_v14 = vpop.permute.xlu1 %1509  ;;  %v6817_v56 = vld [vmem:[#allocation41_spill] sm:$0xff] }
 0x1e2   : > { %v1473_v19 = vmul.f32 %v4390_v52, %v5568_v16  ;;  %v1490_v42 = vmul.f32 %v1488_v44, %v1437_v51  ;;  %v5625_v33 = vsel %vm1334_vm13, %v1324_v63, %v5393_v45  ;;  %v1338_v12 = vsel %vm1334_vm13, %v1324_v63, 0.0 }
 0x1e3   : > { %v1325_v27 = vadd.f32 %v4388_v55, %v1323_v23  ;;  %vm1478_vm1 = vweird.f32 %v4390_v52  ;;  %vm1467_vm2 = vcmp.eq.f32.partialorder %v1466_v18, 8.507059e+37  ;;  %vm1477_vm3 = vweird.f32 %v5568_v16  ;;  %v6821_v18 = vld [vmem:[#allocation13_spill] sm:$0xff] }
 0x1e4   : > { %v4392_v25 = vpop.eup %4391  ;;  %v1474_v21 = vsub.f32 1.0, %v1473_v19  ;;  %v1494_v10 = vadd.f32 %v1492_v9, %v1490_v42  ;;  %v1481_v55 = vand.u32 2147483647, %v5568_v16  ;;  %vm1479_vm4 = vmor %vm1477_vm3, %vm1478_vm1  ;;  %v1484_v40 = vor.u32 1.1754944e-38, %v1483_v60  ;;  %v6831_v60 = vld [vmem:[#allocation21_spill] sm:$0xff] }
 0x1e5   : > { %v5631_v59 = vsel %vm1335_vm14, %v1325_v27, %v5397_v53  ;;  %v1339_v1 = vsel %vm1335_vm14, %v1325_v27, 0.0  ;;  %v1497_v7 = vsub.f32 %v5436_v26, %v4392_v25  ;;  %v1470_v53 = vsel %vm1467_vm2, %v1469_v61, %v1465_v36  ;;  %v6820_v27 = vld [vmem:[#allocation38_spill] sm:$0xff]  ;;  %v6829_v61 = vld [vmem:[#allocation19_spill] sm:$0xff] }
 0x1e6   : > { %v1475_v11 = vmul.f32 %v4390_v52, %v1474_v21  ;;  %4393 = vtanh.f32 %v1494_v10  ;;  %v4217_v24 = vpack.c.bf16 %v1339_v1, %v1338_v12  ;;  %v1531_v45 = vpack.c.bf16 %v5631_v59, %v5625_v33  ;;  %v6818_v21 = vld [vmem:[#allocation11_spill] sm:$0xff]  ;;  %v6819_v10 = vld [vmem:[#allocation12_spill] sm:$0xff]  ;;  %v6822_v36 = vld [vmem:[#allocation14_spill] sm:$0xff] }
 0x1e7   : > { %v1499_v35 = vmul.f32 %v1497_v7, %v1470_v53  ;;  %vm1482_vm5 = vcmp.eq.f32.partialorder %v1481_v55, 8.507059e+37  ;;  %vm1512_vm7 = vcmp.eq.s32.totalorder %v1510_v14, 1  ;;  %v6823_v12 = vld [vmem:[#allocation40_spill] sm:$0xff]  ;;  %v6826_v7 = vld [vmem:[#allocation42_spill] sm:$0xff]  ;;  %v6833_v53 = vld [vmem:[#allocation23_spill] sm:$0xff] }
 0x1e8   : > { %v1476_v50 = vadd.f32 %v4390_v52, %v1475_v11  ;;  %4285 = vst [vmem:[%s4726_s20 + $0x8] sm:$0xff] %v4217_v24   ;;  %1540 = vmatmul.bf16.vlgmr.msrb.gmra.mxu0 %v1531_v45  ;;  %1554 = vmatmul.bf16.vlgmr.msrb.gmra.mxu1 %v1531_v45  ;;  %v6824_v11 = vld [vmem:[#allocation15_spill] sm:$0xff]  ;;  %v6825_v1 = vld [vmem:[#allocation16_spill] sm:$0xff]  ;;  %v6827_v24 = vld [vmem:[#allocation17_spill] sm:$0xff] }
 0x1e9   : > { %1568 = vmatmul.bf16.vlgmr.msrb.gmra.mxu2 %v1531_v45  ;;  %1914 = vmatpush.bf16.msrb.mxu0 %v4939_v34  ;;  %v1501_v20 = vadd.f32 %v4392_v25, %v1499_v35  ;;  %v6815_v25 = vld [vmem:[#allocation37_spill] sm:$0xff]  ;;  %v6828_v45 = vld [vmem:[#allocation18_spill] sm:$0xff]  ;;  %v6834_v35 = vld [vmem:[#allocation24_spill] sm:$0xff] }
 0x1ea   : > { %v1480_v44 = vsel %vm1479_vm4, %v4390_v52, %v1476_v50  ;;  %2063 = vmatpush.bf16.msrb.mxu1 %v4892_v57  ;;  %2077 = vmatpush.bf16.msrb.mxu2 %v5008_v46  ;;  %v1507_v52 = vpop.permute.xlu0 %1506  ;;  %v6830_v50 = vld [vmem:[#allocation20_spill] sm:$0xff]  ;;  %v6832_v55 = vld [vmem:[#allocation22_spill] sm:$0xff] }
 0x1eb   : > { %v1485_v16 = vsel %vm1482_vm5, %v1484_v40, %v1480_v44  ;;  %vm1511_vm6 = vcmp.eq.s32.totalorder %v1507_v52, 1  ;;  %v6835_v44 = vld [vmem:[#allocation25_spill] sm:$0xff] }
 0x1ec   : > { %v4394_v9 = vpop.eup %4393  ;;  %v1515_v22 = vsel %vm1511_vm6, %v1501_v20, 0.0  ;;  %v5650_v19 = vsel %vm1511_vm6, %v1501_v20, %v5436_v26  ;;  %v6813_v26 = vld [vmem:[#allocation39_spill] sm:$0xff]  ;;  %v4035_v40 = vld [vmem:[%s4731_s23 + $0x30] sm:$0xff] }
 0x1ed   : > { %v1498_v43 = vsub.f32 %v5439_v39, %v4394_v9  ;;  %1915 = vmatpush.bf16.msrb.mxu0 %v4954_v49 }
 0x1ee   : > { %2064 = vmatpush.bf16.msrb.mxu1 %v4901_v2  ;;  %2078 = vmatpush.bf16.msrb.mxu2 %v5033_v5 }
 0x1ef   : > { %v1500_v32 = vmul.f32 %v1498_v43, %v1485_v16  ;;  %v1618_v43 = vrot.slane %v4035_v40, 4  ;;  %v1574_v16 = vunpack.c.l.bf16 %v4035_v40 }
 0x1f1   : > { %v1502_v51 = vadd.f32 %v4394_v9, %v1500_v32  ;;  %1916 = vmatpush.bf16.msrb.mxu0 %v4968_v3  ;;  %v6836_v9 = vld [vmem:[#allocation27_spill] sm:$0xff]  ;;  %v1622_v20 = vunpack.c.l.bf16 %v1618_v43 }
 0x1f2   : > { %2065 = vmatpush.bf16.msrb.mxu1 %v4911_v13  ;;  %2079 = vmatpush.bf16.msrb.mxu2 %v5049_v31  ;;  %v4037_v32 = vld [vmem:[%s4731_s23 + $0x3c] sm:$0xff] }
 0x1f3   : > { %v1516_v30 = vsel %vm1512_vm7, %v1502_v51, 0.0  ;;  %v5653_v42 = vsel %vm1512_vm7, %v1502_v51, %v5439_v39  ;;  %v6814_v39 = vld [vmem:[#allocation35_spill] sm:$0xff] }
 0x1f4   : > { %v4222_v23 = vpack.c.bf16 %v1516_v30, %v1515_v22  ;;  %v1708_v63 = vpack.c.bf16 %v5653_v42, %v5650_v19  ;;  %v1619_v30 = vrot.slane %v4037_v32, 4 }
 0x1f5   : > { %1917 = vmatpush.bf16.msrb.mxu0 %v4989_v29 }
 0x1f6   : > { %4286 = vst [vmem:[%s4741_s12 + $0x30] sm:$0xff] %v4222_v23   ;;  %1717 = vmatmul.bf16.vlgmr.msrb.gmra.mxu3 %v1708_v63  ;;  %2066 = vmatpush.bf16.msrb.mxu1 %v4935_v28 }
 0x1f7   : > { %2091 = vmatpush.bf16.msrb.mxu3 %v5011_v48  ;;  %2080 = vmatpush.bf16.msrb.mxu2 %v5063_v0 }
 0x1f8   : > { %1731 = vmatmul.bf16.vlgmr.msra.gmra.mxu0 %v1708_v63  ;;  %1745 = vmatmul.bf16.vlgmr.msra.gmra.mxu1 %v1708_v63 }
 0x1f9   : > { %1918 = vmatpush.bf16.msrb.mxu0 %v5017_v54 }
 0x1fa   : > { %2067 = vmatpush.bf16.msrb.mxu1 %v4949_v41 }
 0x1fb   : > { %2092 = vmatpush.bf16.msrb.mxu3 %v5036_v6  ;;  %2081 = vmatpush.bf16.msrb.mxu2 %v5077_v37 }
 0x1fd   : > { %1919 = vmatpush.bf16.msrb.mxu0 %v5042_v17 }
 0x1fe   : > { %2068 = vmatpush.bf16.msrb.mxu1 %v4964_v58 }
 0x1ff   : > { %2093 = vmatpush.bf16.msrb.mxu3 %v5052_v38  ;;  %2082 = vmatpush.bf16.msrb.mxu2 %v5091_v4 }
 0x201   : > { %1920 = vmatpush.bf16.msrb.mxu0 %v5055_v47 }
 0x202   : > { %2069 = vmatpush.bf16.msrb.mxu1 %v4982_v15 }
 0x203   : > { %2094 = vmatpush.bf16.msrb.mxu3 %v6775_v8  ;;  %2083 = vmatpush.bf16.msrb.mxu2 %v6813_v26 }
 0x205   : > { %1921 = vmatpush.bf16.msrb.mxu0 %v6814_v39 }
 0x206   : > { %2070 = vmatpush.bf16.msrb.mxu1 %v6816_v62 }
 0x207   : > { %2095 = vmatpush.bf16.msrb.mxu3 %v6815_v25  ;;  %2084 = vmatpush.bf16.msrb.mxu2 %v6817_v56 }
 0x209   : > { %2240 = vmatpush.bf16.msra.mxu0 %v6818_v21 }
 0x20a   : > { %2254 = vmatpush.bf16.msra.mxu1 %v6819_v10 }
 0x20b   : > { %2096 = vmatpush.bf16.msrb.mxu3 %v6820_v27 }
 0x20d   : > { %2241 = vmatpush.bf16.msra.mxu0 %v6821_v18 }
 0x20e   : > { %2255 = vmatpush.bf16.msra.mxu1 %v6822_v36 }
 0x20f   : > { %2097 = vmatpush.bf16.msrb.mxu3 %v6823_v12 }
 0x211   : > { %2242 = vmatpush.bf16.msra.mxu0 %v6824_v11 }
 0x212   : > { %2256 = vmatpush.bf16.msra.mxu1 %v6825_v1 }
 0x213   : > { %2098 = vmatpush.bf16.msrb.mxu3 %v6826_v7 }
 0x215   : > { %2243 = vmatpush.bf16.msra.mxu0 %v6827_v24 }
 0x216   : > { %2257 = vmatpush.bf16.msra.mxu1 %v6828_v45 }
 0x219   : > { %2244 = vmatpush.bf16.msra.mxu0 %v6829_v61 }
 0x21a   : > { %2258 = vmatpush.bf16.msra.mxu1 %v6830_v50 }
 0x21d   : > { %2245 = vmatpush.bf16.msra.mxu0 %v6831_v60 }
 0x21e   : > { %2259 = vmatpush.bf16.msra.mxu1 %v6832_v55 }
 0x221   : > { %2246 = vmatpush.bf16.msra.mxu0 %v6833_v53  ;;  %v1575_v53 = vunpack.c.l.bf16 %v4037_v32 }
 0x222   : > { %2260 = vmatpush.bf16.msra.mxu1 %v6834_v35  ;;  %v1623_v35 = vunpack.c.l.bf16 %v1619_v30 }
 0x225   : > { %2247 = vmatpush.bf16.msra.mxu0 %v6835_v44  ;;  %v4045_v44 = vld [vmem:[%s4736_s27 + $0x78] sm:$0xff] }
 0x226   : > { %2261 = vmatpush.bf16.msra.mxu1 %v6836_v9  ;;  %v1795_v50 = vrot.slane %v4045_v44, 4  ;;  %v1751_v32 = vunpack.c.l.bf16 %v4045_v44 }
 0x265   : > { %v1541_v52 = vpop.f32.mrf.mxu0  ;;  %v1555_v14 = vpop.f32.mrf.mxu1 }
 0x266   : > { %v1576_v51 = vadd.f32 %v1574_v16, %v1541_v52  ;;  %v1624_v22 = vadd.f32 %v1622_v20, %v1555_v14  ;;  %v1799_v52 = vunpack.c.l.bf16 %v1795_v50 }
 0x268   : > { %v4039_v23 = vmul.f32 -1.442695, %v1576_v51  ;;  %v4041_v63 = vmul.f32 -1.442695, %v1624_v22 }
 0x26a   : > { %4395 = vpow2.f32 %v4039_v23 }
 0x26b   : > { %4397 = vpow2.f32 %v4041_v63 }
 0x26d   : > { %v1543_v55 = vpop.f32.mrf.mxu0  ;;  %v1557_v9 = vpop.f32.mrf.mxu1 }
 0x26e   : > { %v1577_v7 = vadd.f32 %v1575_v53, %v1543_v55  ;;  %v1625_v60 = vadd.f32 %v1623_v35, %v1557_v9  ;;  %v4047_v35 = vld [vmem:[%s4736_s27 + $0x84] sm:$0xff] }
 0x26f   : > { %v1796_v50 = vrot.slane %v4047_v35, 4 }
 0x270   : > { %v4396_v40 = vpop.eup %4395  ;;  %v4040_v43 = vmul.f32 -1.442695, %v1577_v7  ;;  %v4042_v16 = vmul.f32 -1.442695, %v1625_v60 }
 0x271   : > { %v4398_v12 = vpop.eup %4397  ;;  %v1584_v61 = vadd.f32 1.0, %v4396_v40  ;;  %v1569_v40 = vpop.f32.mrf.mxu2 }
 0x272   : > { %4399 = vpow2.f32 %v4040_v43  ;;  %v5702_v20 = vadd.f32 1.0, %v4398_v12 }
 0x273   : > { %4401 = vrcp.f32 %v1584_v61  ;;  %v1597_v43 = vand.u32 2147483648, %v1584_v61  ;;  %vm1591_vm9 = vweird.f32 %v1584_v61 }
 0x274   : > { %4403 = vpow2.f32 %v4042_v16  ;;  %vm1639_vm1 = vweird.f32 %v5702_v20 }
 0x275   : > { %v1732_v14 = vpop.f32.mrf.mxu0  ;;  %4405 = vrcp.f32 %v5702_v20 }
 0x276   : > { %v1801_v51 = vadd.f32 %v1799_v52, %v1732_v14  ;;  %v1752_v52 = vunpack.c.l.bf16 %v4047_v35  ;;  %v4036_v14 = vld [vmem:[%s4731_s23 + $0x38] sm:$0xf] }
 0x277   : > { %v1668_v35 = vunpack.c.l.bf16 %v4036_v14 }
 0x278   : > { %v4400_v55 = vpop.eup %4399  ;;  %v4051_v12 = vmul.f32 -1.442695, %v1801_v51 }
 0x279   : > { %v1718_v53 = vpop.f32.mrf.mxu3  ;;  %v4402_v9 = vpop.eup %4401  ;;  %v5706_v7 = vadd.f32 1.0, %v4400_v55  ;;  %v1595_v55 = vand.u32 2147483647, %v1584_v61 }
 0x27a   : > { %v1753_v22 = vadd.f32 %v1751_v32, %v1718_v53  ;;  %v1587_v60 = vmul.f32 %v4402_v9, %v1584_v61  ;;  %v4404_v30 = vpop.eup %4403  ;;  %vm1592_vm8 = vweird.f32 %v4402_v9  ;;  %v1800_v32 = vunpack.c.l.bf16 %v1796_v50 }
 0x27b   : > { %4407 = vrcp.f32 %v5706_v7  ;;  %v5709_v44 = vadd.f32 1.0, %v4404_v30  ;;  %v5711_v63 = vpop.eup %4405  ;;  %vm1593_vm10 = vmor %vm1591_vm9, %vm1592_vm8  ;;  %vm1596_vm11 = vcmp.eq.f32.partialorder %v1595_v55, 8.507059e+37  ;;  %v1612_v55 = vand.u32 2147483648, %v5706_v7 }
 0x27c   : > { %v1588_v23 = vsub.f32 1.0, %v1587_v60  ;;  %v4049_v16 = vmul.f32 -1.442695, %v1753_v22  ;;  %v1635_v51 = vmul.f32 %v5711_v63, %v5702_v20  ;;  %v1598_v22 = vor.u32 1.1754944e-38, %v1597_v43 }
 0x27d   : > { %4409 = vrcp.f32 %v5709_v44  ;;  %v1734_v30 = vpop.f32.mrf.mxu0  ;;  %v1610_v36 = vand.u32 2147483647, %v5706_v7  ;;  %vm1606_vm13 = vweird.f32 %v5706_v7  ;;  %vm1640_vm0 = vweird.f32 %v5711_v63 }
 0x27e   : > { %v1589_v45 = vmul.f32 %v4402_v9, %v1588_v23  ;;  %4411 = vpow2.f32 %v4051_v12  ;;  %v5720_v12 = vld [vmem:[%s6639_s5] ss:$0 sm:$0xff]  ;;  %v1636_v25 = vsub.f32 1.0, %v1635_v51  ;;  %vm5748_vm2 = vmor %vm1639_vm1, %vm1640_vm0  ;;  %vm1654_vm5 = vweird.f32 %v5709_v44 }
 0x27f   : > { %4413 = vpow2.f32 %v4049_v16  ;;  %6837 = vst [vmem:[#allocation26_spill] sm:$0xff] %v5720_v12  ;;  %v1664_v50 = vadd.f32 %v5720_v12, %v1569_v40  ;;  %v1802_v16 = vadd.f32 %v1800_v32, %v1734_v30  ;;  %v1571_v32 = vpop.f32.mrf.mxu2  ;;  %vm1611_vm15 = vcmp.eq.f32.partialorder %v1610_v36, 8.507059e+37 }
 0x280   : > { %v1590_v53 = vadd.f32 %v4402_v9, %v1589_v45 }
 0x281   : > { %v1720_v60 = vpop.f32.mrf.mxu3  ;;  %v4408_v27 = vpop.eup %4407  ;;  %v4052_v51 = vmul.f32 -1.442695, %v1802_v16 }
 0x282   : > { %v1754_v24 = vadd.f32 %v1752_v52, %v1720_v60  ;;  %v1594_v23 = vsel %vm1593_vm10, %v4402_v9, %v1590_v53  ;;  %v1602_v45 = vmul.f32 %v4408_v27, %v5706_v7  ;;  %vm1607_vm12 = vweird.f32 %v4408_v27 }
 0x283   : > { %v1599_v61 = vsel %vm1596_vm11, %v1598_v22, %v1594_v23  ;;  %v5724_v1 = vpop.eup %4409  ;;  %v4038_v22 = vld [vmem:[%s4731_s23 + $0x44] sm:$0xf]  ;;  %v1637_v23 = vmul.f32 %v5711_v63, %v1636_v25  ;;  %vm1608_vm14 = vmor %vm1606_vm13, %vm1607_vm12 }
 0x284   : > { %v1666_v43 = vmul.f32 %v1664_v50, %v1599_v61  ;;  %v1603_v14 = vsub.f32 1.0, %v1602_v45  ;;  %v4412_v52 = vpop.eup %4411  ;;  %v1650_v9 = vmul.f32 %v5724_v1, %v5709_v44  ;;  %v4050_v53 = vmul.f32 -1.442695, %v1754_v24 }
 0x285   : > { %v4414_v60 = vpop.eup %4413  ;;  %v1613_v24 = vor.u32 1.1754944e-38, %v1612_v55  ;;  %v1638_v25 = vadd.f32 %v5711_v63, %v1637_v23  ;;  %vm1655_vm3 = vweird.f32 %v5724_v1 }
 0x286   : > { %v1670_v11 = vadd.f32 %v1668_v35, %v1666_v43  ;;  %v1604_v40 = vmul.f32 %v4408_v27, %v1603_v14  ;;  %v5731_v30 = vadd.f32 1.0, %v4414_v60  ;;  %4415 = vpow2.f32 %v4050_v53  ;;  %vm5768_vm6 = vmor %vm1654_vm5, %vm1655_vm3 }
 0x287   : > { %v1651_v45 = vsub.f32 1.0, %v1650_v9  ;;  %v5736_v35 = vadd.f32 1.0, %v4412_v52  ;;  %v1665_v43 = vadd.f32 %v5720_v12, %v1571_v32  ;;  %v1669_v14 = vunpack.c.l.bf16 %v4038_v22 }
 0x288   : > { %4417 = vtanh.f32 %v1670_v11  ;;  %v1605_v50 = vadd.f32 %v4408_v27, %v1604_v40  ;;  %v1645_v11 = vand.u32 2147483648, %v5702_v20  ;;  %v1642_v32 = vsel %vm5748_vm2, %v5711_v63, %v1638_v25 }
 0x289   : > { %4419 = vrcp.f32 %v5731_v30  ;;  %v1652_v9 = vmul.f32 %v5724_v1, %v1651_v45  ;;  %v1660_v45 = vand.u32 2147483648, %v5709_v44  ;;  %v1774_v25 = vand.u32 2147483648, %v5731_v30 }
 0x28a   : > { %v1609_v61 = vsel %vm1608_vm14, %v4408_v27, %v1605_v50  ;;  %4421 = vpow2.f32 %v4052_v51  ;;  %v1643_v27 = vand.u32 2147483647, %v5702_v20  ;;  %v1646_v22 = vor.u32 1.1754944e-38, %v1645_v11 }
 0x28b   : > { %v1614_v53 = vsel %vm1611_vm15, %v1613_v24, %v1609_v61  ;;  %4423 = vrcp.f32 %v5736_v35  ;;  %v1653_v50 = vadd.f32 %v5724_v1, %v1652_v9  ;;  %v1746_v24 = vpop.f32.mrf.mxu1  ;;  %v1772_v9 = vand.u32 2147483647, %v5731_v30 }
 0x28c   : > { %v1667_v7 = vmul.f32 %v1665_v43, %v1614_v53  ;;  %v4416_v16 = vpop.eup %4415  ;;  %vm1644_vm4 = vcmp.eq.f32.partialorder %v1643_v27, 8.507059e+37  ;;  %v1658_v53 = vand.u32 2147483647, %v5709_v44  ;;  %v5781_v44 = vld [vmem:[%s6640_s6] ss:$0 sm:$0xff]  ;;  %vm1768_vm8 = vweird.f32 %v5731_v30 }
 0x28d   : > { %v5746_v55 = vadd.f32 1.0, %v4416_v16  ;;  %v1841_v40 = vadd.f32 %v5781_v44, %v1746_v24  ;;  %vm1773_vm11 = vcmp.eq.f32.partialorder %v1772_v9, 8.507059e+37  ;;  %v1684_v24 = vpop.permute.xlu2 %1683  ;;  %vm1816_vm3 = vweird.f32 %v5736_v35 }
 0x28e   : > { %v4418_v52 = vpop.eup %4417  ;;  %v1671_v36 = vadd.f32 %v1669_v14, %v1667_v7  ;;  %v1647_v14 = vsel %vm1644_vm4, %v1646_v22, %v1642_v32  ;;  %v4046_v7 = vld [vmem:[%s4736_s27 + $0x80] sm:$0xf]  ;;  %v1661_v32 = vor.u32 1.1754944e-38, %v1660_v45  ;;  %vm1659_vm9 = vcmp.eq.f32.partialorder %v1658_v53, 8.507059e+37 }
 0x28f   : > { %v4420_v60 = vpop.eup %4419  ;;  %v1674_v20 = vsub.f32 %v5625_v33, %v4418_v52  ;;  %vm1688_vm13 = vcmp.eq.s32.totalorder %v1684_v24, 1  ;;  %vm1783_vm14 = vweird.f32 %v5746_v55 }
 0x290   : > { %4425 = vtanh.f32 %v1671_v36  ;;  %v1764_v51 = vmul.f32 %v4420_v60, %v5731_v30  ;;  %v4422_v23 = vpop.eup %4421  ;;  %vm1769_vm7 = vweird.f32 %v4420_v60  ;;  %v1657_v36 = vsel %vm5768_vm6, %v5724_v1, %v1653_v50 }
 0x291   : > { %4427 = vrcp.f32 %v5746_v55  ;;  %v5761_v43 = vadd.f32 1.0, %v4422_v23  ;;  %v5763_v63 = vpop.eup %4423  ;;  %v1676_v27 = vmul.f32 %v1674_v20, %v1647_v14  ;;  %vm1770_vm10 = vmor %vm1768_vm8, %vm1769_vm7  ;;  %v1775_v1 = vor.u32 1.1754944e-38, %v1774_v25  ;;  %v1687_v14 = vpop.permute.xlu0 %1686 }
 0x292   : > { %v1765_v61 = vsub.f32 1.0, %v1764_v51  ;;  %v1812_v51 = vmul.f32 %v5763_v63, %v5736_v35  ;;  %v1845_v50 = vunpack.c.l.bf16 %v4046_v7  ;;  %v1662_v11 = vsel %vm1659_vm9, %v1661_v32, %v1657_v36 }
 0x293   : > { %4429 = vrcp.f32 %v5761_v43  ;;  %vm1689_vm12 = vcmp.eq.s32.totalorder %v1687_v14, 1  ;;  %v1678_v8 = vadd.f32 %v4418_v52, %v1676_v27  ;;  %vm1817_vm2 = vweird.f32 %v5763_v63 }
 0x294   : > { %v1766_v16 = vmul.f32 %v4420_v60, %v1765_v61  ;;  %v1813_v53 = vsub.f32 1.0, %v1812_v51  ;;  %vm1818_vm4 = vmor %vm1816_vm3, %vm1817_vm2  ;;  %vm1831_vm7 = vweird.f32 %v5761_v43 }
 0x295   : > { %v1692_v52 = vsel %vm1688_vm13, %v1678_v8, 0.0 }
 0x296   : > { %v4426_v22 = vpop.eup %4425  ;;  %v1767_v23 = vadd.f32 %v4420_v60, %v1766_v16 }
 0x297   : > { %v4428_v20 = vpop.eup %4427  ;;  %v1675_v61 = vsub.f32 %v5631_v59, %v4426_v22 }
 0x298   : > { %v1771_v12 = vsel %vm1770_vm10, %v4420_v60, %v1767_v23  ;;  %v1779_v45 = vmul.f32 %v4428_v20, %v5746_v55  ;;  %v1789_v60 = vand.u32 2147483648, %v5746_v55  ;;  %vm1784_vm15 = vweird.f32 %v4428_v20 }
 0x299   : > { %v1677_v16 = vmul.f32 %v1675_v61, %v1662_v11  ;;  %v1776_v18 = vsel %vm1773_vm11, %v1775_v1, %v1771_v12  ;;  %v5790_v30 = vpop.eup %4429  ;;  %v1787_v12 = vand.u32 2147483647, %v5746_v55  ;;  %v1814_v23 = vmul.f32 %v5763_v63, %v1813_v53  ;;  %vm1785_vm0 = vmor %vm1783_vm14, %vm1784_vm15 }
 0x29a   : > { %v1843_v10 = vmul.f32 %v1841_v40, %v1776_v18  ;;  %v1780_v56 = vsub.f32 1.0, %v1779_v45  ;;  %v1827_v7 = vmul.f32 %v5790_v30, %v5761_v43  ;;  %v4048_v18 = vld [vmem:[%s4736_s27 + $0x8c] sm:$0xf]  ;;  %v1748_v40 = vpop.f32.mrf.mxu1  ;;  %v1790_v1 = vor.u32 1.1754944e-38, %v1789_v60 }
 0x29b   : > { %v1679_v25 = vadd.f32 %v4426_v22, %v1677_v16  ;;  %v5802_v22 = vsel %vm1688_vm13, %v1678_v8, %v5625_v33  ;;  %vm1788_vm1 = vcmp.eq.f32.partialorder %v1787_v12, 8.507059e+37  ;;  %v1842_v33 = vadd.f32 %v5781_v44, %v1748_v40 }
 0x29c   : > { %v1847_v9 = vadd.f32 %v1845_v50, %v1843_v10  ;;  %v1781_v36 = vmul.f32 %v4428_v20, %v1780_v56  ;;  %v1828_v61 = vsub.f32 1.0, %v1827_v7  ;;  %v1815_v55 = vadd.f32 %v5763_v63, %v1814_v23 }
 0x29d   : > { %v1693_v27 = vsel %vm1689_vm12, %v1679_v25, 0.0  ;;  %v5806_v32 = vsel %vm1689_vm12, %v1679_v25, %v5631_v59  ;;  %v1846_v59 = vunpack.c.l.bf16 %v4048_v18  ;;  %v1822_v45 = vand.u32 2147483648, %v5736_v35 }
 0x29e   : > { %v4227_v10 = vpack.c.bf16 %v1693_v27, %v1692_v52  ;;  %4431 = vtanh.f32 %v1847_v9  ;;  %v1782_v56 = vadd.f32 %v4428_v20, %v1781_v36  ;;  %v1885_v51 = vpack.c.bf16 %v5806_v32, %v5802_v22 }
 0x29f   : > { %v1820_v16 = vand.u32 2147483647, %v5736_v35  ;;  %v1819_v53 = vsel %vm1818_vm4, %v5763_v63, %v1815_v55  ;;  %vm1832_vm5 = vweird.f32 %v5790_v30  ;;  %v1823_v60 = vor.u32 1.1754944e-38, %v1822_v45  ;;  %v6846_v55 = vld [vmem:[#allocation14_spill] sm:$0xff]  ;;  %v6849_v45 = vld [vmem:[#allocation16_spill] sm:$0xff] }
 0x2a0   : > { %4287 = vst [vmem:[%s4726_s20 + $0x10] sm:$0xff] %v4227_v10   ;;  %v1786_v8 = vsel %vm1785_vm0, %v4428_v20, %v1782_v56  ;;  %1894 = vmatmul.bf16.vlgmr.msra.gmra.mxu2 %v1885_v51  ;;  %1908 = vmatmul.bf16.vlgmr.msra.gmra.mxu3 %v1885_v51  ;;  %v1829_v20 = vmul.f32 %v5790_v30, %v1828_v61  ;;  %v1837_v9 = vand.u32 2147483648, %v5761_v43  ;;  %v1835_v35 = vand.u32 2147483647, %v5761_v43  ;;  %vm1833_vm8 = vmor %vm1831_vm7, %vm1832_vm5  ;;  %v1861_v56 = vpop.permute.xlu1 %1860 }
 0x2a1   : > { %v1791_v50 = vsel %vm1788_vm1, %v1790_v1, %v1786_v8  ;;  %1922 = vmatmul.bf16.vlgmr.msrb.gmra.mxu0 %v1885_v51  ;;  %2268 = vmatpush.bf16.msra.mxu2 %v4939_v34  ;;  %vm1821_vm6 = vcmp.eq.f32.partialorder %v1820_v16, 8.507059e+37  ;;  %v1864_v51 = vpop.permute.xlu2 %1863  ;;  %vm1865_vm10 = vcmp.eq.s32.totalorder %v1861_v56, 1  ;;  %v6851_v16 = vld [vmem:[#allocation38_spill] sm:$0xff] }
 0x2a2   : > { %v1844_v14 = vmul.f32 %v1842_v33, %v1791_v50  ;;  %2417 = vmatpush.bf16.msra.mxu3 %v4892_v57  ;;  %2431 = vmatpush.bf16.msrb.mxu0 %v5008_v46  ;;  %v1830_v7 = vadd.f32 %v5790_v30, %v1829_v20  ;;  %v1824_v36 = vsel %vm1821_vm6, %v1823_v60, %v1819_v53  ;;  %v1838_v27 = vor.u32 1.1754944e-38, %v1837_v9  ;;  %v6844_v50 = vld [vmem:[#allocation13_spill] sm:$0xff]  ;;  %v6847_v20 = vld [vmem:[#allocation15_spill] sm:$0xff]  ;;  %v6852_v53 = vld [vmem:[#allocation18_spill] sm:$0xff] }
 0x2a3   : > { %vm1836_vm9 = vcmp.eq.f32.partialorder %v1835_v35, 8.507059e+37  ;;  %vm1866_vm11 = vcmp.eq.s32.totalorder %v1864_v51, 1  ;;  %v6855_v60 = vld [vmem:[#allocation20_spill] sm:$0xff]  ;;  %v6856_v9 = vld [vmem:[#allocation21_spill] sm:$0xff]  ;;  %v6857_v35 = vld [vmem:[#allocation42_spill] sm:$0xff] }
 0x2a4   : > { %v4432_v11 = vpop.eup %4431  ;;  %v1848_v24 = vadd.f32 %v1846_v59, %v1844_v14  ;;  %v1834_v12 = vsel %vm1833_vm8, %v5790_v30, %v1830_v7  ;;  %v6845_v14 = vld [vmem:[#allocation34_spill] sm:$0xff]  ;;  %v6854_v7 = vld [vmem:[#allocation40_spill] sm:$0xff] }
 0x2a5   : > { %2269 = vmatpush.bf16.msra.mxu2 %v4954_v49  ;;  %v1851_v25 = vsub.f32 %v5650_v19, %v4432_v11  ;;  %v1839_v40 = vsel %vm1836_vm9, %v1838_v27, %v1834_v12  ;;  %v6860_v12 = vld [vmem:[#allocation24_spill] sm:$0xff]  ;;  %v6862_v27 = vld [vmem:[#allocation27_spill] sm:$0xff]  ;;  %v4057_v56 = vld [vmem:[%s4731_s23 + $0x54] sm:$0xff] }
 0x2a6   : > { %4433 = vtanh.f32 %v1848_v24  ;;  %2418 = vmatpush.bf16.msra.mxu3 %v4901_v2  ;;  %2432 = vmatpush.bf16.msrb.mxu0 %v5033_v5  ;;  %v6850_v24 = vld [vmem:[#allocation17_spill] sm:$0xff] }
 0x2a7   : > { %v1853_v63 = vmul.f32 %v1851_v25, %v1824_v36  ;;  %v6853_v25 = vld [vmem:[#allocation19_spill] sm:$0xff]  ;;  %v6858_v36 = vld [vmem:[#allocation22_spill] sm:$0xff] }
 0x2a9   : > { %2270 = vmatpush.bf16.msra.mxu2 %v4968_v3  ;;  %v1855_v43 = vadd.f32 %v4432_v11, %v1853_v63  ;;  %v6848_v11 = vld [vmem:[#allocation37_spill] sm:$0xff]  ;;  %v6859_v63 = vld [vmem:[#allocation23_spill] sm:$0xff] }
 0x2aa   : > { %2419 = vmatpush.bf16.msra.mxu3 %v4911_v13  ;;  %2433 = vmatpush.bf16.msrb.mxu0 %v5049_v31 }
 0x2ab   : > { %v1869_v30 = vsel %vm1865_vm10, %v1855_v43, 0.0  ;;  %v5846_v1 = vsel %vm1865_vm10, %v1855_v43, %v5650_v19  ;;  %v6842_v19 = vld [vmem:[#allocation41_spill] sm:$0xff] }
 0x2ac   : > { %v4434_v52 = vpop.eup %4433 }
 0x2ad   : > { %v1852_v18 = vsub.f32 %v5653_v42, %v4434_v52  ;;  %2271 = vmatpush.bf16.msra.mxu2 %v4989_v29 }
 0x2ae   : > { %2420 = vmatpush.bf16.msra.mxu3 %v4935_v28  ;;  %2434 = vmatpush.bf16.msrb.mxu0 %v5063_v0 }
 0x2af   : > { %v1854_v10 = vmul.f32 %v1852_v18, %v1839_v40  ;;  %v4055_v18 = vld [vmem:[%s4731_s23 + $0x48] sm:$0xff] }
 0x2b0   : > { %v1972_v40 = vrot.slane %v4055_v18, 4  ;;  %v1928_v43 = vunpack.c.l.bf16 %v4055_v18 }
 0x2b1   : > { %v1856_v23 = vadd.f32 %v4434_v52, %v1854_v10  ;;  %2272 = vmatpush.bf16.msra.mxu2 %v5017_v54  ;;  %v6861_v52 = vld [vmem:[#allocation25_spill] sm:$0xff] }
 0x2b2   : > { %2421 = vmatpush.bf16.msra.mxu3 %v4949_v41  ;;  %2435 = vmatpush.bf16.msrb.mxu0 %v5077_v37  ;;  %v1976_v10 = vunpack.c.l.bf16 %v1972_v40 }
 0x2b3   : > { %v1870_v61 = vsel %vm1866_vm11, %v1856_v23, 0.0  ;;  %v5849_v8 = vsel %vm1866_vm11, %v1856_v23, %v5653_v42  ;;  %v6843_v42 = vld [vmem:[#allocation12_spill] sm:$0xff] }
 0x2b4   : > { %v4232_v33 = vpack.c.bf16 %v1870_v61, %v1869_v30  ;;  %v2062_v59 = vpack.c.bf16 %v5849_v8, %v5846_v1 }
 0x2b5   : > { %2273 = vmatpush.bf16.msra.mxu2 %v5042_v17 }
 0x2b6   : > { %4288 = vst [vmem:[%s4741_s12 + $0x28] sm:$0xff] %v4232_v33   ;;  %2071 = vmatmul.bf16.vlgmr.msrb.gmra.mxu1 %v2062_v59  ;;  %2085 = vmatmul.bf16.vlgmr.msrb.gmra.mxu2 %v2062_v59  ;;  %v1973_v33 = vrot.slane %v4057_v56, 4 }
 0x2b7   : > { %2099 = vmatmul.bf16.vlgmr.msrb.gmra.mxu3 %v2062_v59  ;;  %2445 = vmatpush.bf16.msrb.mxu1 %v5011_v48 }
 0x2b8   : > { %2422 = vmatpush.bf16.msra.mxu3 %v4964_v58  ;;  %2436 = vmatpush.bf16.msrb.mxu0 %v5091_v4 }
 0x2b9   : > { %2274 = vmatpush.bf16.msra.mxu2 %v5055_v47 }
 0x2bb   : > { %2446 = vmatpush.bf16.msrb.mxu1 %v5036_v6 }
 0x2bc   : > { %2423 = vmatpush.bf16.msra.mxu3 %v4982_v15  ;;  %2437 = vmatpush.bf16.msrb.mxu0 %v6813_v26 }
 0x2bd   : > { %2275 = vmatpush.bf16.msra.mxu2 %v6814_v39 }
 0x2bf   : > { %2447 = vmatpush.bf16.msrb.mxu1 %v5052_v38 }
 0x2c0   : > { %2424 = vmatpush.bf16.msra.mxu3 %v6816_v62  ;;  %2438 = vmatpush.bf16.msrb.mxu0 %v6842_v19 }
 0x2c1   : > { %2594 = vmatpush.bf16.msrb.mxu2 %v6818_v21 }
 0x2c3   : > { %2448 = vmatpush.bf16.msrb.mxu1 %v6845_v14 }
 0x2c4   : > { %2608 = vmatpush.bf16.msrb.mxu3 %v6843_v42 }
 0x2c5   : > { %2595 = vmatpush.bf16.msrb.mxu2 %v6844_v50 }
 0x2c7   : > { %2449 = vmatpush.bf16.msrb.mxu1 %v6848_v11 }
 0x2c8   : > { %2609 = vmatpush.bf16.msrb.mxu3 %v6846_v55 }
 0x2c9   : > { %2596 = vmatpush.bf16.msrb.mxu2 %v6847_v20 }
 0x2cb   : > { %2450 = vmatpush.bf16.msrb.mxu1 %v6851_v16 }
 0x2cc   : > { %2610 = vmatpush.bf16.msrb.mxu3 %v6849_v45 }
 0x2cd   : > { %2597 = vmatpush.bf16.msrb.mxu2 %v6850_v24 }
 0x2cf   : > { %2451 = vmatpush.bf16.msrb.mxu1 %v6854_v7 }
 0x2d0   : > { %2611 = vmatpush.bf16.msrb.mxu3 %v6852_v53 }
 0x2d1   : > { %2598 = vmatpush.bf16.msrb.mxu2 %v6853_v25 }
 0x2d3   : > { %2452 = vmatpush.bf16.msrb.mxu1 %v6857_v35 }
 0x2d4   : > { %2612 = vmatpush.bf16.msrb.mxu3 %v6855_v60  ;;  %v4065_v60 = vld [vmem:[%s4736_s27 + $0x60] sm:$0xff] }
 0x2d5   : > { %2599 = vmatpush.bf16.msrb.mxu2 %v6856_v9 }
 0x2d8   : > { %2613 = vmatpush.bf16.msrb.mxu3 %v6858_v36 }
 0x2d9   : > { %2600 = vmatpush.bf16.msrb.mxu2 %v6859_v63  ;;  %v1929_v63 = vunpack.c.l.bf16 %v4057_v56  ;;  %v2149_v56 = vrot.slane %v4065_v60, 4 }
 0x2dc   : > { %2614 = vmatpush.bf16.msrb.mxu3 %v6860_v12  ;;  %v1977_v12 = vunpack.c.l.bf16 %v1973_v33  ;;  %v4056_v33 = vld [vmem:[%s4731_s23 + $0x50] sm:$0xf] }
 0x2dd   : > { %2601 = vmatpush.bf16.msrb.mxu2 %v6861_v52 }
 0x2e0   : > { %2615 = vmatpush.bf16.msrb.mxu3 %v6862_v27 }
 0x323   : > { %v1895_v51 = vpop.f32.mrf.mxu2  ;;  %v1909_v23 = vpop.f32.mrf.mxu3 }
 0x324   : > { %v1930_v30 = vadd.f32 %v1928_v43, %v1895_v51  ;;  %v1978_v61 = vadd.f32 %v1976_v10, %v1909_v23  ;;  %v2105_v43 = vunpack.c.l.bf16 %v4065_v60  ;;  %v1923_v23 = vpop.f32.mrf.mxu0 }
 0x326   : > { %v4059_v59 = vmul.f32 -1.442695, %v1930_v30  ;;  %v4061_v36 = vmul.f32 -1.442695, %v1978_v61 }
 0x328   : > { %4435 = vpow2.f32 %v4059_v59 }
 0x329   : > { %4437 = vpow2.f32 %v4061_v36 }
 0x32b   : > { %v1897_v52 = vpop.f32.mrf.mxu2  ;;  %v1911_v35 = vpop.f32.mrf.mxu3 }
 0x32c   : > { %v1931_v27 = vadd.f32 %v1929_v63, %v1897_v52  ;;  %v1979_v9 = vadd.f32 %v1977_v12, %v1911_v35 }
 0x32e   : > { %v4436_v18 = vpop.eup %4435  ;;  %v4060_v40 = vmul.f32 -1.442695, %v1931_v27  ;;  %v4062_v53 = vmul.f32 -1.442695, %v1979_v9  ;;  %v2153_v27 = vunpack.c.l.bf16 %v2149_v56 }
 0x32f   : > { %v4438_v7 = vpop.eup %4437  ;;  %v1938_v25 = vadd.f32 1.0, %v4436_v18 }
 0x330   : > { %v5890_v16 = vadd.f32 1.0, %v4438_v7  ;;  %4439 = vpow2.f32 %v4060_v40  ;;  %v4067_v7 = vld [vmem:[%s4736_s27 + $0x6c] sm:$0xff] }
 0x331   : > { %4441 = vrcp.f32 %v1938_v25  ;;  %v1951_v59 = vand.u32 2147483648, %v1938_v25  ;;  %v2106_v40 = vunpack.c.l.bf16 %v4067_v7  ;;  %v1949_v56 = vand.u32 2147483647, %v1938_v25 }
 0x332   : > { %4443 = vpow2.f32 %v4062_v53  ;;  %vm1945_vm13 = vweird.f32 %v1938_v25  ;;  %vm1993_vm5 = vweird.f32 %v5890_v16 }
 0x333   : > { %v2072_v10 = vpop.f32.mrf.mxu1  ;;  %4445 = vrcp.f32 %v5890_v16  ;;  %vm1950_vm15 = vcmp.eq.f32.partialorder %v1949_v56, 8.507059e+37 }
 0x334   : > { %v2107_v36 = vadd.f32 %v2105_v43, %v2072_v10  ;;  %v2150_v43 = vrot.slane %v4067_v7, 4 }
 0x336   : > { %v4440_v35 = vpop.eup %4439  ;;  %v4069_v63 = vmul.f32 -1.442695, %v2107_v36 }
 0x337   : > { %v4442_v12 = vpop.eup %4441  ;;  %v5893_v52 = vadd.f32 1.0, %v4440_v35  ;;  %v6863_v35 = vld [vmem:[#allocation26_spill] sm:$0xff] }
 0x338   : > { %v1941_v9 = vmul.f32 %v4442_v12, %v1938_v25  ;;  %4447 = vpow2.f32 %v4069_v63  ;;  %v4444_v51 = vpop.eup %4443  ;;  %vm1946_vm12 = vweird.f32 %v4442_v12  ;;  %v2018_v63 = vadd.f32 %v6863_v35, %v1923_v23 }
 0x339   : > { %4449 = vrcp.f32 %v5893_v52  ;;  %v2086_v53 = vpop.f32.mrf.mxu2  ;;  %v5897_v30 = vpop.eup %4445  ;;  %v5899_v61 = vadd.f32 1.0, %v4444_v51  ;;  %v2022_v51 = vunpack.c.l.bf16 %v4056_v33  ;;  %vm1947_vm14 = vmor %vm1945_vm13, %vm1946_vm12  ;;  %vm1960_vm1 = vweird.f32 %v5893_v52 }
 0x33a   : > { %v1942_v60 = vsub.f32 1.0, %v1941_v9  ;;  %v2155_v18 = vadd.f32 %v2153_v27, %v2086_v53  ;;  %v1989_v24 = vmul.f32 %v5897_v30, %v5890_v16  ;;  %v1952_v27 = vor.u32 1.1754944e-38, %v1951_v59  ;;  %v1925_v59 = vpop.f32.mrf.mxu0 }
 0x33b   : > { %4451 = vrcp.f32 %v5899_v61  ;;  %v2074_v36 = vpop.f32.mrf.mxu1  ;;  %vm1994_vm4 = vweird.f32 %v5897_v30  ;;  %vm2008_vm13 = vweird.f32 %v5899_v61 }
 0x33c   : > { %v1943_v10 = vmul.f32 %v4442_v12, %v1942_v60  ;;  %v4071_v11 = vmul.f32 -1.442695, %v2155_v18  ;;  %v2108_v53 = vadd.f32 %v2106_v40, %v2074_v36  ;;  %v2154_v60 = vunpack.c.l.bf16 %v2150_v43  ;;  %v4058_v36 = vld [vmem:[%s4731_s23 + $0x5c] sm:$0xf]  ;;  %vm5931_vm6 = vmor %vm1993_vm5, %vm1994_vm4 }
 0x33d   : > { %v1990_v50 = vsub.f32 1.0, %v1989_v24 }
 0x33e   : > { %v4448_v45 = vpop.eup %4447  ;;  %v1944_v9 = vadd.f32 %v4442_v12, %v1943_v10  ;;  %4453 = vpow2.f32 %v4071_v11  ;;  %v4070_v40 = vmul.f32 -1.442695, %v2108_v53 }
 0x33f   : > { %v4450_v20 = vpop.eup %4449  ;;  %v5906_v7 = vadd.f32 1.0, %v4448_v45  ;;  %v1966_v45 = vand.u32 2147483648, %v5893_v52  ;;  %v1991_v24 = vmul.f32 %v5897_v30, %v1990_v50 }
 0x340   : > { %v1948_v55 = vsel %vm1947_vm14, %v4442_v12, %v1944_v9  ;;  %v1956_v23 = vmul.f32 %v4450_v20, %v5893_v52  ;;  %vm1961_vm0 = vweird.f32 %v4450_v20 }
 0x341   : > { %v1953_v14 = vsel %vm1950_vm15, %v1952_v27, %v1948_v55  ;;  %4455 = vrcp.f32 %v5906_v7  ;;  %v2088_v25 = vpop.f32.mrf.mxu2  ;;  %v5910_v33 = vpop.eup %4451  ;;  %v1964_v55 = vand.u32 2147483647, %v5893_v52  ;;  %vm1962_vm2 = vmor %vm1960_vm1, %vm1961_vm0  ;;  %v1967_v53 = vor.u32 1.1754944e-38, %v1966_v45 }
 0x342   : > { %v2020_v18 = vmul.f32 %v2018_v63, %v1953_v14  ;;  %v1957_v10 = vsub.f32 1.0, %v1956_v23  ;;  %v2004_v12 = vmul.f32 %v5910_v33, %v5899_v61  ;;  %v2156_v43 = vadd.f32 %v2154_v60, %v2088_v25 }
 0x343   : > { %4457 = vpow2.f32 %v4070_v40  ;;  %v2019_v63 = vadd.f32 %v6863_v35, %v1925_v59  ;;  %vm1965_vm3 = vcmp.eq.f32.partialorder %v1964_v55, 8.507059e+37  ;;  %v1999_v35 = vand.u32 2147483648, %v5890_v16 }
 0x344   : > { %v2024_v56 = vadd.f32 %v2022_v51, %v2020_v18  ;;  %v1958_v11 = vmul.f32 %v4450_v20, %v1957_v10  ;;  %v4072_v9 = vmul.f32 -1.442695, %v2156_v43  ;;  %v4454_v14 = vpop.eup %4453  ;;  %v2023_v51 = vunpack.c.l.bf16 %v4058_v36 }
 0x345   : > { %v2005_v60 = vsub.f32 1.0, %v2004_v12  ;;  %v5920_v18 = vadd.f32 1.0, %v4454_v14  ;;  %v1992_v10 = vadd.f32 %v5897_v30, %v1991_v24  ;;  %v1997_v12 = vand.u32 2147483647, %v5890_v16 }
 0x346   : > { %v1959_v27 = vadd.f32 %v4450_v20, %v1958_v11  ;;  %4459 = vtanh.f32 %v2024_v56  ;;  %v2126_v43 = vand.u32 2147483647, %v5906_v7  ;;  %v2128_v56 = vand.u32 2147483648, %v5906_v7 }
 0x347   : > { %v4456_v23 = vpop.eup %4455  ;;  %4461 = vpow2.f32 %v4072_v9  ;;  %v1996_v16 = vsel %vm5931_vm6, %v5897_v30, %v1992_v10  ;;  %v2000_v14 = vor.u32 1.1754944e-38, %v1999_v35  ;;  %vm2122_vm8 = vweird.f32 %v5906_v7  ;;  %v4066_v35 = vld [vmem:[%s4736_s27 + $0x68] sm:$0xf] }
 0x348   : > { %v1963_v25 = vsel %vm1962_vm2, %v4450_v20, %v1959_v27  ;;  %v2118_v50 = vmul.f32 %v4456_v23, %v5906_v7  ;;  %v2006_v20 = vmul.f32 %v5910_v33, %v2005_v60  ;;  %4463 = vrcp.f32 %v5920_v18  ;;  %v2100_v60 = vpop.f32.mrf.mxu3 }
 0x349   : > { %v1968_v52 = vsel %vm1965_vm3, %v1967_v53, %v1963_v25  ;;  %v4458_v40 = vpop.eup %4457  ;;  %vm2123_vm7 = vweird.f32 %v4456_v23  ;;  %vm2009_vm9 = vweird.f32 %v5910_v33  ;;  %v2129_v25 = vor.u32 1.1754944e-38, %v2128_v56 }
 0x34a   : > { %v2021_v59 = vmul.f32 %v2019_v63, %v1968_v52  ;;  %v2119_v45 = vsub.f32 1.0, %v2118_v50  ;;  %v5940_v63 = vadd.f32 1.0, %v4458_v40  ;;  %vm2124_vm10 = vmor %vm2122_vm8, %vm2123_vm7  ;;  %v2014_v7 = vand.u32 2147483648, %v5899_v61 }
 0x34b   : > { %vm2127_vm11 = vcmp.eq.f32.partialorder %v2126_v43, 8.507059e+37  ;;  %vm1998_vm12 = vcmp.eq.f32.partialorder %v1997_v12, 8.507059e+37  ;;  %v2012_v10 = vand.u32 2147483647, %v5899_v61  ;;  %vm5957_vm14 = vmor %vm2008_vm13, %vm2009_vm9  ;;  %v2199_v11 = vunpack.c.l.bf16 %v4066_v35 }
 0x34c   : > { %v4460_v36 = vpop.eup %4459  ;;  %v2025_v55 = vadd.f32 %v2023_v51, %v2021_v59  ;;  %v2120_v24 = vmul.f32 %v4456_v23, %v2119_v45  ;;  %v2007_v51 = vadd.f32 %v5910_v33, %v2006_v20  ;;  %v2001_v40 = vsel %vm1998_vm12, %v2000_v14, %v1996_v16 }
 0x34d   : > { %v4462_v9 = vpop.eup %4461  ;;  %v2028_v30 = vsub.f32 %v5802_v22, %v4460_v36  ;;  %v2015_v61 = vor.u32 1.1754944e-38, %v2014_v7  ;;  %vm2013_vm15 = vcmp.eq.f32.partialorder %v2012_v10, 8.507059e+37  ;;  %v2143_v35 = vand.u32 2147483648, %v5940_v63 }
 0x34e   : > { %v2121_v27 = vadd.f32 %v4456_v23, %v2120_v24  ;;  %v5943_v53 = vadd.f32 1.0, %v4462_v9  ;;  %4465 = vtanh.f32 %v2025_v55  ;;  %v5953_v59 = vpop.eup %4463  ;;  %v2011_v12 = vsel %vm5957_vm14, %v5910_v33, %v2007_v51  ;;  %v2041_v33 = vpop.permute.xlu1 %2040 }
 0x34f   : > { %4467 = vrcp.f32 %v5940_v63  ;;  %v2030_v20 = vmul.f32 %v2028_v30, %v2001_v40  ;;  %v2166_v24 = vmul.f32 %v5953_v59, %v5920_v18  ;;  %v2016_v14 = vsel %vm2013_vm15, %v2015_v61, %v2011_v12  ;;  %v4068_v40 = vld [vmem:[%s4736_s27 + $0x74] sm:$0xf] }
 0x350   : > { %v2125_v50 = vsel %vm2124_vm10, %v4456_v23, %v2121_v27  ;;  %4469 = vrcp.f32 %v5943_v53  ;;  %v2195_v23 = vadd.f32 %v5781_v44, %v2100_v60  ;;  %v2038_v60 = vpop.permute.xlu0 %2037  ;;  %vm2043_vm1 = vcmp.eq.s32.totalorder %v2041_v33, 1  ;;  %v2102_v12 = vpop.f32.mrf.mxu3 }
 0x351   : > { %v2130_v52 = vsel %vm2127_vm11, %v2129_v25, %v2125_v50  ;;  %v2032_v25 = vadd.f32 %v4460_v36, %v2030_v20  ;;  %vm2042_vm0 = vcmp.eq.s32.totalorder %v2038_v60, 1  ;;  %v2167_v50 = vsub.f32 1.0, %v2166_v24 }
 0x352   : > { %v2197_v56 = vmul.f32 %v2195_v23, %v2130_v52  ;;  %vm2137_vm2 = vweird.f32 %v5940_v63  ;;  %v2141_v23 = vand.u32 2147483647, %v5940_v63  ;;  %v2200_v60 = vunpack.c.l.bf16 %v4068_v40 }
 0x353   : > { %v5979_v36 = vsel %vm2042_vm0, %v2032_v25, %v5802_v22  ;;  %v2046_v61 = vsel %vm2042_vm0, %v2032_v25, 0.0  ;;  %v2144_v22 = vor.u32 1.1754944e-38, %v2143_v35  ;;  %vm2171_vm6 = vweird.f32 %v5953_v59 }
 0x354   : > { %v4466_v43 = vpop.eup %4465  ;;  %v2201_v30 = vadd.f32 %v2199_v11, %v2197_v56  ;;  %vm2142_vm5 = vcmp.eq.f32.partialorder %v2141_v23, 8.507059e+37  ;;  %v2176_v25 = vand.u32 2147483648, %v5920_v18  ;;  %vm2170_vm7 = vweird.f32 %v5920_v18 }
 0x355   : > { %v4468_v55 = vpop.eup %4467  ;;  %v2029_v9 = vsub.f32 %v5806_v32, %v4466_v43  ;;  %vm2172_vm8 = vmor %vm2170_vm7, %vm2171_vm6  ;;  %vm2185_vm11 = vweird.f32 %v5943_v53 }
 0x356   : > { %v5968_v27 = vpop.eup %4469  ;;  %v2133_v16 = vmul.f32 %v4468_v55, %v5940_v63  ;;  %vm2138_vm3 = vweird.f32 %v4468_v55  ;;  %4471 = vtanh.f32 %v2201_v30 }
 0x357   : > { %v2031_v51 = vmul.f32 %v2029_v9, %v2016_v14  ;;  %v2181_v10 = vmul.f32 %v5968_v27, %v5943_v53  ;;  %v2168_v9 = vmul.f32 %v5953_v59, %v2167_v50  ;;  %vm2139_vm4 = vmor %vm2137_vm2, %vm2138_vm3  ;;  %vm2186_vm9 = vweird.f32 %v5968_v27 }
 0x358   : > { %v2134_v7 = vsub.f32 1.0, %v2133_v16  ;;  %vm2187_vm12 = vmor %vm2185_vm11, %vm2186_vm9 }
 0x359   : > { %v2033_v52 = vadd.f32 %v4466_v43, %v2031_v51  ;;  %v2182_v16 = vsub.f32 1.0, %v2181_v10  ;;  %v2169_v63 = vadd.f32 %v5953_v59, %v2168_v9  ;;  %v2215_v9 = vpop.permute.xlu2 %2214 }
 0x35a   : > { %v2135_v45 = vmul.f32 %v4468_v55, %v2134_v7  ;;  %v2174_v7 = vand.u32 2147483647, %v5920_v18  ;;  %v2189_v18 = vand.u32 2147483647, %v5943_v53  ;;  %vm2219_vm15 = vcmp.eq.s32.totalorder %v2215_v9, 1 }
 0x35b   : > { %v5983_v20 = vsel %vm2043_vm1, %v2033_v52, %v5806_v32  ;;  %v2047_v43 = vsel %vm2043_vm1, %v2033_v52, 0.0  ;;  %v2196_v32 = vadd.f32 %v5781_v44, %v2102_v12  ;;  %v2173_v50 = vsel %vm2172_vm8, %v5953_v59, %v2169_v63  ;;  %v6871_v63 = vld [vmem:[#allocation15_spill] sm:$0xff] }
 0x35c   : > { %v2136_v56 = vadd.f32 %v4468_v55, %v2135_v45  ;;  %v4237_v11 = vpack.c.bf16 %v2047_v43, %v2046_v61  ;;  %v2239_v24 = vpack.c.bf16 %v5983_v20, %v5979_v36  ;;  %v4472_v44 = vpop.eup %4471  ;;  %v2177_v52 = vor.u32 1.1754944e-38, %v2176_v25  ;;  %v6874_v25 = vld [vmem:[#allocation17_spill] sm:$0xff] }
 0x35d   : > { %v2205_v10 = vsub.f32 %v5846_v1, %v4472_v44  ;;  %v2191_v45 = vand.u32 2147483648, %v5943_v53  ;;  %vm2175_vm10 = vcmp.eq.f32.partialorder %v2174_v7, 8.507059e+37  ;;  %vm2190_vm13 = vcmp.eq.f32.partialorder %v2189_v18, 8.507059e+37  ;;  %v6876_v7 = vld [vmem:[#allocation18_spill] sm:$0xff] }
 0x35e   : > { %v2140_v14 = vsel %vm2139_vm4, %v4468_v55, %v2136_v56  ;;  %4289 = vst [vmem:[%s4726_s20 + $0x18] sm:$0xff] %v4237_v11   ;;  %2248 = vmatmul.bf16.vlgmr.msra.gmra.mxu0 %v2239_v24  ;;  %2262 = vmatmul.bf16.vlgmr.msra.gmra.mxu1 %v2239_v24  ;;  %v2183_v55 = vmul.f32 %v5968_v27, %v2182_v16  ;;  %v6882_v18 = vld [vmem:[#allocation22_spill] sm:$0xff] }
 0x35f   : > { %v2145_v33 = vsel %vm2142_vm5, %v2144_v22, %v2140_v14  ;;  %2276 = vmatmul.bf16.vlgmr.msra.gmra.mxu2 %v2239_v24  ;;  %2622 = vmatpush.bf16.msra.mxu0 %v4939_v34  ;;  %v2178_v23 = vsel %vm2175_vm10, %v2177_v52, %v2173_v50  ;;  %v2192_v61 = vor.u32 1.1754944e-38, %v2191_v45  ;;  %v2218_v24 = vpop.permute.xlu0 %2217  ;;  %v6877_v50 = vld [vmem:[#allocation19_spill] sm:$0xff]  ;;  %v6880_v52 = vld [vmem:[#allocation21_spill] sm:$0xff]  ;;  %v6881_v45 = vld [vmem:[#allocation42_spill] sm:$0xff] }
 0x360   : > { %v2198_v51 = vmul.f32 %v2196_v32, %v2145_v33  ;;  %2771 = vmatpush.bf16.msra.mxu1 %v4892_v57  ;;  %2785 = vmatpush.bf16.msra.mxu2 %v5008_v46  ;;  %v2184_v35 = vadd.f32 %v5968_v27, %v2183_v55  ;;  %v2207_v59 = vmul.f32 %v2205_v10, %v2178_v23  ;;  %vm2220_vm14 = vcmp.eq.s32.totalorder %v2218_v24, 1  ;;  %v6872_v55 = vld [vmem:[#allocation37_spill] sm:$0xff]  ;;  %v6878_v10 = vld [vmem:[#allocation40_spill] sm:$0xff]  ;;  %v6883_v23 = vld [vmem:[#allocation23_spill] sm:$0xff] }
 0x362   : > { %v2202_v30 = vadd.f32 %v2200_v60, %v2198_v51  ;;  %v2188_v40 = vsel %vm2187_vm12, %v5968_v27, %v2184_v35  ;;  %v2209_v53 = vadd.f32 %v4472_v44, %v2207_v59  ;;  %v6870_v51 = vld [vmem:[#allocation14_spill] sm:$0xff]  ;;  %v6873_v44 = vld [vmem:[#allocation16_spill] sm:$0xff] }
 0x363   : > { %2623 = vmatpush.bf16.msra.mxu0 %v4954_v49  ;;  %v2193_v56 = vsel %vm2190_vm13, %v2192_v61, %v2188_v40  ;;  %v6879_v35 = vld [vmem:[#allocation20_spill] sm:$0xff]  ;;  %v6885_v40 = vld [vmem:[#allocation25_spill] sm:$0xff]  ;;  %v4075_v61 = vld [vmem:[%s4731_s23 + $0x60] sm:$0xff] }
 0x364   : > { %4473 = vtanh.f32 %v2202_v30  ;;  %2772 = vmatpush.bf16.msra.mxu1 %v4901_v2  ;;  %2786 = vmatpush.bf16.msra.mxu2 %v5033_v5  ;;  %v2223_v27 = vsel %vm2219_vm15, %v2209_v53, 0.0  ;;  %v6025_v14 = vsel %vm2219_vm15, %v2209_v53, %v5846_v1  ;;  %v6868_v1 = vld [vmem:[#allocation13_spill] sm:$0xff]  ;;  %v6875_v30 = vld [vmem:[#allocation38_spill] sm:$0xff]  ;;  %v6884_v59 = vld [vmem:[#allocation24_spill] sm:$0xff] }
 0x367   : > { %2624 = vmatpush.bf16.msra.mxu0 %v4968_v3 }
 0x368   : > { %2773 = vmatpush.bf16.msra.mxu1 %v4911_v13  ;;  %2787 = vmatpush.bf16.msra.mxu2 %v5049_v31 }
 0x36a   : > { %v4474_v12 = vpop.eup %4473 }
 0x36b   : > { %v2206_v43 = vsub.f32 %v5849_v8, %v4474_v12  ;;  %2625 = vmatpush.bf16.msra.mxu0 %v4989_v29 }
 0x36c   : > { %2774 = vmatpush.bf16.msra.mxu1 %v4935_v28  ;;  %2788 = vmatpush.bf16.msra.mxu2 %v5063_v0 }
 0x36d   : > { %v2208_v11 = vmul.f32 %v2206_v43, %v2193_v56  ;;  %v2326_v43 = vrot.slane %v4075_v61, 4  ;;  %v2282_v56 = vunpack.c.l.bf16 %v4075_v61 }
 0x36f   : > { %v2210_v16 = vadd.f32 %v4474_v12, %v2208_v11  ;;  %2626 = vmatpush.bf16.msra.mxu0 %v5017_v54  ;;  %v6886_v12 = vld [vmem:[#allocation27_spill] sm:$0xff]  ;;  %v2330_v53 = vunpack.c.l.bf16 %v2326_v43  ;;  %v4077_v11 = vld [vmem:[%s4731_s23 + $0x6c] sm:$0xff] }
 0x370   : > { %2775 = vmatpush.bf16.msra.mxu1 %v4949_v41  ;;  %2789 = vmatpush.bf16.msra.mxu2 %v5077_v37 }
 0x371   : > { %v2224_v22 = vsel %vm2220_vm14, %v2210_v16, 0.0  ;;  %v6028_v32 = vsel %vm2220_vm14, %v2210_v16, %v5849_v8  ;;  %v6869_v8 = vld [vmem:[#allocation34_spill] sm:$0xff] }
 0x372   : > { %v4242_v60 = vpack.c.bf16 %v2224_v22, %v2223_v27  ;;  %v2416_v33 = vpack.c.bf16 %v6028_v32, %v6025_v14  ;;  %v2327_v22 = vrot.slane %v4077_v11, 4 }
 0x373   : > { %2627 = vmatpush.bf16.msra.mxu0 %v5042_v17 }
 0x374   : > { %4290 = vst [vmem:[%s4741_s12 + $0x20] sm:$0xff] %v4242_v60   ;;  %2425 = vmatmul.bf16.vlgmr.msra.gmra.mxu3 %v2416_v33  ;;  %2439 = vmatmul.bf16.vlgmr.msrb.gmra.mxu0 %v2416_v33 }
 0x375   : > { %2453 = vmatmul.bf16.vlgmr.msrb.gmra.mxu1 %v2416_v33  ;;  %2799 = vmatpush.bf16.msra.mxu3 %v5011_v48 }
 0x376   : > { %2776 = vmatpush.bf16.msra.mxu1 %v4964_v58  ;;  %2790 = vmatpush.bf16.msra.mxu2 %v5091_v4 }
 0x377   : > { %2628 = vmatpush.bf16.msra.mxu0 %v5055_v47 }
 0x379   : > { %2800 = vmatpush.bf16.msra.mxu3 %v5036_v6 }
 0x37a   : > { %2777 = vmatpush.bf16.msra.mxu1 %v4982_v15  ;;  %2791 = vmatpush.bf16.msra.mxu2 %v6813_v26 }
 0x37b   : > { %2629 = vmatpush.bf16.msra.mxu0 %v6814_v39 }
 0x37d   : > { %2801 = vmatpush.bf16.msra.mxu3 %v5052_v38 }
 0x37e   : > { %2778 = vmatpush.bf16.msra.mxu1 %v6816_v62  ;;  %2792 = vmatpush.bf16.msra.mxu2 %v6842_v19 }
 0x37f   : > { %2948 = vmatpush.bf16.msrb.mxu0 %v6818_v21 }
 0x381   : > { %2802 = vmatpush.bf16.msra.mxu3 %v6869_v8 }
 0x382   : > { %2962 = vmatpush.bf16.msrb.mxu1 %v6843_v42 }
 0x383   : > { %2949 = vmatpush.bf16.msrb.mxu0 %v6868_v1 }
 0x385   : > { %2803 = vmatpush.bf16.msra.mxu3 %v6872_v55 }
 0x386   : > { %2963 = vmatpush.bf16.msrb.mxu1 %v6870_v51 }
 0x387   : > { %2950 = vmatpush.bf16.msrb.mxu0 %v6871_v63 }
 0x389   : > { %2804 = vmatpush.bf16.msra.mxu3 %v6875_v30 }
 0x38a   : > { %2964 = vmatpush.bf16.msrb.mxu1 %v6873_v44 }
 0x38b   : > { %2951 = vmatpush.bf16.msrb.mxu0 %v6874_v25 }
 0x38d   : > { %2805 = vmatpush.bf16.msra.mxu3 %v6878_v10 }
 0x38e   : > { %2965 = vmatpush.bf16.msrb.mxu1 %v6876_v7 }
 0x38f   : > { %2952 = vmatpush.bf16.msrb.mxu0 %v6877_v50 }
 0x391   : > { %2806 = vmatpush.bf16.msra.mxu3 %v6881_v45  ;;  %v2283_v45 = vunpack.c.l.bf16 %v4077_v11 }
 0x392   : > { %2966 = vmatpush.bf16.msrb.mxu1 %v6879_v35 }
 0x393   : > { %2953 = vmatpush.bf16.msrb.mxu0 %v6880_v52 }
 0x396   : > { %2967 = vmatpush.bf16.msrb.mxu1 %v6882_v18 }
 0x397   : > { %2954 = vmatpush.bf16.msrb.mxu0 %v6883_v23 }
 0x39a   : > { %2968 = vmatpush.bf16.msrb.mxu1 %v6884_v59  ;;  %v2331_v59 = vunpack.c.l.bf16 %v2327_v22 }
 0x39b   : > { %2955 = vmatpush.bf16.msrb.mxu0 %v6885_v40 }
 0x39e   : > { %2969 = vmatpush.bf16.msrb.mxu1 %v6886_v12 }
 0x3db   : > { %v2249_v24 = vpop.f32.mrf.mxu0  ;;  %v2263_v9 = vpop.f32.mrf.mxu1 }
 0x3dc   : > { %v2284_v16 = vadd.f32 %v2282_v56, %v2249_v24  ;;  %v2332_v27 = vadd.f32 %v2330_v53, %v2263_v9  ;;  %v4085_v53 = vld [vmem:[%s4736_s27 + $0x48] sm:$0xff] }
 0x3de   : > { %v4079_v60 = vmul.f32 -1.442695, %v2284_v16  ;;  %v4081_v33 = vmul.f32 -1.442695, %v2332_v27  ;;  %v4076_v27 = vld [vmem:[%s4731_s23 + $0x68] sm:$0xf] }
 0x3e0   : > { %4475 = vpow2.f32 %v4079_v60  ;;  %v2459_v60 = vunpack.c.l.bf16 %v4085_v53 }
 0x3e1   : > { %4477 = vpow2.f32 %v4081_v33 }
 0x3e3   : > { %v2251_v40 = vpop.f32.mrf.mxu0  ;;  %v2265_v23 = vpop.f32.mrf.mxu1 }
 0x3e4   : > { %v2285_v12 = vadd.f32 %v2283_v45, %v2251_v40  ;;  %v2333_v10 = vadd.f32 %v2331_v59, %v2265_v23  ;;  %v2503_v45 = vrot.slane %v4085_v53, 4  ;;  %v2277_v23 = vpop.f32.mrf.mxu2  ;;  %v6075_v40 = vld [vmem:[%s4736_s27 + $0x54] sm:$0xff]  ;;  %v6090_v53 = vld [vmem:[%s6639_s5] ss:$0 sm:$0xff] }
 0x3e6   : > { %v4476_v18 = vpop.eup %4475  ;;  %v4080_v61 = vmul.f32 -1.442695, %v2285_v12  ;;  %v4082_v30 = vmul.f32 -1.442695, %v2333_v10  ;;  %v2507_v33 = vunpack.c.l.bf16 %v2503_v45  ;;  %v2372_v45 = vadd.f32 %v6090_v53, %v2277_v23 }
 0x3e7   : > { %v4478_v43 = vpop.eup %4477  ;;  %v2292_v52 = vadd.f32 1.0, %v4476_v18 }
 0x3e8   : > { %4479 = vpow2.f32 %v4080_v61  ;;  %v6068_v56 = vadd.f32 1.0, %v4478_v43  ;;  %v2504_v61 = vrot.slane %v6075_v40, 4 }
 0x3e9   : > { %4481 = vrcp.f32 %v2292_v52  ;;  %v2305_v22 = vand.u32 2147483648, %v2292_v52  ;;  %vm2299_vm1 = vweird.f32 %v2292_v52 }
 0x3ea   : > { %4483 = vpow2.f32 %v4082_v30  ;;  %v2508_v25 = vunpack.c.l.bf16 %v2504_v61  ;;  %vm2347_vm9 = vweird.f32 %v6068_v56 }
 0x3eb   : > { %4485 = vrcp.f32 %v6068_v56  ;;  %v2306_v55 = vor.u32 1.1754944e-38, %v2305_v22  ;;  %v2460_v22 = vunpack.c.l.bf16 %v6075_v40 }
 0x3ec   : > { %v2279_v23 = vpop.f32.mrf.mxu2 }
 0x3ed   : > { %v2373_v61 = vadd.f32 %v6090_v53, %v2279_v23 }
 0x3ee   : > { %v4480_v11 = vpop.eup %4479 }
 0x3ef   : > { %v4482_v24 = vpop.eup %4481  ;;  %v6072_v9 = vadd.f32 1.0, %v4480_v11  ;;  %v2303_v11 = vand.u32 2147483647, %v2292_v52 }
 0x3f0   : > { %v2295_v59 = vmul.f32 %v4482_v24, %v2292_v52  ;;  %v4484_v18 = vpop.eup %4483  ;;  %vm2300_vm0 = vweird.f32 %v4482_v24 }
 0x3f1   : > { %4487 = vrcp.f32 %v6072_v9  ;;  %v2440_v10 = vpop.f32.mrf.mxu0  ;;  %v6078_v16 = vadd.f32 1.0, %v4484_v18  ;;  %v6080_v30 = vpop.eup %4485  ;;  %vm2301_vm2 = vmor %vm2299_vm1, %vm2300_vm0  ;;  %vm2304_vm3 = vcmp.eq.f32.partialorder %v2303_v11, 8.507059e+37  ;;  %vm2314_vm5 = vweird.f32 %v6072_v9 }
 0x3f2   : > { %v2296_v12 = vsub.f32 1.0, %v2295_v59  ;;  %v2343_v35 = vmul.f32 %v6080_v30, %v6068_v56  ;;  %v2376_v59 = vunpack.c.l.bf16 %v4076_v27  ;;  %v2509_v7 = vadd.f32 %v2507_v33, %v2440_v10 }
 0x3f3   : > { %4489 = vrcp.f32 %v6078_v16  ;;  %v2318_v27 = vand.u32 2147483647, %v6072_v9  ;;  %vm2348_vm8 = vweird.f32 %v6080_v30  ;;  %vm2362_vm13 = vweird.f32 %v6078_v16 }
 0x3f4   : > { %v2297_v43 = vmul.f32 %v4482_v24, %v2296_v12  ;;  %v2344_v51 = vsub.f32 1.0, %v2343_v35  ;;  %vm6112_vm10 = vmor %vm2347_vm9, %vm2348_vm8 }
 0x3f5   : > { %vm2319_vm7 = vcmp.eq.f32.partialorder %v2318_v27, 8.507059e+37 }
 0x3f6   : > { %v2298_v50 = vadd.f32 %v4482_v24, %v2297_v43  ;;  %v2345_v35 = vmul.f32 %v6080_v30, %v2344_v51 }
 0x3f7   : > { %v4488_v18 = vpop.eup %4487  ;;  %v2426_v12 = vpop.f32.mrf.mxu3 }
 0x3f8   : > { %v2302_v8 = vsel %vm2301_vm2, %v4482_v24, %v2298_v50  ;;  %v2310_v44 = vmul.f32 %v4488_v18, %v6072_v9  ;;  %v2461_v43 = vadd.f32 %v2459_v60, %v2426_v12  ;;  %vm2315_vm4 = vweird.f32 %v4488_v18 }
 0x3f9   : > { %v2307_v52 = vsel %vm2304_vm3, %v2306_v55, %v2302_v8  ;;  %v2442_v63 = vpop.f32.mrf.mxu0  ;;  %v6096_v38 = vpop.eup %4489  ;;  %v2320_v24 = vand.u32 2147483648, %v6072_v9  ;;  %v4091_v60 = vmul.f32 -1.442695, %v2509_v7  ;;  %v4078_v55 = vld [vmem:[%s4731_s23 + $0x74] sm:$0xf]  ;;  %vm2316_vm6 = vmor %vm2314_vm5, %vm2315_vm4 }
 0x3fa   : > { %v2374_v1 = vmul.f32 %v2372_v45, %v2307_v52  ;;  %v2311_v6 = vsub.f32 1.0, %v2310_v44  ;;  %v4089_v10 = vmul.f32 -1.442695, %v2461_v43  ;;  %v2358_v50 = vmul.f32 %v6096_v38, %v6078_v16 }
 0x3fb   : > { %v2510_v40 = vadd.f32 %v2508_v25, %v2442_v63  ;;  %v2321_v45 = vor.u32 1.1754944e-38, %v2320_v24  ;;  %v2377_v12 = vunpack.c.l.bf16 %v4078_v55  ;;  %v2346_v25 = vadd.f32 %v6080_v30, %v2345_v35 }
 0x3fc   : > { %v2378_v8 = vadd.f32 %v2376_v59, %v2374_v1  ;;  %v2312_v33 = vmul.f32 %v4488_v18, %v2311_v6  ;;  %4491 = vpow2.f32 %v4089_v10  ;;  %v2359_v44 = vsub.f32 1.0, %v2358_v50 }
 0x3fd   : > { %v4092_v6 = vmul.f32 -1.442695, %v2510_v40  ;;  %v2351_v50 = vand.u32 2147483647, %v6068_v56  ;;  %vm2363_vm11 = vweird.f32 %v6096_v38  ;;  %v2368_v40 = vand.u32 2147483648, %v6078_v16 }
 0x3fe   : > { %4493 = vtanh.f32 %v2378_v8  ;;  %v2313_v11 = vadd.f32 %v4488_v18, %v2312_v33  ;;  %v2360_v52 = vmul.f32 %v6096_v38, %v2359_v44  ;;  %vm2364_vm14 = vmor %vm2362_vm13, %vm2363_vm11 }
 0x3ff   : > { %v2428_v43 = vpop.f32.mrf.mxu3  ;;  %4495 = vpow2.f32 %v4091_v60  ;;  %v2350_v60 = vsel %vm6112_vm10, %v6080_v30, %v2346_v25  ;;  %vm2352_vm12 = vcmp.eq.f32.partialorder %v2351_v50, 8.507059e+37 }
 0x400   : > { %v2317_v7 = vsel %vm2316_vm6, %v4488_v18, %v2313_v11  ;;  %v2462_v1 = vadd.f32 %v2460_v22, %v2428_v43  ;;  %v2353_v18 = vand.u32 2147483648, %v6068_v56  ;;  %4497 = vpow2.f32 %v4092_v6 }
 0x401   : > { %v2322_v59 = vsel %vm2319_vm7, %v2321_v45, %v2317_v7  ;;  %v2361_v55 = vadd.f32 %v6096_v38, %v2360_v52  ;;  %v2366_v56 = vand.u32 2147483647, %v6078_v16  ;;  %v2369_v43 = vor.u32 1.1754944e-38, %v2368_v40 }
 0x402   : > { %v4492_v63 = vpop.eup %4491  ;;  %v2375_v51 = vmul.f32 %v2373_v61, %v2322_v59  ;;  %v4090_v23 = vmul.f32 -1.442695, %v2462_v1  ;;  %v2354_v33 = vor.u32 1.1754944e-38, %v2353_v18  ;;  %v2392_v18 = vpop.permute.xlu1 %2391 }
 0x403   : > { %v6108_v9 = vadd.f32 1.0, %v4492_v63  ;;  %v2365_v45 = vsel %vm2364_vm14, %v6096_v38, %v2361_v55  ;;  %vm2367_vm15 = vcmp.eq.f32.partialorder %v2366_v56, 8.507059e+37  ;;  %vm2396_vm1 = vcmp.eq.s32.totalorder %v2392_v18, 1  ;;  %v6146_v55 = vld [vmem:[%s6640_s6] ss:$0 sm:$0xff] }
 0x404   : > { %v4494_v27 = vpop.eup %4493  ;;  %v2379_v10 = vadd.f32 %v2377_v12, %v2375_v51  ;;  %v2355_v30 = vsel %vm2352_vm12, %v2354_v33, %v2350_v60  ;;  %v2370_v59 = vsel %vm2367_vm15, %v2369_v43, %v2365_v45  ;;  %v4086_v60 = vld [vmem:[%s4736_s27 + $0x50] sm:$0xf] }
 0x405   : > { %4499 = vrcp.f32 %v6108_v9  ;;  %v4496_v24 = vpop.eup %4495  ;;  %v2382_v8 = vsub.f32 %v5979_v36, %v4494_v27  ;;  %v2482_v25 = vand.u32 2147483648, %v6108_v9  ;;  %v2480_v50 = vand.u32 2147483647, %v6108_v9 }
 0x406   : > { %4501 = vtanh.f32 %v2379_v10  ;;  %v6127_v61 = vadd.f32 1.0, %v4496_v24  ;;  %v4498_v35 = vpop.eup %4497  ;;  %v2395_v10 = vpop.permute.xlu2 %2394  ;;  %vm2476_vm3 = vweird.f32 %v6108_v9 }
 0x407   : > { %4503 = vpow2.f32 %v4090_v23  ;;  %v2384_v44 = vmul.f32 %v2382_v8, %v2355_v30  ;;  %v6133_v16 = vadd.f32 1.0, %v4498_v35  ;;  %v2454_v23 = vpop.f32.mrf.mxu1  ;;  %vm2397_vm2 = vcmp.eq.s32.totalorder %v2395_v10, 1  ;;  %v4088_v10 = vld [vmem:[%s4736_s27 + $0x5c] sm:$0xf] }
 0x408   : > { %4505 = vrcp.f32 %v6127_v61  ;;  %v2549_v33 = vadd.f32 %v6146_v55, %v2454_v23  ;;  %vm2481_vm5 = vcmp.eq.f32.partialorder %v2480_v50, 8.507059e+37  ;;  %vm2524_vm11 = vweird.f32 %v6127_v61 }
 0x409   : > { %v2386_v38 = vadd.f32 %v4494_v27, %v2384_v44  ;;  %v2483_v27 = vor.u32 1.1754944e-38, %v2482_v25  ;;  %vm2539_vm15 = vweird.f32 %v6133_v16 }
 0x40b   : > { %v4500_v11 = vpop.eup %4499  ;;  %v2400_v56 = vsel %vm2396_vm1, %v2386_v38, 0.0  ;;  %v6153_v30 = vsel %vm2396_vm1, %v2386_v38, %v5979_v36 }
 0x40c   : > { %v4502_v12 = vpop.eup %4501  ;;  %v2472_v7 = vmul.f32 %v4500_v11, %v6108_v9  ;;  %vm2477_vm0 = vweird.f32 %v4500_v11 }
 0x40d   : > { %v4504_v1 = vpop.eup %4503  ;;  %v2383_v6 = vsub.f32 %v5983_v20, %v4502_v12  ;;  %vm2478_vm4 = vmor %vm2476_vm3, %vm2477_vm0 }
 0x40e   : > { %v2473_v63 = vsub.f32 1.0, %v2472_v7  ;;  %v6136_v51 = vadd.f32 1.0, %v4504_v1  ;;  %v6149_v40 = vpop.eup %4505  ;;  %v2553_v7 = vunpack.c.l.bf16 %v4086_v60 }
 0x40f   : > { %v2385_v52 = vmul.f32 %v2383_v6, %v2370_v59  ;;  %v2520_v6 = vmul.f32 %v6149_v40, %v6127_v61  ;;  %vm2525_vm10 = vweird.f32 %v6149_v40 }
 0x410   : > { %v2474_v22 = vmul.f32 %v4500_v11, %v2473_v63  ;;  %4507 = vrcp.f32 %v6136_v51  ;;  %v2495_v18 = vand.u32 2147483647, %v6136_v51  ;;  %vm2491_vm7 = vweird.f32 %v6136_v51  ;;  %vm2526_vm12 = vmor %vm2524_vm11, %vm2525_vm10 }
 0x411   : > { %v2387_v24 = vadd.f32 %v4502_v12, %v2385_v52  ;;  %4509 = vrcp.f32 %v6133_v16  ;;  %v2521_v25 = vsub.f32 1.0, %v2520_v6  ;;  %v2497_v52 = vand.u32 2147483648, %v6136_v51 }
 0x412   : > { %v2475_v8 = vadd.f32 %v4500_v11, %v2474_v22  ;;  %v2456_v22 = vpop.f32.mrf.mxu1  ;;  %vm2496_vm9 = vcmp.eq.f32.partialorder %v2495_v18, 8.507059e+37 }
 0x413   : > { %v2401_v35 = vsel %vm2397_vm2, %v2387_v24, 0.0  ;;  %v6156_v9 = vsel %vm2397_vm2, %v2387_v24, %v5983_v20  ;;  %v2522_v24 = vmul.f32 %v6149_v40, %v2521_v25 }
 0x414   : > { %v4247_v44 = vpack.c.bf16 %v2401_v35, %v2400_v56  ;;  %v2479_v45 = vsel %vm2478_vm4, %v4500_v11, %v2475_v8  ;;  %v2593_v12 = vpack.c.bf16 %v6156_v9, %v6153_v30  ;;  %v2498_v8 = vor.u32 1.1754944e-38, %v2497_v52 }
 0x415   : > { %v2484_v43 = vsel %vm2481_vm5, %v2483_v27, %v2479_v45  ;;  %v2554_v56 = vunpack.c.l.bf16 %v4088_v10 }
 0x416   : > { %v4508_v1 = vpop.eup %4507  ;;  %4291 = vst [vmem:[%s4726_s20 + $0x20] sm:$0xff] %v4247_v44   ;;  %v2551_v59 = vmul.f32 %v2549_v33, %v2484_v43  ;;  %2602 = vmatmul.bf16.vlgmr.msrb.gmra.mxu2 %v2593_v12  ;;  %2616 = vmatmul.bf16.vlgmr.msrb.gmra.mxu3 %v2593_v12  ;;  %v2550_v33 = vadd.f32 %v6146_v55, %v2456_v22  ;;  %v2530_v43 = vand.u32 2147483648, %v6127_v61 }
 0x417   : > { %v6163_v36 = vpop.eup %4509  ;;  %v2487_v20 = vmul.f32 %v4508_v1, %v6136_v51  ;;  %2630 = vmatmul.bf16.vlgmr.msra.gmra.mxu0 %v2593_v12  ;;  %2976 = vmatpush.bf16.msrb.mxu2 %v4939_v34  ;;  %vm2492_vm6 = vweird.f32 %v4508_v1  ;;  %v2523_v51 = vadd.f32 %v6149_v40, %v2522_v24  ;;  %v2572_v24 = vpop.permute.xlu1 %2571 }
 0x418   : > { %3125 = vmatpush.bf16.msrb.mxu3 %v4892_v57  ;;  %3139 = vmatpush.bf16.msra.mxu0 %v5008_v46  ;;  %v2555_v11 = vadd.f32 %v2553_v7, %v2551_v59  ;;  %v2535_v38 = vmul.f32 %v6163_v36, %v6133_v16  ;;  %vm2493_vm8 = vmor %vm2491_vm7, %vm2492_vm6  ;;  %vm2540_vm13 = vweird.f32 %v6163_v36  ;;  %vm2574_vm3 = vcmp.eq.s32.totalorder %v2572_v24, 1 }
 0x419   : > { %v2488_v63 = vsub.f32 1.0, %v2487_v20  ;;  %v2527_v6 = vsel %vm2526_vm12, %v6149_v40, %v2523_v51  ;;  %vm2541_vm0 = vmor %vm2539_vm15, %vm2540_vm13  ;;  %v6892_v51 = vld [vmem:[#allocation33_spill] sm:$0xff] }
 0x41a   : > { %4511 = vtanh.f32 %v2555_v11  ;;  %v2536_v60 = vsub.f32 1.0, %v2535_v38  ;;  %v2531_v11 = vor.u32 1.1754944e-38, %v2530_v43  ;;  %v6895_v43 = vld [vmem:[#allocation34_spill] sm:$0xff] }
 0x41b   : > { %v2489_v23 = vmul.f32 %v4508_v1, %v2488_v63  ;;  %2977 = vmatpush.bf16.msrb.mxu2 %v4954_v49  ;;  %v2545_v63 = vand.u32 2147483648, %v6133_v16 }
 0x41c   : > { %3126 = vmatpush.bf16.msrb.mxu3 %v4901_v2  ;;  %3140 = vmatpush.bf16.msra.mxu0 %v5033_v5  ;;  %v2537_v45 = vmul.f32 %v6163_v36, %v2536_v60 }
 0x41d   : > { %v2490_v50 = vadd.f32 %v4508_v1, %v2489_v23  ;;  %v2546_v23 = vor.u32 1.1754944e-38, %v2545_v63  ;;  %v6904_v63 = vld [vmem:[#allocation40_spill] sm:$0xff] }
 0x41e   : > { %v2538_v20 = vadd.f32 %v6163_v36, %v2537_v45  ;;  %v6893_v45 = vld [vmem:[#allocation15_spill] sm:$0xff] }
 0x41f   : > { %v2494_v27 = vsel %vm2493_vm8, %v4508_v1, %v2490_v50  ;;  %2978 = vmatpush.bf16.msrb.mxu2 %v4968_v3  ;;  %v2528_v1 = vand.u32 2147483647, %v6127_v61  ;;  %v2543_v61 = vand.u32 2147483647, %v6133_v16  ;;  %v2569_v50 = vpop.permute.xlu0 %2568 }
 0x420   : > { %v2499_v35 = vsel %vm2496_vm9, %v2498_v8, %v2494_v27  ;;  %3127 = vmatpush.bf16.msrb.mxu3 %v4911_v13  ;;  %3141 = vmatpush.bf16.msra.mxu0 %v5049_v31  ;;  %v4512_v12 = vpop.eup %4511  ;;  %v2542_v38 = vsel %vm2541_vm0, %v6163_v36, %v2538_v20  ;;  %vm2573_vm2 = vcmp.eq.s32.totalorder %v2569_v50, 1  ;;  %v6902_v20 = vld [vmem:[#allocation21_spill] sm:$0xff] }
 0x421   : > { %v2552_v44 = vmul.f32 %v2550_v33, %v2499_v35  ;;  %v2559_v59 = vsub.f32 %v6025_v14, %v4512_v12  ;;  %vm2529_vm14 = vcmp.eq.f32.partialorder %v2528_v1, 8.507059e+37  ;;  %vm2544_vm1 = vcmp.eq.f32.partialorder %v2543_v61, 8.507059e+37  ;;  %v6899_v1 = vld [vmem:[#allocation19_spill] sm:$0xff] }
 0x422   : > { %v2532_v40 = vsel %vm2529_vm14, %v2531_v11, %v2527_v6  ;;  %v2547_v16 = vsel %vm2544_vm1, %v2546_v23, %v2542_v38  ;;  %v6900_v6 = vld [vmem:[#allocation20_spill] sm:$0xff]  ;;  %v6903_v11 = vld [vmem:[#allocation22_spill] sm:$0xff]  ;;  %v6905_v61 = vld [vmem:[#allocation23_spill] sm:$0xff] }
 0x423   : > { %v2556_v7 = vadd.f32 %v2554_v56, %v2552_v44  ;;  %2979 = vmatpush.bf16.msrb.mxu2 %v4989_v29  ;;  %v2561_v25 = vmul.f32 %v2559_v59, %v2532_v40  ;;  %v6891_v44 = vld [vmem:[#allocation14_spill] sm:$0xff]  ;;  %v6906_v40 = vld [vmem:[#allocation24_spill] sm:$0xff]  ;;  %v6908_v38 = vld [vmem:[#allocation25_spill] sm:$0xff] }
 0x424   : > { %3128 = vmatpush.bf16.msrb.mxu3 %v4935_v28  ;;  %3142 = vmatpush.bf16.msra.mxu0 %v5063_v0  ;;  %v6901_v59 = vld [vmem:[#allocation38_spill] sm:$0xff] }
 0x425   : > { %4513 = vtanh.f32 %v2556_v7  ;;  %v2563_v10 = vadd.f32 %v4512_v12, %v2561_v25  ;;  %v6894_v12 = vld [vmem:[#allocation16_spill] sm:$0xff]  ;;  %v6896_v7 = vld [vmem:[#allocation17_spill] sm:$0xff]  ;;  %v6907_v25 = vld [vmem:[#allocation42_spill] sm:$0xff] }
 0x426   : > { %v4095_v23 = vld [vmem:[%s4731_s23 + $0x78] sm:$0xff] }
 0x427   : > { %2980 = vmatpush.bf16.msrb.mxu2 %v5017_v54  ;;  %v2577_v60 = vsel %vm2573_vm2, %v2563_v10, 0.0  ;;  %v6211_v27 = vsel %vm2573_vm2, %v2563_v10, %v6025_v14  ;;  %v6889_v14 = vld [vmem:[#allocation31_spill] sm:$0xff] }
 0x428   : > { %3129 = vmatpush.bf16.msrb.mxu3 %v4949_v41  ;;  %3143 = vmatpush.bf16.msra.mxu0 %v5077_v37 }
 0x42b   : > { %v4514_v52 = vpop.eup %4513  ;;  %2981 = vmatpush.bf16.msrb.mxu2 %v5042_v17 }
 0x42c   : > { %v2560_v18 = vsub.f32 %v6028_v32, %v4514_v52  ;;  %3130 = vmatpush.bf16.msrb.mxu3 %v4964_v58  ;;  %3144 = vmatpush.bf16.msra.mxu0 %v5091_v4 }
 0x42e   : > { %v2562_v22 = vmul.f32 %v2560_v18, %v2547_v16  ;;  %v2680_v18 = vrot.slane %v4095_v23, 4  ;;  %v2636_v16 = vunpack.c.l.bf16 %v4095_v23 }
 0x42f   : > { %2982 = vmatpush.bf16.msrb.mxu2 %v5055_v47 }
 0x430   : > { %v2564_v36 = vadd.f32 %v4514_v52, %v2562_v22  ;;  %3131 = vmatpush.bf16.msrb.mxu3 %v4982_v15  ;;  %3145 = vmatpush.bf16.msra.mxu0 %v6813_v26  ;;  %v6909_v52 = vld [vmem:[#allocation27_spill] sm:$0xff]  ;;  %v2684_v10 = vunpack.c.l.bf16 %v2680_v18  ;;  %v4105_v18 = vld [vmem:[%s4736_s27 + $0x30] sm:$0xff] }
 0x431   : > { %v4097_v22 = vld [vmem:[%s4731_s23 + $0x84] sm:$0xff] }
 0x432   : > { %v2578_v8 = vsel %vm2574_vm3, %v2564_v36, 0.0  ;;  %v6214_v33 = vsel %vm2574_vm3, %v2564_v36, %v6028_v32  ;;  %v6890_v32 = vld [vmem:[#allocation13_spill] sm:$0xff] }
 0x433   : > { %v4252_v56 = vpack.c.bf16 %v2578_v8, %v2577_v60  ;;  %v2770_v35 = vpack.c.bf16 %v6214_v33, %v6211_v27  ;;  %2983 = vmatpush.bf16.msrb.mxu2 %v6814_v39  ;;  %v2681_v8 = vrot.slane %v4097_v22, 4 }
 0x434   : > { %3132 = vmatpush.bf16.msrb.mxu3 %v6816_v62  ;;  %3146 = vmatpush.bf16.msra.mxu0 %v6842_v19 }
 0x435   : > { %4292 = vst [vmem:[%s4741_s12 + $0x18] sm:$0xff] %v4252_v56   ;;  %2779 = vmatmul.bf16.vlgmr.msra.gmra.mxu1 %v2770_v35  ;;  %2793 = vmatmul.bf16.vlgmr.msra.gmra.mxu2 %v2770_v35 }
 0x436   : > { %2807 = vmatmul.bf16.vlgmr.msra.gmra.mxu3 %v2770_v35  ;;  %3153 = vmatpush.bf16.msra.mxu1 %v5011_v48 }
 0x437   : > { %3302 = vmatpush.bf16.msra.mxu2 %v6818_v21  ;;  %v6897_v21 = vld [vmem:[#allocation18_spill] sm:$0xff] }
 0x438   : > { %3316 = vmatpush.bf16.msra.mxu3 %v6843_v42  ;;  %v6898_v42 = vld [vmem:[#allocation37_spill] sm:$0xff] }
 0x43a   : > { %3154 = vmatpush.bf16.msra.mxu1 %v6889_v14 }
 0x43b   : > { %3303 = vmatpush.bf16.msra.mxu2 %v6890_v32  ;;  %v2637_v32 = vunpack.c.l.bf16 %v4097_v22 }
 0x43c   : > { %3317 = vmatpush.bf16.msra.mxu3 %v6891_v44  ;;  %v2685_v44 = vunpack.c.l.bf16 %v2681_v8  ;;  %v2857_v8 = vrot.slane %v4105_v18, 4 }
 0x43e   : > { %3155 = vmatpush.bf16.msra.mxu1 %v6892_v51 }
 0x43f   : > { %3304 = vmatpush.bf16.msra.mxu2 %v6893_v45 }
 0x440   : > { %3318 = vmatpush.bf16.msra.mxu3 %v6894_v12 }
 0x442   : > { %3156 = vmatpush.bf16.msra.mxu1 %v6895_v43 }
 0x443   : > { %3305 = vmatpush.bf16.msra.mxu2 %v6896_v7 }
 0x444   : > { %3319 = vmatpush.bf16.msra.mxu3 %v6897_v21 }
 0x446   : > { %3157 = vmatpush.bf16.msra.mxu1 %v6898_v42 }
 0x447   : > { %3306 = vmatpush.bf16.msra.mxu2 %v6899_v1 }
 0x448   : > { %3320 = vmatpush.bf16.msra.mxu3 %v6900_v6 }
 0x44a   : > { %3158 = vmatpush.bf16.msra.mxu1 %v6901_v59 }
 0x44b   : > { %3307 = vmatpush.bf16.msra.mxu2 %v6902_v20 }
 0x44c   : > { %3321 = vmatpush.bf16.msra.mxu3 %v6903_v11 }
 0x44e   : > { %3159 = vmatpush.bf16.msra.mxu1 %v6904_v63  ;;  %v4098_v63 = vld [vmem:[%s4731_s23 + $0x8c] sm:$0xf] }
 0x44f   : > { %3308 = vmatpush.bf16.msra.mxu2 %v6905_v61  ;;  %v2731_v42 = vunpack.c.l.bf16 %v4098_v63 }
 0x450   : > { %3322 = vmatpush.bf16.msra.mxu3 %v6906_v40 }
 0x452   : > { %3160 = vmatpush.bf16.msra.mxu1 %v6907_v25 }
 0x453   : > { %3309 = vmatpush.bf16.msra.mxu2 %v6908_v38 }
 0x454   : > { %3323 = vmatpush.bf16.msra.mxu3 %v6909_v52 }
 0x494   : > { %v2631_v22 = vpop.f32.mrf.mxu0 }
 0x499   : > { %v2603_v50 = vpop.f32.mrf.mxu2  ;;  %v2617_v24 = vpop.f32.mrf.mxu3 }
 0x49a   : > { %v2638_v36 = vadd.f32 %v2636_v16, %v2603_v50  ;;  %v2686_v60 = vadd.f32 %v2684_v10, %v2617_v24 }
 0x49c   : > { %v4099_v56 = vmul.f32 -1.442695, %v2638_v36  ;;  %v4101_v35 = vmul.f32 -1.442695, %v2686_v60  ;;  %v2813_v36 = vunpack.c.l.bf16 %v4105_v18 }
 0x49e   : > { %4515 = vpow2.f32 %v4099_v56  ;;  %v4096_v56 = vld [vmem:[%s4731_s23 + $0x80] sm:$0xf] }
 0x49f   : > { %4517 = vpow2.f32 %v4101_v35 }
 0x4a1   : > { %v2605_v45 = vpop.f32.mrf.mxu2  ;;  %v2619_v12 = vpop.f32.mrf.mxu3 }
 0x4a2   : > { %v2639_v7 = vadd.f32 %v2637_v32, %v2605_v45  ;;  %v2687_v21 = vadd.f32 %v2685_v44, %v2619_v12 }
 0x4a4   : > { %v4516_v1 = vpop.eup %4515  ;;  %v4100_v6 = vmul.f32 -1.442695, %v2639_v7  ;;  %v4102_v11 = vmul.f32 -1.442695, %v2687_v21  ;;  %v4107_v21 = vld [vmem:[%s4736_s27 + $0x3c] sm:$0xff] }
 0x4a5   : > { %v2646_v20 = vadd.f32 1.0, %v4516_v1  ;;  %v4518_v61 = vpop.eup %4517 }
 0x4a6   : > { %4519 = vpow2.f32 %v4100_v6  ;;  %v6248_v40 = vadd.f32 1.0, %v4518_v61  ;;  %v2726_v6 = vadd.f32 %v6090_v53, %v2631_v22  ;;  %v2730_v61 = vunpack.c.l.bf16 %v4096_v56 }
 0x4a7   : > { %4521 = vrcp.f32 %v2646_v20  ;;  %v2659_v60 = vand.u32 2147483648, %v2646_v20  ;;  %v2657_v32 = vand.u32 2147483647, %v2646_v20  ;;  %vm2653_vm5 = vweird.f32 %v2646_v20 }
 0x4a8   : > { %4523 = vpow2.f32 %v4102_v11  ;;  %vm2701_vm13 = vweird.f32 %v6248_v40 }
 0x4a9   : > { %4525 = vrcp.f32 %v6248_v40  ;;  %v2660_v11 = vor.u32 1.1754944e-38, %v2659_v60  ;;  %vm2658_vm7 = vcmp.eq.f32.partialorder %v2657_v32, 8.507059e+37  ;;  %v2633_v60 = vpop.f32.mrf.mxu0  ;;  %v2858_v32 = vrot.slane %v4107_v21, 4 }
 0x4ac   : > { %v4520_v38 = vpop.eup %4519 }
 0x4ad   : > { %v4522_v52 = vpop.eup %4521  ;;  %v6250_v23 = vadd.f32 1.0, %v4520_v38  ;;  %v2861_v38 = vunpack.c.l.bf16 %v2857_v8 }
 0x4ae   : > { %v2649_v16 = vmul.f32 %v4522_v52, %v2646_v20  ;;  %v4524_v10 = vpop.eup %4523  ;;  %vm2654_vm4 = vweird.f32 %v4522_v52  ;;  %v2814_v20 = vunpack.c.l.bf16 %v4107_v21 }
 0x4af   : > { %4527 = vrcp.f32 %v6250_v23  ;;  %v6255_v24 = vadd.f32 1.0, %v4524_v10  ;;  %v6259_v45 = vpop.eup %4525  ;;  %vm2655_vm6 = vmor %vm2653_vm5, %vm2654_vm4  ;;  %v2674_v8 = vand.u32 2147483648, %v6250_v23  ;;  %vm2668_vm9 = vweird.f32 %v6250_v23 }
 0x4b0   : > { %v2650_v50 = vsub.f32 1.0, %v2649_v16  ;;  %vm2702_vm12 = vweird.f32 %v6259_v45 }
 0x4b1   : > { %4529 = vrcp.f32 %v6255_v24  ;;  %v2675_v43 = vor.u32 1.1754944e-38, %v2674_v8  ;;  %vm6289_vm15 = vmor %vm2701_vm13, %vm2702_vm12  ;;  %vm2716_vm0 = vweird.f32 %v6255_v24 }
 0x4b2   : > { %v2651_v35 = vmul.f32 %v4522_v52, %v2650_v50  ;;  %v2780_v44 = vpop.f32.mrf.mxu1 }
 0x4b3   : > { %v2815_v7 = vadd.f32 %v2813_v36, %v2780_v44 }
 0x4b4   : > { %v2652_v12 = vadd.f32 %v4522_v52, %v2651_v35  ;;  %v2697_v35 = vmul.f32 %v6259_v45, %v6248_v40 }
 0x4b5   : > { %v4528_v1 = vpop.eup %4527  ;;  %v4109_v10 = vmul.f32 -1.442695, %v2815_v7 }
 0x4b6   : > { %v2656_v18 = vsel %vm2655_vm6, %v4522_v52, %v2652_v12  ;;  %v2664_v16 = vmul.f32 %v4528_v1, %v6250_v23  ;;  %vm2669_vm8 = vweird.f32 %v4528_v1  ;;  %v2698_v59 = vsub.f32 1.0, %v2697_v35 }
 0x4b7   : > { %v2661_v50 = vsel %vm2658_vm7, %v2660_v11, %v2656_v18  ;;  %v6266_v36 = vpop.eup %4529  ;;  %4531 = vpow2.f32 %v4109_v10  ;;  %v2672_v11 = vand.u32 2147483647, %v6250_v23  ;;  %v2727_v10 = vadd.f32 %v6090_v53, %v2633_v60  ;;  %vm2670_vm10 = vmor %vm2668_vm9, %vm2669_vm8 }
 0x4b8   : > { %v2728_v44 = vmul.f32 %v2726_v6, %v2661_v50  ;;  %v2665_v25 = vsub.f32 1.0, %v2664_v16  ;;  %v2794_v22 = vpop.f32.mrf.mxu2  ;;  %v2712_v52 = vmul.f32 %v6266_v36, %v6255_v24  ;;  %v2699_v35 = vmul.f32 %v6259_v45, %v2698_v59 }
 0x4b9   : > { %v2863_v56 = vadd.f32 %v2861_v38, %v2794_v22  ;;  %vm2673_vm11 = vcmp.eq.f32.partialorder %v2672_v11, 8.507059e+37  ;;  %v2862_v38 = vunpack.c.l.bf16 %v2858_v32  ;;  %v2707_v59 = vand.u32 2147483648, %v6248_v40 }
 0x4ba   : > { %v2732_v12 = vadd.f32 %v2730_v61, %v2728_v44  ;;  %v2666_v7 = vmul.f32 %v4528_v1, %v2665_v25  ;;  %v2782_v18 = vpop.f32.mrf.mxu1  ;;  %v2713_v51 = vsub.f32 1.0, %v2712_v52  ;;  %vm2717_vm14 = vweird.f32 %v6266_v36 }
 0x4bb   : > { %v4111_v6 = vmul.f32 -1.442695, %v2863_v56  ;;  %v2816_v16 = vadd.f32 %v2814_v20, %v2782_v18  ;;  %v2722_v11 = vand.u32 2147483648, %v6255_v24  ;;  %vm6303_vm1 = vmor %vm2716_vm0, %vm2717_vm14 }
 0x4bc   : > { %v2667_v50 = vadd.f32 %v4528_v1, %v2666_v7  ;;  %v2714_v63 = vmul.f32 %v6266_v36, %v2713_v51  ;;  %v2705_v51 = vand.u32 2147483647, %v6248_v40  ;;  %v2720_v7 = vand.u32 2147483647, %v6255_v24 }
 0x4bd   : > { %4533 = vpow2.f32 %v4111_v6  ;;  %v4110_v21 = vmul.f32 -1.442695, %v2816_v16  ;;  %v4532_v61 = vpop.eup %4531 }
 0x4be   : > { %v2671_v25 = vsel %vm2670_vm10, %v4528_v1, %v2667_v50  ;;  %4535 = vtanh.f32 %v2732_v12  ;;  %v6276_v20 = vadd.f32 1.0, %v4532_v61  ;;  %v2700_v1 = vadd.f32 %v6259_v45, %v2699_v35  ;;  %v4106_v35 = vld [vmem:[%s4736_s27 + $0x38] sm:$0xf] }
 0x4bf   : > { %v2676_v44 = vsel %vm2673_vm11, %v2675_v43, %v2671_v25  ;;  %4537 = vpow2.f32 %v4110_v21  ;;  %vm2706_vm2 = vcmp.eq.f32.partialorder %v2705_v51, 8.507059e+37  ;;  %v2723_v61 = vor.u32 1.1754944e-38, %v2722_v11 }
 0x4c0   : > { %v2729_v53 = vmul.f32 %v2727_v10, %v2676_v44  ;;  %v2796_v22 = vpop.f32.mrf.mxu2  ;;  %4539 = vrcp.f32 %v6276_v20  ;;  %v2704_v40 = vsel %vm6289_vm15, %v6259_v45, %v2700_v1  ;;  %v2708_v10 = vor.u32 1.1754944e-38, %v2707_v59 }
 0x4c1   : > { %v2864_v60 = vadd.f32 %v2862_v38, %v2796_v22  ;;  %vm2721_vm3 = vcmp.eq.f32.partialorder %v2720_v7, 8.507059e+37  ;;  %v2836_v44 = vand.u32 2147483648, %v6276_v20  ;;  %vm2830_vm5 = vweird.f32 %v6276_v20 }
 0x4c2   : > { %v2733_v23 = vadd.f32 %v2731_v42, %v2729_v53  ;;  %v2715_v42 = vadd.f32 %v6266_v36, %v2714_v63  ;;  %v2709_v38 = vsel %vm2706_vm2, %v2708_v10, %v2704_v40 }
 0x4c3   : > { %v4534_v8 = vpop.eup %4533  ;;  %v4112_v56 = vmul.f32 -1.442695, %v2864_v60  ;;  %v2837_v12 = vor.u32 1.1754944e-38, %v2836_v44 }
 0x4c4   : > { %v4536_v52 = vpop.eup %4535  ;;  %v6283_v43 = vadd.f32 1.0, %v4534_v8  ;;  %4541 = vtanh.f32 %v2733_v23  ;;  %v2719_v21 = vsel %vm6303_vm1, %v6266_v36, %v2715_v42  ;;  %v2808_v23 = vpop.f32.mrf.mxu3  ;;  %v2834_v36 = vand.u32 2147483647, %v6276_v20 }
 0x4c5   : > { %v4538_v32 = vpop.eup %4537  ;;  %v2736_v16 = vsub.f32 %v6153_v30, %v4536_v52  ;;  %v2724_v8 = vsel %vm2721_vm3, %v2723_v61, %v2719_v21  ;;  %v2903_v7 = vadd.f32 %v6146_v55, %v2808_v23 }
 0x4c6   : > { %4543 = vrcp.f32 %v6283_v43  ;;  %v4540_v18 = vpop.eup %4539  ;;  %v6300_v6 = vadd.f32 1.0, %v4538_v32  ;;  %v2907_v32 = vunpack.c.l.bf16 %v4106_v35  ;;  %vm2835_vm7 = vcmp.eq.f32.partialorder %v2834_v36, 8.507059e+37 }
 0x4c7   : > { %4545 = vpow2.f32 %v4112_v56  ;;  %v2826_v24 = vmul.f32 %v4540_v18, %v6276_v20  ;;  %v2738_v22 = vmul.f32 %v2736_v16, %v2709_v38  ;;  %vm2831_vm4 = vweird.f32 %v4540_v18  ;;  %v2749_v16 = vpop.permute.xlu0 %2748  ;;  %v2746_v20 = vpop.permute.xlu2 %2745 }
 0x4c8   : > { %4547 = vrcp.f32 %v6300_v6  ;;  %vm2832_vm6 = vmor %vm2830_vm5, %vm2831_vm4  ;;  %vm2751_vm8 = vcmp.eq.s32.totalorder %v2749_v16, 1  ;;  %vm2750_vm9 = vcmp.eq.s32.totalorder %v2746_v20, 1  ;;  %vm2845_vm11 = vweird.f32 %v6300_v6 }
 0x4c9   : > { %v2827_v25 = vsub.f32 1.0, %v2826_v24  ;;  %v2740_v11 = vadd.f32 %v4536_v52, %v2738_v22  ;;  %vm2878_vm15 = vweird.f32 %v6283_v43 }
 0x4ca   : > { %v4542_v45 = vpop.eup %4541 }
 0x4cb   : > { %v2737_v53 = vsub.f32 %v6156_v9, %v4542_v45  ;;  %v2828_v60 = vmul.f32 %v4540_v18, %v2827_v25  ;;  %v2851_v25 = vand.u32 2147483648, %v6300_v6  ;;  %v2754_v38 = vsel %vm2750_vm9, %v2740_v11, 0.0 }
 0x4cc   : > { %v6315_v63 = vpop.eup %4543 }
 0x4cd   : > { %v4546_v1 = vpop.eup %4545  ;;  %v2739_v59 = vmul.f32 %v2737_v53, %v2724_v8  ;;  %v2829_v56 = vadd.f32 %v4540_v18, %v2828_v60  ;;  %v2874_v10 = vmul.f32 %v6315_v63, %v6283_v43  ;;  %v4108_v60 = vld [vmem:[%s4736_s27 + $0x44] sm:$0xf]  ;;  %v2849_v8 = vand.u32 2147483647, %v6300_v6 }
 0x4ce   : > { %v6319_v51 = vadd.f32 1.0, %v4546_v1  ;;  %v4548_v42 = vpop.eup %4547  ;;  %vm2879_vm14 = vweird.f32 %v6315_v63 }
 0x4cf   : > { %v2741_v40 = vadd.f32 %v4542_v45, %v2739_v59  ;;  %v2833_v50 = vsel %vm2832_vm6, %v4540_v18, %v2829_v56  ;;  %v2841_v21 = vmul.f32 %v4548_v42, %v6300_v6  ;;  %v6331_v18 = vsel %vm2750_vm9, %v2740_v11, %v6153_v30  ;;  %vm2880_vm0 = vmor %vm2878_vm15, %vm2879_vm14 }
 0x4d0   : > { %4549 = vrcp.f32 %v6319_v51  ;;  %v2838_v24 = vsel %vm2835_vm7, %v2837_v12, %v2833_v50  ;;  %v2875_v44 = vsub.f32 1.0, %v2874_v10  ;;  %vm2846_vm10 = vweird.f32 %v4548_v42 }
 0x4d1   : > { %v2905_v61 = vmul.f32 %v2903_v7, %v2838_v24  ;;  %v6328_v52 = vsel %vm2751_vm8, %v2741_v40, %v6156_v9  ;;  %v2842_v45 = vsub.f32 1.0, %v2841_v21  ;;  %v2755_v35 = vsel %vm2751_vm8, %v2741_v40, 0.0  ;;  %v2810_v9 = vpop.f32.mrf.mxu3  ;;  %vm2847_vm12 = vmor %vm2845_vm11, %vm2846_vm10 }
 0x4d2   : > { %v4257_v22 = vpack.c.bf16 %v2755_v35, %v2754_v38  ;;  %v2947_v23 = vpack.c.bf16 %v6328_v52, %v6331_v18  ;;  %v2876_v56 = vmul.f32 %v6315_v63, %v2875_v44  ;;  %v2908_v12 = vunpack.c.l.bf16 %v4108_v60 }
 0x4d3   : > { %v2909_v53 = vadd.f32 %v2907_v32, %v2905_v61  ;;  %v2843_v36 = vmul.f32 %v4548_v42, %v2842_v45  ;;  %v2852_v32 = vor.u32 1.1754944e-38, %v2851_v25  ;;  %vm2850_vm13 = vcmp.eq.f32.partialorder %v2849_v8, 8.507059e+37  ;;  %v2926_v45 = vpop.permute.xlu2 %2925 }
 0x4d4   : > { %4293 = vst [vmem:[%s4726_s20 + $0x28] sm:$0xff] %v4257_v22   ;;  %2956 = vmatmul.bf16.vlgmr.msrb.gmra.mxu0 %v2947_v23  ;;  %2970 = vmatmul.bf16.vlgmr.msrb.gmra.mxu1 %v2947_v23  ;;  %v2904_v40 = vadd.f32 %v6146_v55, %v2810_v9  ;;  %v2882_v55 = vand.u32 2147483647, %v6283_v43  ;;  %vm2893_vm3 = vweird.f32 %v6319_v51  ;;  %vm2928_vm7 = vcmp.eq.s32.totalorder %v2926_v45, 1 }
 0x4d5   : > { %4551 = vtanh.f32 %v2909_v53  ;;  %v2844_v59 = vadd.f32 %v4548_v42, %v2843_v36  ;;  %2984 = vmatmul.bf16.vlgmr.msrb.gmra.mxu2 %v2947_v23  ;;  %3330 = vmatpush.bf16.msrb.mxu0 %v4939_v34  ;;  %v2877_v34 = vadd.f32 %v6315_v63, %v2876_v56 }
 0x4d6   : > { %v4550_v1 = vpop.eup %4549  ;;  %3478 = vmatpush.bf16.msrb.mxu1 %v4892_v57  ;;  %3492 = vmatpush.bf16.msrb.mxu2 %v5008_v46  ;;  %v2884_v46 = vand.u32 2147483648, %v6283_v43  ;;  %vm2883_vm2 = vcmp.eq.f32.partialorder %v2882_v55, 8.507059e+37  ;;  %v2897_v43 = vand.u32 2147483647, %v6319_v51 }
 0x4d7   : > { %v2889_v30 = vmul.f32 %v4550_v1, %v6319_v51  ;;  %v2848_v11 = vsel %vm2847_vm12, %v4548_v42, %v2844_v59  ;;  %vm2894_vm1 = vweird.f32 %v4550_v1 }
 0x4d8   : > { %v2853_v16 = vsel %vm2850_vm13, %v2852_v32, %v2848_v11  ;;  %vm2895_vm4 = vmor %vm2893_vm3, %vm2894_vm1  ;;  %vm2898_vm5 = vcmp.eq.f32.partialorder %v2897_v43, 8.507059e+37  ;;  %v4116_v43 = vld [vmem:[%s4731_s23 + $0x98] sm:$0xf] }
 0x4d9   : > { %v2890_v7 = vsub.f32 1.0, %v2889_v30  ;;  %v2906_v10 = vmul.f32 %v2904_v40, %v2853_v16  ;;  %3331 = vmatpush.bf16.msrb.mxu0 %v4954_v49  ;;  %v2881_v49 = vsel %vm2880_vm0, %v6315_v63, %v2877_v34 }
 0x4da   : > { %3479 = vmatpush.bf16.msrb.mxu1 %v4901_v2  ;;  %3493 = vmatpush.bf16.msrb.mxu2 %v5033_v5  ;;  %v2885_v2 = vor.u32 1.1754944e-38, %v2884_v46  ;;  %v2899_v5 = vand.u32 2147483648, %v6319_v51 }
 0x4db   : > { %v2891_v6 = vmul.f32 %v4550_v1, %v2890_v7  ;;  %v4552_v57 = vpop.eup %4551  ;;  %v2910_v42 = vadd.f32 %v2908_v12, %v2906_v10 }
 0x4dc   : > { %v2913_v50 = vsub.f32 %v6211_v27, %v4552_v57  ;;  %v2886_v24 = vsel %vm2883_vm2, %v2885_v2, %v2881_v49 }
 0x4dd   : > { %4553 = vtanh.f32 %v2910_v42  ;;  %3332 = vmatpush.bf16.msrb.mxu0 %v4968_v3  ;;  %v2892_v20 = vadd.f32 %v4550_v1, %v2891_v6  ;;  %v4125_v6 = vld [vmem:[%s4736_s27 + $0x18] sm:$0xff] }
 0x4de   : > { %3480 = vmatpush.bf16.msrb.mxu1 %v4911_v13  ;;  %3494 = vmatpush.bf16.msrb.mxu2 %v5049_v31  ;;  %v2915_v3 = vmul.f32 %v2913_v50, %v2886_v24  ;;  %v2900_v31 = vor.u32 1.1754944e-38, %v2899_v5  ;;  %v3211_v50 = vrot.slane %v4125_v6, 4  ;;  %v3167_v45 = vunpack.c.l.bf16 %v4125_v6 }
 0x4df   : > { %v2896_v63 = vsel %vm2895_vm4, %v4550_v1, %v2892_v20  ;;  %v6408_v20 = vld [vmem:[%s4736_s27 + $0x24] sm:$0xff] }
 0x4e0   : > { %v2901_v61 = vsel %vm2898_vm5, %v2900_v31, %v2896_v63  ;;  %v2917_v25 = vadd.f32 %v4552_v57, %v2915_v3  ;;  %v3212_v31 = vrot.slane %v6408_v20, 4 }
 0x4e1   : > { %3333 = vmatpush.bf16.msrb.mxu0 %v4989_v29  ;;  %v2923_v29 = vpop.permute.xlu1 %2922 }
 0x4e2   : > { %3481 = vmatpush.bf16.msrb.mxu1 %v4935_v28  ;;  %3495 = vmatpush.bf16.msrb.mxu2 %v5063_v0  ;;  %vm2927_vm6 = vcmp.eq.s32.totalorder %v2923_v29, 1  ;;  %v3084_v29 = vunpack.c.l.bf16 %v4116_v43 }
 0x4e3   : > { %v4554_v13 = vpop.eup %4553  ;;  %v2931_v0 = vsel %vm2927_vm6, %v2917_v25, 0.0  ;;  %v6370_v35 = vsel %vm2927_vm6, %v2917_v25, %v6211_v27 }
 0x4e4   : > { %v2914_v21 = vsub.f32 %v6214_v33, %v4554_v13 }
 0x4e5   : > { %3334 = vmatpush.bf16.msrb.mxu0 %v5017_v54 }
 0x4e6   : > { %v2916_v51 = vmul.f32 %v2914_v21, %v2901_v61  ;;  %3482 = vmatpush.bf16.msrb.mxu1 %v4949_v41  ;;  %3496 = vmatpush.bf16.msrb.mxu2 %v5077_v37  ;;  %v3215_v61 = vunpack.c.l.bf16 %v3211_v50 }
 0x4e8   : > { %v2918_v28 = vadd.f32 %v4554_v13, %v2916_v51 }
 0x4e9   : > { %3335 = vmatpush.bf16.msrb.mxu0 %v5042_v17  ;;  %v6915_v17 = vld [vmem:[#allocation34_spill] sm:$0xff] }
 0x4ea   : > { %v2932_v38 = vsel %vm2928_vm7, %v2918_v28, 0.0  ;;  %v6373_v54 = vsel %vm2928_vm7, %v2918_v28, %v6214_v33  ;;  %3483 = vmatpush.bf16.msrb.mxu1 %v4964_v58  ;;  %3497 = vmatpush.bf16.msrb.mxu2 %v5091_v4  ;;  %v6914_v58 = vld [vmem:[#allocation33_spill] sm:$0xff]  ;;  %v6919_v4 = vld [vmem:[#allocation42_spill] sm:$0xff] }
 0x4eb   : > { %v4262_v41 = vpack.c.bf16 %v2932_v38, %v2931_v0  ;;  %v3124_v37 = vpack.c.bf16 %v6373_v54, %v6370_v35  ;;  %v6418_v0 = vld [vmem:[%s6639_s5] ss:$0 sm:$0xff] }
 0x4ed   : > { %4294 = vst [vmem:[%s4741_s12 + $0x10] sm:$0xff] %v4262_v41   ;;  %3133 = vmatmul.bf16.vlgmr.msrb.gmra.mxu3 %v3124_v37  ;;  %3147 = vmatmul.bf16.vlgmr.msra.gmra.mxu0 %v3124_v37 }
 0x4ee   : > { %3161 = vmatmul.bf16.vlgmr.msra.gmra.mxu1 %v3124_v37  ;;  %3506 = vmatpush.bf16.msrb.mxu3 %v5011_v48  ;;  %v6916_v48 = vld [vmem:[#allocation37_spill] sm:$0xff] }
 0x4ef   : > { %3336 = vmatpush.bf16.msrb.mxu0 %v5055_v47  ;;  %3484 = vmatpush.bf16.msrb.mxu1 %v4982_v15  ;;  %v6917_v47 = vld [vmem:[#allocation38_spill] sm:$0xff]  ;;  %v6918_v15 = vld [vmem:[#allocation40_spill] sm:$0xff] }
 0x4f0   : > { %3498 = vmatpush.bf16.msrb.mxu2 %v6813_v26  ;;  %v4115_v26 = vld [vmem:[%s4731_s23 + $0x90] sm:$0xff] }
 0x4f1   : > { %v3034_v27 = vrot.slane %v4115_v26, 4  ;;  %v2990_v33 = vunpack.c.l.bf16 %v4115_v26 }
 0x4f2   : > { %3507 = vmatpush.bf16.msrb.mxu3 %v6889_v14  ;;  %v4117_v14 = vld [vmem:[%s4731_s23 + $0x9c] sm:$0xff] }
 0x4f3   : > { %3337 = vmatpush.bf16.msrb.mxu0 %v6814_v39  ;;  %3485 = vmatpush.bf16.msrb.mxu1 %v6816_v62  ;;  %v3038_v39 = vunpack.c.l.bf16 %v3034_v27  ;;  %v3035_v22 = vrot.slane %v4117_v14, 4  ;;  %v2991_v36 = vunpack.c.l.bf16 %v4117_v14 }
 0x4f4   : > { %3499 = vmatpush.bf16.msrb.mxu2 %v6842_v19 }
 0x4f5   : > { %v3039_v8 = vunpack.c.l.bf16 %v3035_v22  ;;  %v4118_v22 = vld [vmem:[%s4731_s23 + $0xa4] sm:$0xf] }
 0x4f6   : > { %3508 = vmatpush.bf16.msrb.mxu3 %v6914_v58 }
 0x4fa   : > { %3509 = vmatpush.bf16.msrb.mxu3 %v6915_v17  ;;  %v3216_v17 = vunpack.c.l.bf16 %v3212_v31 }
 0x4fe   : > { %3510 = vmatpush.bf16.msrb.mxu3 %v6916_v48 }
 0x502   : > { %3511 = vmatpush.bf16.msrb.mxu3 %v6917_v47 }
 0x506   : > { %3512 = vmatpush.bf16.msrb.mxu3 %v6918_v15 }
 0x50a   : > { %3513 = vmatpush.bf16.msrb.mxu3 %v6919_v4 }
 0x551   : > { %v2957_v62 = vpop.f32.mrf.mxu0  ;;  %v2971_v44 = vpop.f32.mrf.mxu1 }
 0x552   : > { %v2992_v19 = vadd.f32 %v2990_v33, %v2957_v62  ;;  %v3040_v53 = vadd.f32 %v3038_v39, %v2971_v44 }
 0x554   : > { %v4119_v23 = vmul.f32 -1.442695, %v2992_v19  ;;  %v4121_v60 = vmul.f32 -1.442695, %v3040_v53 }
 0x556   : > { %4555 = vpow2.f32 %v4119_v23 }
 0x557   : > { %4557 = vpow2.f32 %v4121_v60 }
 0x558   : > { %v2985_v2 = vpop.f32.mrf.mxu2 }
 0x559   : > { %v2959_v1 = vpop.f32.mrf.mxu0  ;;  %v2973_v9 = vpop.f32.mrf.mxu1  ;;  %v3080_v38 = vadd.f32 %v6418_v0, %v2985_v2 }
 0x55a   : > { %v2993_v30 = vadd.f32 %v2991_v36, %v2959_v1  ;;  %v3041_v59 = vadd.f32 %v3039_v8, %v2973_v9 }
 0x55c   : > { %v4556_v56 = vpop.eup %4555  ;;  %v4120_v32 = vmul.f32 -1.442695, %v2993_v30  ;;  %v4122_v11 = vmul.f32 -1.442695, %v3041_v59  ;;  %v3168_v59 = vunpack.c.l.bf16 %v6408_v20 }
 0x55d   : > { %v4558_v12 = vpop.eup %4557  ;;  %v3000_v7 = vadd.f32 1.0, %v4556_v56 }
 0x55e   : > { %v6396_v40 = vadd.f32 1.0, %v4558_v12  ;;  %4559 = vpow2.f32 %v4120_v32  ;;  %v3085_v12 = vunpack.c.l.bf16 %v4118_v22 }
 0x55f   : > { %4561 = vrcp.f32 %v3000_v7  ;;  %v3013_v5 = vand.u32 2147483648, %v3000_v7  ;;  %v3011_v3 = vand.u32 2147483647, %v3000_v7  ;;  %vm3007_vm9 = vweird.f32 %v3000_v7 }
 0x560   : > { %4563 = vpow2.f32 %v4122_v11  ;;  %v2987_v23 = vpop.f32.mrf.mxu2  ;;  %vm3055_vm1 = vweird.f32 %v6396_v40  ;;  %v3061_v6 = vand.u32 2147483648, %v6396_v40  ;;  %v3059_v50 = vand.u32 2147483647, %v6396_v40 }
 0x561   : > { %4565 = vrcp.f32 %v6396_v40  ;;  %v3014_v51 = vor.u32 1.1754944e-38, %v3013_v5  ;;  %vm3012_vm11 = vcmp.eq.f32.partialorder %v3011_v3, 8.507059e+37  ;;  %v3081_v32 = vadd.f32 %v6418_v0, %v2987_v23  ;;  %v4126_v23 = vld [vmem:[%s4736_s27 + $0x20] sm:$0xf] }
 0x562   : > { %vm3060_vm4 = vcmp.eq.f32.partialorder %v3059_v50, 8.507059e+37 }
 0x564   : > { %v4560_v16 = vpop.eup %4559 }
 0x565   : > { %v4562_v10 = vpop.eup %4561  ;;  %v6399_v34 = vadd.f32 1.0, %v4560_v16 }
 0x566   : > { %v3003_v57 = vmul.f32 %v4562_v10, %v3000_v7  ;;  %v4564_v46 = vpop.eup %4563  ;;  %vm3008_vm8 = vweird.f32 %v4562_v10 }
 0x567   : > { %4567 = vrcp.f32 %v6399_v34  ;;  %v6403_v42 = vpop.eup %4565  ;;  %v6405_v49 = vadd.f32 1.0, %v4564_v46  ;;  %vm3009_vm10 = vmor %vm3007_vm9, %vm3008_vm8  ;;  %v3028_v33 = vand.u32 2147483648, %v6399_v34  ;;  %v3026_v44 = vand.u32 2147483647, %v6399_v34 }
 0x568   : > { %v3004_v55 = vsub.f32 1.0, %v3003_v57  ;;  %v3051_v13 = vmul.f32 %v6403_v42, %v6396_v40  ;;  %vm3022_vm13 = vweird.f32 %v6399_v34  ;;  %vm3056_vm0 = vweird.f32 %v6403_v42 }
 0x569   : > { %4569 = vrcp.f32 %v6405_v49  ;;  %v3029_v30 = vor.u32 1.1754944e-38, %v3028_v33  ;;  %vm3027_vm15 = vcmp.eq.f32.partialorder %v3026_v44, 8.507059e+37  ;;  %vm6438_vm2 = vmor %vm3055_vm1, %vm3056_vm0  ;;  %v3076_v40 = vand.u32 2147483648, %v6405_v49 }
 0x56a   : > { %v3005_v24 = vmul.f32 %v4562_v10, %v3004_v55  ;;  %v3148_v63 = vpop.f32.mrf.mxu0  ;;  %v3052_v37 = vsub.f32 1.0, %v3051_v13  ;;  %v3062_v13 = vor.u32 1.1754944e-38, %v3061_v6  ;;  %vm3070_vm5 = vweird.f32 %v6405_v49 }
 0x56b   : > { %v3217_v26 = vadd.f32 %v3215_v61, %v3148_v63 }
 0x56c   : > { %v3006_v21 = vadd.f32 %v4562_v10, %v3005_v24  ;;  %v3053_v53 = vmul.f32 %v6403_v42, %v3052_v37 }
 0x56d   : > { %v4568_v25 = vpop.eup %4567  ;;  %v4131_v1 = vmul.f32 -1.442695, %v3217_v26  ;;  %v3100_v26 = vpop.permute.xlu0 %3099 }
 0x56e   : > { %v3010_v28 = vsel %vm3009_vm10, %v4562_v10, %v3006_v21  ;;  %v3018_v41 = vmul.f32 %v4568_v25, %v6399_v34  ;;  %vm3023_vm12 = vweird.f32 %v4568_v25  ;;  %v3054_v7 = vadd.f32 %v6403_v42, %v3053_v53 }
 0x56f   : > { %v3015_v58 = vsel %vm3012_vm11, %v3014_v51, %v3010_v28  ;;  %v6422_v48 = vpop.eup %4569  ;;  %vm3024_vm14 = vmor %vm3022_vm13, %vm3023_vm12  ;;  %vm3104_vm8 = vcmp.eq.s32.totalorder %v3100_v26, 1 }
 0x570   : > { %v3082_v47 = vmul.f32 %v3080_v38, %v3015_v58  ;;  %v3019_v15 = vsub.f32 1.0, %v3018_v41  ;;  %v3134_v4 = vpop.f32.mrf.mxu3  ;;  %v3066_v27 = vmul.f32 %v6422_v48, %v6405_v49  ;;  %v3058_v43 = vsel %vm6438_vm2, %v6403_v42, %v3054_v7 }
 0x571   : > { %v3169_v39 = vadd.f32 %v3167_v45, %v3134_v4  ;;  %vm3071_vm3 = vweird.f32 %v6422_v48  ;;  %v3063_v61 = vsel %vm3060_vm4, %v3062_v13, %v3058_v43  ;;  %v3074_v42 = vand.u32 2147483647, %v6405_v49 }
 0x572   : > { %v3086_v14 = vadd.f32 %v3084_v29, %v3082_v47  ;;  %v3020_v62 = vmul.f32 %v4568_v25, %v3019_v15  ;;  %v3150_v19 = vpop.f32.mrf.mxu0  ;;  %v3067_v9 = vsub.f32 1.0, %v3066_v27  ;;  %vm3072_vm6 = vmor %vm3070_vm5, %vm3071_vm3  ;;  %v3077_v38 = vor.u32 1.1754944e-38, %v3076_v40 }
 0x573   : > { %v4129_v60 = vmul.f32 -1.442695, %v3169_v39  ;;  %v3218_v36 = vadd.f32 %v3216_v17, %v3150_v19  ;;  %vm3075_vm7 = vcmp.eq.f32.partialorder %v3074_v42, 8.507059e+37 }
 0x574   : > { %4571 = vtanh.f32 %v3086_v14  ;;  %v3021_v8 = vadd.f32 %v4568_v25, %v3020_v62  ;;  %v3068_v57 = vmul.f32 %v6422_v48, %v3067_v9 }
 0x575   : > { %4573 = vpow2.f32 %v4129_v60  ;;  %v4132_v16 = vmul.f32 -1.442695, %v3218_v36  ;;  %v3162_v60 = vpop.f32.mrf.mxu1 }
 0x576   : > { %v3025_v56 = vsel %vm3024_vm14, %v4568_v25, %v3021_v8  ;;  %4575 = vpow2.f32 %v4131_v1  ;;  %v3069_v31 = vadd.f32 %v6422_v48, %v3068_v57 }
 0x577   : > { %v3030_v11 = vsel %vm3027_vm15, %v3029_v30, %v3025_v56  ;;  %4577 = vpow2.f32 %v4132_v16 }
 0x578   : > { %v3083_v10 = vmul.f32 %v3081_v32, %v3030_v11  ;;  %v3136_v34 = vpop.f32.mrf.mxu3  ;;  %v3073_v29 = vsel %vm3072_vm6, %v6422_v48, %v3069_v31  ;;  %v3103_v48 = vpop.permute.xlu1 %3102  ;;  %v6479_v32 = vld [vmem:[%s6640_s6] ss:$0 sm:$0xff] }
 0x579   : > { %v3170_v2 = vadd.f32 %v3168_v59, %v3136_v34  ;;  %v3078_v17 = vsel %vm3075_vm7, %v3077_v38, %v3073_v29  ;;  %vm3105_vm9 = vcmp.eq.s32.totalorder %v3103_v48, 1 }
 0x57a   : > { %v4572_v46 = vpop.eup %4571  ;;  %v3087_v20 = vadd.f32 %v3085_v12, %v3083_v10  ;;  %v3261_v12 = vunpack.c.l.bf16 %v4126_v23 }
 0x57b   : > { %v4574_v5 = vpop.eup %4573  ;;  %v3090_v24 = vsub.f32 %v6331_v18, %v4572_v46  ;;  %v4130_v63 = vmul.f32 -1.442695, %v3170_v2 }
 0x57c   : > { %4579 = vtanh.f32 %v3087_v20  ;;  %v3177_v3 = vadd.f32 1.0, %v4574_v5  ;;  %v4576_v21 = vpop.eup %4575  ;;  %v4128_v5 = vld [vmem:[%s4736_s27 + $0x2c] sm:$0xf] }
 0x57d   : > { %v3092_v25 = vmul.f32 %v3090_v24, %v3063_v61  ;;  %v4578_v51 = vpop.eup %4577  ;;  %v6453_v45 = vadd.f32 1.0, %v4576_v21  ;;  %v3164_v43 = vpop.f32.mrf.mxu1  ;;  %v3262_v40 = vunpack.c.l.bf16 %v4128_v5 }
 0x57e   : > { %4581 = vrcp.f32 %v3177_v3  ;;  %v6457_v4 = vadd.f32 1.0, %v4578_v51  ;;  %v3188_v62 = vand.u32 2147483647, %v3177_v3  ;;  %v3190_v44 = vand.u32 2147483648, %v3177_v3 }
 0x57f   : > { %4583 = vpow2.f32 %v4130_v63  ;;  %v3094_v58 = vadd.f32 %v4572_v46, %v3092_v25  ;;  %vm3184_vm11 = vweird.f32 %v3177_v3  ;;  %v3258_v21 = vadd.f32 %v6479_v32, %v3164_v43 }
 0x580   : > { %4585 = vrcp.f32 %v6453_v45  ;;  %v3191_v30 = vor.u32 1.1754944e-38, %v3190_v44  ;;  %vm3189_vm13 = vcmp.eq.f32.partialorder %v3188_v62, 8.507059e+37  ;;  %vm3232_vm3 = vweird.f32 %v6453_v45 }
 0x581   : > { %v3108_v14 = vsel %vm3104_vm8, %v3094_v58, 0.0  ;;  %v6467_v1 = vsel %vm3104_vm8, %v3094_v58, %v6331_v18  ;;  %v3257_v18 = vadd.f32 %v6479_v32, %v3162_v60  ;;  %vm3247_vm7 = vweird.f32 %v6457_v4 }
 0x582   : > { %v4580_v28 = vpop.eup %4579 }
 0x583   : > { %v3091_v41 = vsub.f32 %v6328_v52, %v4580_v28 }
 0x584   : > { %v4582_v37 = vpop.eup %4581 }
 0x585   : > { %v4584_v47 = vpop.eup %4583  ;;  %v3093_v15 = vmul.f32 %v3091_v41, %v3078_v17  ;;  %v3180_v49 = vmul.f32 %v4582_v37, %v3177_v3  ;;  %vm3185_vm10 = vweird.f32 %v4582_v37  ;;  %v3236_v41 = vand.u32 2147483647, %v6453_v45 }
 0x586   : > { %v3178_v27 = vadd.f32 1.0, %v4584_v47  ;;  %v6463_v36 = vpop.eup %4585  ;;  %vm3186_vm12 = vmor %vm3184_vm11, %vm3185_vm10 }
 0x587   : > { %v3095_v33 = vadd.f32 %v4580_v28, %v3093_v15  ;;  %v3181_v39 = vsub.f32 1.0, %v3180_v49  ;;  %vm3233_vm2 = vweird.f32 %v6463_v36  ;;  %v3238_v28 = vand.u32 2147483648, %v6453_v45 }
 0x588   : > { %4587 = vrcp.f32 %v3178_v27  ;;  %v3205_v50 = vand.u32 2147483648, %v3178_v27  ;;  %v3203_v2 = vand.u32 2147483647, %v3178_v27  ;;  %vm3199_vm15 = vweird.f32 %v3178_v27  ;;  %vm3234_vm4 = vmor %vm3232_vm3, %vm3233_vm2 }
 0x589   : > { %v3109_v19 = vsel %vm3105_vm9, %v3095_v33, 0.0  ;;  %v3182_v53 = vmul.f32 %v4582_v37, %v3181_v39  ;;  %4589 = vrcp.f32 %v6457_v4  ;;  %v6471_v9 = vsel %vm3105_vm9, %v3095_v33, %v6328_v52 }
 0x58a   : > { %v4267_v22 = vpack.c.bf16 %v3109_v19, %v3108_v14  ;;  %v3301_v59 = vpack.c.bf16 %v6471_v9, %v6467_v1  ;;  %v3228_v52 = vmul.f32 %v6463_v36, %v6453_v45  ;;  %v3206_v13 = vor.u32 1.1754944e-38, %v3205_v50  ;;  %v3280_v19 = vpop.permute.xlu0 %3279 }
 0x58b   : > { %v3183_v8 = vadd.f32 %v4582_v37, %v3182_v53  ;;  %vm3204_vm1 = vcmp.eq.f32.partialorder %v3203_v2, 8.507059e+37  ;;  %v3239_v47 = vor.u32 1.1754944e-38, %v3238_v28  ;;  %v3253_v15 = vand.u32 2147483648, %v6457_v4  ;;  %v3277_v53 = vpop.permute.xlu2 %3276 }
 0x58c   : > { %4295 = vst [vmem:[%s4726_s20 + $0x30] sm:$0xff] %v4267_v22   ;;  %3310 = vmatmul.bf16.vlgmr.msra.gmra.mxu2 %v3301_v59  ;;  %3324 = vmatmul.bf16.vlgmr.msra.gmra.mxu3 %v3301_v59  ;;  %v3229_v46 = vsub.f32 1.0, %v3228_v52  ;;  %vm3237_vm6 = vcmp.eq.f32.partialorder %v3236_v41, 8.507059e+37  ;;  %v3251_v49 = vand.u32 2147483647, %v6457_v4  ;;  %vm3282_vm10 = vcmp.eq.s32.totalorder %v3280_v19, 1 }
 0x58d   : > { %v3187_v56 = vsel %vm3186_vm12, %v4582_v37, %v3183_v8  ;;  %3338 = vmatmul.bf16.vlgmr.msrb.gmra.mxu0 %v3301_v59  ;;  %v3254_v33 = vor.u32 1.1754944e-38, %v3253_v15  ;;  %vm3281_vm11 = vcmp.eq.s32.totalorder %v3277_v53, 1  ;;  %v4135_v59 = vld [vmem:[%s4731_s23 + $0xa8] sm:$0xff]  ;;  %v4136_v41 = vld [vmem:[%s4731_s23 + $0xb0] sm:$0xf] }
 0x58e   : > { %v4588_v7 = vpop.eup %4587  ;;  %v3192_v11 = vsel %vm3189_vm13, %v3191_v30, %v3187_v56  ;;  %v3230_v3 = vmul.f32 %v6463_v36, %v3229_v46  ;;  %vm3252_vm9 = vcmp.eq.f32.partialorder %v3251_v49, 8.507059e+37  ;;  %v3388_v56 = vrot.slane %v4135_v59, 4 }
 0x58f   : > { %v4590_v16 = vpop.eup %4589  ;;  %v3259_v10 = vmul.f32 %v3257_v18, %v3192_v11  ;;  %v3195_v34 = vmul.f32 %v4588_v7, %v3178_v27  ;;  %vm3200_vm14 = vweird.f32 %v4588_v7  ;;  %v3344_v18 = vunpack.c.l.bf16 %v4135_v59 }
 0x590   : > { %v3243_v55 = vmul.f32 %v4590_v16, %v6457_v4  ;;  %vm3201_vm0 = vmor %vm3199_vm15, %vm3200_vm14  ;;  %v3231_v25 = vadd.f32 %v6463_v36, %v3230_v3  ;;  %vm3248_vm5 = vweird.f32 %v4590_v16 }
 0x591   : > { %v3263_v6 = vadd.f32 %v3261_v12, %v3259_v10  ;;  %v3196_v57 = vsub.f32 1.0, %v3195_v34  ;;  %vm3249_vm8 = vmor %vm3247_vm7, %vm3248_vm5  ;;  %v3392_v12 = vunpack.c.l.bf16 %v3388_v56 }
 0x592   : > { %v3244_v63 = vsub.f32 1.0, %v3243_v55  ;;  %v3235_v37 = vsel %vm3234_vm4, %v6463_v36, %v3231_v25 }
 0x593   : > { %v3197_v20 = vmul.f32 %v4588_v7, %v3196_v57  ;;  %4591 = vtanh.f32 %v3263_v6  ;;  %v3240_v26 = vsel %vm3237_vm6, %v3239_v47, %v3235_v37 }
 0x594   : > { %v3245_v51 = vmul.f32 %v4590_v16, %v3244_v63 }
 0x595   : > { %v3198_v24 = vadd.f32 %v4588_v7, %v3197_v20 }
 0x596   : > { %v3246_v17 = vadd.f32 %v4590_v16, %v3245_v51 }
 0x597   : > { %v3202_v31 = vsel %vm3201_vm0, %v4588_v7, %v3198_v24  ;;  %v4137_v7 = vld [vmem:[%s4731_s23 + $0xb4] sm:$0xff] }
 0x598   : > { %v3207_v61 = vsel %vm3204_vm1, %v3206_v13, %v3202_v31  ;;  %v3250_v45 = vsel %vm3249_vm8, %v4590_v16, %v3246_v17  ;;  %v3389_v10 = vrot.slane %v4137_v7, 4  ;;  %v3345_v6 = vunpack.c.l.bf16 %v4137_v7 }
 0x599   : > { %v3260_v42 = vmul.f32 %v3258_v21, %v3207_v61  ;;  %v4592_v29 = vpop.eup %4591  ;;  %v3255_v14 = vsel %vm3252_vm9, %v3254_v33, %v3250_v45  ;;  %v3473_v61 = vld [vmem:[%s4736_s27] sm:$0xff]  ;;  %v3438_v45 = vunpack.c.l.bf16 %v4136_v41 }
 0x59a   : > { %v3267_v58 = vsub.f32 %v6370_v35, %v4592_v29  ;;  %v3393_v57 = vunpack.c.l.bf16 %v3389_v10  ;;  %v3564_v17 = vrot.slane %v3473_v61, 4 }
 0x59b   : > { %v3264_v38 = vadd.f32 %v3262_v40, %v3260_v42 }
 0x59c   : > { %v3269_v48 = vmul.f32 %v3267_v58, %v3240_v26  ;;  %v3568_v19 = vunpack.c.l.bf16 %v3564_v17 }
 0x59d   : > { %4593 = vtanh.f32 %v3264_v38  ;;  %v3520_v38 = vunpack.c.l.bf16 %v3473_v61 }
 0x59e   : > { %v3271_v62 = vadd.f32 %v4592_v29, %v3269_v48 }
 0x5a0   : > { %v3285_v4 = vsel %vm3281_vm11, %v3271_v62, 0.0  ;;  %v6500_v60 = vsel %vm3281_vm11, %v3271_v62, %v6370_v35 }
 0x5a3   : > { %v4594_v27 = vpop.eup %4593 }
 0x5a4   : > { %v3268_v39 = vsub.f32 %v6373_v54, %v4594_v27 }
 0x5a6   : > { %v3270_v44 = vmul.f32 %v3268_v39, %v3255_v14  ;;  %v3475_v39 = vld [vmem:[%s4736_s27 + $0xc] sm:$0xff] }
 0x5a7   : > { %v3565_v53 = vrot.slane %v3475_v39, 4  ;;  %v3521_v59 = vunpack.c.l.bf16 %v3475_v39  ;;  %v3454_v39 = vpop.permute.xlu1 %3453 }
 0x5a8   : > { %v3272_v22 = vadd.f32 %v4594_v27, %v3270_v44 }
 0x5a9   : > { %v3569_v10 = vunpack.c.l.bf16 %v3565_v53 }
 0x5aa   : > { %v3286_v23 = vsel %vm3282_vm10, %v3272_v22, 0.0  ;;  %v6503_v36 = vsel %vm3282_vm10, %v3272_v22, %v6373_v54  ;;  %vm3458_vm10 = vcmp.eq.s32.totalorder %v3454_v39, 1 }
 0x5ab   : > { %v4272_v8 = vpack.c.bf16 %v3286_v23, %v3285_v4  ;;  %v3477_v30 = vpack.c.bf16 %v6503_v36, %v6500_v60 }
 0x5ad   : > { %4296 = vst [vmem:[%s4741_s12 + $0x8] sm:$0xff] %v4272_v8   ;;  %3486 = vmatmul.bf16.vlgmr.msrb.gmra.mxu1 %v3477_v30  ;;  %3500 = vmatmul.bf16.vlgmr.msrb.gmra.mxu2 %v3477_v30 }
 0x5ae   : > { %3514 = vmatmul.bf16.vlgmr.msrb.gmra.mxu3 %v3477_v30 }
 0x60a   : > { %v3339_v13 = vpop.f32.mrf.mxu0 }
 0x60b   : > { %v3434_v26 = vadd.f32 %v6418_v0, %v3339_v13 }
 0x60f   : > { %v3311_v52 = vpop.f32.mrf.mxu2  ;;  %v3325_v11 = vpop.f32.mrf.mxu3 }
 0x610   : > { %v3346_v35 = vadd.f32 %v3344_v18, %v3311_v52  ;;  %v3394_v16 = vadd.f32 %v3392_v12, %v3325_v11 }
 0x612   : > { %v4139_v54 = vmul.f32 -1.442695, %v3346_v35  ;;  %v4141_v34 = vmul.f32 -1.442695, %v3394_v16  ;;  %v3341_v27 = vpop.f32.mrf.mxu0 }
 0x613   : > { %v3435_v30 = vadd.f32 %v6418_v0, %v3341_v27 }
 0x614   : > { %4595 = vpow2.f32 %v4139_v54 }
 0x615   : > { %4597 = vpow2.f32 %v4141_v34 }
 0x617   : > { %v3313_v46 = vpop.f32.mrf.mxu2  ;;  %v3327_v55 = vpop.f32.mrf.mxu3 }
 0x618   : > { %v3347_v50 = vadd.f32 %v3345_v6, %v3313_v46  ;;  %v3395_v20 = vadd.f32 %v3393_v57, %v3327_v55  ;;  %v4138_v57 = vld [vmem:[%s4731_s23 + $0xbc] sm:$0xf] }
 0x61a   : > { %v4596_v2 = vpop.eup %4595  ;;  %v4140_v5 = vmul.f32 -1.442695, %v3347_v50  ;;  %v4142_v3 = vmul.f32 -1.442695, %v3395_v20 }
 0x61b   : > { %v4598_v43 = vpop.eup %4597  ;;  %v3354_v24 = vadd.f32 1.0, %v4596_v2 }
 0x61c   : > { %v6510_v63 = vadd.f32 1.0, %v4598_v43  ;;  %4599 = vpow2.f32 %v4140_v5 }
 0x61d   : > { %4601 = vrcp.f32 %v3354_v24  ;;  %v3367_v37 = vand.u32 2147483648, %v3354_v24  ;;  %v3365_v15 = vand.u32 2147483647, %v3354_v24  ;;  %vm3361_vm13 = vweird.f32 %v3354_v24 }
 0x61e   : > { %4603 = vrcp.f32 %v6510_v63  ;;  %vm3409_vm1 = vweird.f32 %v6510_v63 }
 0x61f   : > { %4605 = vpow2.f32 %v4142_v3  ;;  %v3368_v62 = vor.u32 1.1754944e-38, %v3367_v37  ;;  %vm3366_vm15 = vcmp.eq.f32.partialorder %v3365_v15, 8.507059e+37  ;;  %v3415_v3 = vand.u32 2147483648, %v6510_v63 }
 0x621   : > { %v3416_v37 = vor.u32 1.1754944e-38, %v3415_v3 }
 0x622   : > { %v4600_v31 = vpop.eup %4599 }
 0x623   : > { %v4602_v21 = vpop.eup %4601  ;;  %v6513_v40 = vadd.f32 1.0, %v4600_v31  ;;  %v3439_v31 = vunpack.c.l.bf16 %v4138_v57 }
 0x624   : > { %v6516_v42 = vpop.eup %4603  ;;  %v3357_v25 = vmul.f32 %v4602_v21, %v3354_v24  ;;  %vm3362_vm12 = vweird.f32 %v4602_v21 }
 0x625   : > { %v4606_v51 = vpop.eup %4605  ;;  %4607 = vrcp.f32 %v6513_v40  ;;  %v3405_v58 = vmul.f32 %v6516_v42, %v6510_v63  ;;  %vm3363_vm14 = vmor %vm3361_vm13, %vm3362_vm12  ;;  %v3382_v7 = vand.u32 2147483648, %v6513_v40  ;;  %v3380_v0 = vand.u32 2147483647, %v6513_v40 }
 0x626   : > { %v3358_v29 = vsub.f32 1.0, %v3357_v25  ;;  %v6519_v28 = vadd.f32 1.0, %v4606_v51  ;;  %vm3410_vm2 = vweird.f32 %v6516_v42  ;;  %vm3376_vm3 = vweird.f32 %v6513_v40 }
 0x627   : > { %v3406_v44 = vsub.f32 1.0, %v3405_v58  ;;  %v3383_v20 = vor.u32 1.1754944e-38, %v3382_v7  ;;  %vm3381_vm5 = vcmp.eq.f32.partialorder %v3380_v0, 8.507059e+37  ;;  %vm3411_vm6 = vmor %vm3409_vm1, %vm3410_vm2 }
 0x628   : > { %v3359_v47 = vmul.f32 %v4602_v21, %v3358_v29  ;;  %4609 = vrcp.f32 %v6519_v28  ;;  %vm3424_vm9 = vweird.f32 %v6519_v28  ;;  %v3430_v27 = vand.u32 2147483648, %v6519_v28 }
 0x629   : > { %v3407_v11 = vmul.f32 %v6516_v42, %v3406_v44 }
 0x62a   : > { %v3487_v49 = vpop.f32.mrf.mxu1  ;;  %v3360_v48 = vadd.f32 %v4602_v21, %v3359_v47 }
 0x62b   : > { %v3522_v33 = vadd.f32 %v3520_v38, %v3487_v49  ;;  %v4608_v14 = vpop.eup %4607  ;;  %v3408_v2 = vadd.f32 %v6516_v42, %v3407_v11 }
 0x62c   : > { %v3364_v22 = vsel %vm3363_vm14, %v4602_v21, %v3360_v48  ;;  %v3372_v4 = vmul.f32 %v4608_v14, %v6513_v40  ;;  %vm3377_vm0 = vweird.f32 %v4608_v14  ;;  %v3413_v21 = vand.u32 2147483647, %v6510_v63 }
 0x62d   : > { %v4145_v23 = vmul.f32 -1.442695, %v3522_v33  ;;  %v3369_v8 = vsel %vm3366_vm15, %v3368_v62, %v3364_v22  ;;  %vm3378_vm4 = vmor %vm3376_vm3, %vm3377_vm0  ;;  %v3412_v29 = vsel %vm3411_vm6, %v6516_v42, %v3408_v2  ;;  %v3428_v62 = vand.u32 2147483647, %v6519_v28 }
 0x62e   : > { %v6529_v56 = vpop.eup %4609  ;;  %v3436_v18 = vmul.f32 %v3434_v26, %v3369_v8  ;;  %v3373_v12 = vsub.f32 1.0, %v3372_v4  ;;  %vm3414_vm7 = vcmp.eq.f32.partialorder %v3413_v21, 8.507059e+37 }
 0x62f   : > { %4611 = vpow2.f32 %v4145_v23  ;;  %v3420_v35 = vmul.f32 %v6529_v56, %v6519_v28  ;;  %v3417_v49 = vsel %vm3414_vm7, %v3416_v37, %v3412_v29  ;;  %vm3425_vm8 = vweird.f32 %v6529_v56  ;;  %v3457_v28 = vpop.permute.xlu2 %3456 }
 0x630   : > { %v3501_v52 = vpop.f32.mrf.mxu2  ;;  %v3440_v54 = vadd.f32 %v3438_v45, %v3436_v18  ;;  %v3374_v34 = vmul.f32 %v4608_v14, %v3373_v12  ;;  %vm3426_vm11 = vmor %vm3424_vm9, %vm3425_vm8  ;;  %v3431_v23 = vor.u32 1.1754944e-38, %v3430_v27  ;;  %vm3429_vm12 = vcmp.eq.f32.partialorder %v3428_v62, 8.507059e+37 }
 0x631   : > { %v3570_v16 = vadd.f32 %v3568_v19, %v3501_v52  ;;  %v3421_v5 = vsub.f32 1.0, %v3420_v35  ;;  %vm3459_vm14 = vcmp.eq.s32.totalorder %v3457_v28, 1 }
 0x632   : > { %v3489_v6 = vpop.f32.mrf.mxu1  ;;  %4613 = vtanh.f32 %v3440_v54  ;;  %v3375_v50 = vadd.f32 %v4608_v14, %v3374_v34 }
 0x633   : > { %v4147_v46 = vmul.f32 -1.442695, %v3570_v16  ;;  %v3523_v55 = vadd.f32 %v3521_v59, %v3489_v6  ;;  %v3422_v38 = vmul.f32 %v6529_v56, %v3421_v5  ;;  %v3515_v16 = vpop.f32.mrf.mxu3 }
 0x634   : > { %v3379_v13 = vsel %vm3378_vm4, %v4608_v14, %v3375_v50  ;;  %v3610_v50 = vadd.f32 %v6479_v32, %v3515_v16 }
 0x635   : > { %4615 = vpow2.f32 %v4147_v46  ;;  %v4146_v43 = vmul.f32 -1.442695, %v3523_v55  ;;  %v4612_v24 = vpop.eup %4611  ;;  %v3384_v61 = vsel %vm3381_vm5, %v3383_v20, %v3379_v13  ;;  %v3423_v42 = vadd.f32 %v6529_v56, %v3422_v38  ;;  %v3476_v38 = vld [vmem:[%s4736_s27 + $0x14] sm:$0xf] }
 0x636   : > { %v6543_v25 = vadd.f32 1.0, %v4612_v24  ;;  %v3437_v40 = vmul.f32 %v3435_v30, %v3384_v61 }
 0x637   : > { %4617 = vpow2.f32 %v4146_v43  ;;  %v3427_v22 = vsel %vm3426_vm11, %v6529_v56, %v3423_v42 }
 0x638   : > { %v3503_v51 = vpop.f32.mrf.mxu2  ;;  %4619 = vrcp.f32 %v6543_v25  ;;  %v4614_v41 = vpop.eup %4613  ;;  %v3441_v58 = vadd.f32 %v3439_v31, %v3437_v40  ;;  %v3543_v59 = vand.u32 2147483648, %v6543_v25  ;;  %v3432_v12 = vsel %vm3429_vm12, %v3431_v23, %v3427_v22 }
 0x639   : > { %v3571_v17 = vadd.f32 %v3569_v10, %v3503_v51  ;;  %v3444_v15 = vsub.f32 %v6467_v1, %v4614_v41  ;;  %v3541_v56 = vand.u32 2147483647, %v6543_v25  ;;  %vm3537_vm15 = vweird.f32 %v6543_v25  ;;  %v3630_v22 = vpop.permute.xlu0 %3629 }
 0x63a   : > { %4621 = vtanh.f32 %v3441_v58  ;;  %v3544_v6 = vor.u32 1.1754944e-38, %v3543_v59 }
 0x63b   : > { %v4616_v47 = vpop.eup %4615  ;;  %v4148_v26 = vmul.f32 -1.442695, %v3571_v17  ;;  %v3446_v45 = vmul.f32 %v3444_v15, %v3417_v49  ;;  %vm3542_vm1 = vcmp.eq.f32.partialorder %v3541_v56, 8.507059e+37  ;;  %v3517_v58 = vpop.f32.mrf.mxu3 }
 0x63c   : > { %v6553_v63 = vadd.f32 1.0, %v4616_v47  ;;  %v3611_v27 = vadd.f32 %v6479_v32, %v3517_v58 }
 0x63d   : > { %v4618_v48 = vpop.eup %4617  ;;  %v3448_v14 = vadd.f32 %v4614_v41, %v3446_v45 }
 0x63e   : > { %4623 = vrcp.f32 %v6553_v63  ;;  %v4620_v33 = vpop.eup %4619  ;;  %v6561_v44 = vadd.f32 1.0, %v4618_v48  ;;  %vm3585_vm4 = vweird.f32 %v6553_v63  ;;  %v3591_v37 = vand.u32 2147483648, %v6553_v63 }
 0x63f   : > { %4625 = vpow2.f32 %v4148_v26  ;;  %v3533_v19 = vmul.f32 %v4620_v33, %v6543_v25  ;;  %v6566_v53 = vsel %vm3458_vm10, %v3448_v14, %v6467_v1  ;;  %v3474_v1 = vld [vmem:[%s4736_s27 + $0x8] sm:$0xf]  ;;  %vm3538_vm13 = vweird.f32 %v4620_v33 }
 0x640   : > { %v4622_v4 = vpop.eup %4621  ;;  %3644 = vst [vmem:[#allocation5] sm:$0xff] %v6566_v53  ;;  %4627 = vrcp.f32 %v6561_v44  ;;  %vm3539_vm0 = vmor %vm3537_vm15, %vm3538_vm13  ;;  %v3614_v57 = vunpack.c.l.bf16 %v3474_v1  ;;  %v3462_v20 = vsel %vm3458_vm10, %v3448_v14, 0.0  ;;  %v3558_v40 = vand.u32 2147483648, %v6561_v44 }
 0x641   : > { %v3534_v8 = vsub.f32 1.0, %v3533_v19  ;;  %v3445_v30 = vsub.f32 %v6471_v9, %v4622_v4  ;;  %v3589_v47 = vand.u32 2147483647, %v6553_v63  ;;  %vm3552_vm6 = vweird.f32 %v6561_v44 }
 0x642   : > { %v3559_v26 = vor.u32 1.1754944e-38, %v3558_v40  ;;  %v3615_v48 = vunpack.c.l.bf16 %v3476_v38  ;;  %v3592_v39 = vor.u32 1.1754944e-38, %v3591_v37  ;;  %vm3634_vm10 = vcmp.eq.s32.totalorder %v3630_v22, 1 }
 0x643   : > { %v3535_v7 = vmul.f32 %v4620_v33, %v3534_v8  ;;  %v3447_v11 = vmul.f32 %v3445_v30, %v3432_v12  ;;  %vm3590_vm9 = vcmp.eq.f32.partialorder %v3589_v47, 8.507059e+37 }
 0x644   : > { %v6573_v18 = vpop.eup %4623 }
 0x645   : > { %v4626_v52 = vpop.eup %4625  ;;  %v3581_v35 = vmul.f32 %v6573_v18, %v6553_v63  ;;  %v3536_v10 = vadd.f32 %v4620_v33, %v3535_v7  ;;  %v3449_v34 = vadd.f32 %v4622_v4, %v3447_v11  ;;  %vm3586_vm2 = vweird.f32 %v6573_v18 }
 0x646   : > { %v6580_v54 = vadd.f32 1.0, %v4626_v52  ;;  %v4628_v46 = vpop.eup %4627  ;;  %vm6602_vm5 = vmor %vm3585_vm4, %vm3586_vm2  ;;  %v3633_v52 = vpop.permute.xlu1 %3632 }
 0x647   : > { %v3582_v0 = vsub.f32 1.0, %v3581_v35  ;;  %v3540_v55 = vsel %vm3539_vm0, %v4620_v33, %v3536_v10  ;;  %v6587_v2 = vsel %vm3459_vm14, %v3449_v34, %v6471_v9  ;;  %v3463_v5 = vsel %vm3459_vm14, %v3449_v34, 0.0 }
 0x648   : > { %4629 = vrcp.f32 %v6580_v54  ;;  %v3545_v43 = vsel %vm3542_vm1, %v3544_v6, %v3540_v55  ;;  %v4277_v24 = vpack.c.bf16 %v3463_v5, %v3462_v20  ;;  %3645 = vst [vmem:[#allocation5 + $0x8] sm:$0xff] %v6587_v2  ;;  %v3548_v31 = vmul.f32 %v4628_v46, %v6561_v44 }
 0x649   : > { %v3612_v3 = vmul.f32 %v3610_v50, %v3545_v43  ;;  %v3583_v13 = vmul.f32 %v6573_v18, %v3582_v0  ;;  %v3556_v9 = vand.u32 2147483647, %v6561_v44  ;;  %vm3553_vm3 = vweird.f32 %v4628_v46 }
 0x64a   : > { %4297 = vst [vmem:[%s4726_s20 + $0x38] sm:$0xff] %v4277_v24   ;;  %v3549_v61 = vsub.f32 1.0, %v3548_v31  ;;  %vm3554_vm7 = vmor %vm3552_vm6, %vm3553_vm3  ;;  %v3606_v30 = vand.u32 2147483648, %v6580_v54  ;;  %vm3600_vm12 = vweird.f32 %v6580_v54  ;;  %v3604_v59 = vand.u32 2147483647, %v6580_v54 }
 0x64b   : > { %v3616_v21 = vadd.f32 %v3614_v57, %v3612_v3  ;;  %v3584_v51 = vadd.f32 %v6573_v18, %v3583_v13  ;;  %vm3557_vm8 = vcmp.eq.f32.partialorder %v3556_v9, 8.507059e+37  ;;  %vm3635_vm15 = vcmp.eq.s32.totalorder %v3633_v52, 1 }
 0x64c   : > { %v3550_v41 = vmul.f32 %v4628_v46, %v3549_v61  ;;  %v3607_v1 = vor.u32 1.1754944e-38, %v3606_v30  ;;  %vm3605_vm14 = vcmp.eq.f32.partialorder %v3604_v59, 8.507059e+37 }
 0x64d   : > { %4631 = vtanh.f32 %v3616_v21  ;;  %v3588_v45 = vsel %vm6602_vm5, %v6573_v18, %v3584_v51 }
 0x64e   : > { %v4630_v25 = vpop.eup %4629  ;;  %v3551_v15 = vadd.f32 %v4628_v46, %v3550_v41  ;;  %v3593_v44 = vsel %vm3590_vm9, %v3592_v39, %v3588_v45 }
 0x64f   : > { %v3596_v29 = vmul.f32 %v4630_v25, %v6580_v54  ;;  %vm3601_vm11 = vweird.f32 %v4630_v25 }
 0x650   : > { %v3555_v42 = vsel %vm3554_vm7, %v4628_v46, %v3551_v15  ;;  %vm3602_vm13 = vmor %vm3600_vm12, %vm3601_vm11 }
 0x651   : > { %v3597_v49 = vsub.f32 1.0, %v3596_v29  ;;  %v3560_v14 = vsel %vm3557_vm8, %v3559_v26, %v3555_v42 }
 0x652   : > { %v3613_v62 = vmul.f32 %v3611_v27, %v3560_v14 }
 0x653   : > { %v4632_v33 = vpop.eup %4631  ;;  %v3598_v19 = vmul.f32 %v4630_v25, %v3597_v49 }
 0x654   : > { %v3620_v63 = vsub.f32 %v6500_v60, %v4632_v33  ;;  %v3617_v23 = vadd.f32 %v3615_v48, %v3613_v62 }
 0x655   : > { %v3599_v28 = vadd.f32 %v4630_v25, %v3598_v19 }
 0x656   : > { %v3622_v4 = vmul.f32 %v3620_v63, %v3593_v44  ;;  %4633 = vtanh.f32 %v3617_v23 }
 0x657   : > { %v3603_v18 = vsel %vm3602_vm13, %v4630_v25, %v3599_v28 }
 0x658   : > { %v3624_v8 = vadd.f32 %v4632_v33, %v3622_v4  ;;  %v3608_v56 = vsel %vm3605_vm14, %v3607_v1, %v3603_v18 }
 0x65a   : > { %v3636_v32 = vsel %vm3634_vm10, %v3624_v8, %v6500_v60  ;;  %v3638_v60 = vsel %vm3634_vm10, %v3624_v8, 0.0 }
 0x65b   : > { %3646 = vst [vmem:[#allocation6 + $0x8] sm:$0xff] %v3636_v32 }
 0x65c   : > { %v4634_v12 = vpop.eup %4633 }
 0x65d   : > { %v3621_v7 = vsub.f32 %v6503_v36, %v4634_v12 }
 0x65f   : > { %v3623_v11 = vmul.f32 %v3621_v7, %v3608_v56 }
 0x661   : > { %v3625_v35 = vadd.f32 %v4634_v12, %v3623_v11 }
 0x662   : > { %3651 = sbr.rel (%p4149_p6) target bundleno = 1643 (0x66b), region = 86 }
 0x663   : > { %v3637_v16 = vsel %vm3635_vm15, %v3625_v35, %v6503_v36  ;;  %v3639_v10 = vsel %vm3635_vm15, %v3625_v35, 0.0 }
 0x664   : > { %v4282_v34 = vpack.c.bf16 %v3639_v10, %v3638_v60  ;;  %3647 = vst [vmem:[#allocation6] sm:$0xff] %v3637_v16 }
 0x666   : > { %4283 = vst [vmem:[%s4741_s12] sm:$0xff] %v4282_v34  }
 0x667   : > { %v3652_v54 = vadd.f32 %v3636_v32, %v6566_v53  ;;  %v3653_v0 = vadd.f32 %v3637_v16, %v6587_v2 }
 0x669   : > { %3654 = vst [vmem:[%s6643_s9] sm:$0xff] %v3652_v54 }
 0x66a   : > { %3655 = vst [vmem:[%s6643_s9 + $0x8] sm:$0xff] %v3653_v0 }
 0x66b PF: > { %s20_s30 = sadd.s32 1, %s4653_s30  }
 0x66c   : > { %p17_p7 = scmp.ge.s32.totalorder %s20_s30, 4  }
 0x66e   :  { %19 = sbr.rel (!%p17_p7) target bundleno = 1 (0x1), region = 177 }
 0x673   :  { %3708 = vsyncmov [#allocation4] }
 0x676   :  { %s3709_s10 = vpop.sfrf %3708 }
 0x677   :  { %p4152_p8 = scmp.ne.s32.totalorder %s3709_s10, 0 }
 0x679   :  { %3713 = shalt.err (%p4152_p8)  }
 0x67a   :  { %3715 = vsyncmov [#allocation4 + $0x1] }
 0x67d   :  { %s3716_s12 = vpop.sfrf %3715 }
 0x67e   :  { %p4153_p9 = scmp.ne.s32.totalorder %s3716_s12, 0 }
 0x680   :  { %3720 = shalt.err (%p4153_p9)  }

</bundles_post_ra>
